<compile_context>
chip_gen: v7x
topology: tpu7x:2x2x1
jax: 0.10.0
libtpu: 0.0.40
codegen_flags: <defaults>
</compile_context>

<pallas_src>
import math

import jax
import jax.numpy as jnp
from jax import lax
from jax.experimental import pallas as pl
from jax.experimental.pallas import tpu as pltpu


# ----------------------------------------------------------------------------
# small helpers
# ----------------------------------------------------------------------------
def _round_up(x, m):
    return ((x + m - 1) // m) * m


def _row_tiling(M, max_rows=512):
    """Pick (tm, Mp, grid_m): tm multiple of 8, Mp = tm * grid_m >= M, minimal padding."""
    Mp8 = _round_up(max(M, 1), 8)
    if Mp8 <= max_rows:
        return Mp8, Mp8, 1
    n = -(-Mp8 // max_rows)                 # number of row tiles
    tm = _round_up(-(-Mp8 // n), 8)         # rows per tile, multiple of 8
    return tm, tm * n, n


# ----------------------------------------------------------------------------
# Pallas kernels
# ----------------------------------------------------------------------------
def _gemm_kernel(a_ref, b_ref, o_ref):
    # single K step; bf16 MXU matmul, f32 accumulate
    o_ref[...] = jnp.dot(a_ref[...].astype(jnp.bfloat16), b_ref[...],
                         preferred_element_type=jnp.float32)


def _bnrelu_gemm_kernel(a_ref, s_ref, t_ref, b_ref, o_ref):
    # fused BatchNorm(scale/shift) + ReLU prologue (f32) followed by bf16 MXU matmul
    a = jnp.maximum(a_ref[...] * s_ref[...] + t_ref[...], 0.0)
    o_ref[...] = jnp.dot(a.astype(jnp.bfloat16), b_ref[...],
                         preferred_element_type=jnp.float32)


def pallas_gemm(a, b, scale=None, shift=None, max_rows=512):
    """a: (M, K); b: (K, N) bf16 weights, pre-reshaped at build time.

    If scale/shift (shape (K,)) are given, computes relu(a*scale + shift) @ b
    (BN+ReLU fused into the GEMM prologue).  K and N are never padded; only M
    is rounded up to a multiple of 8.  Returns f32 (M, N)."""
    M, K = a.shape
    K2, N = b.shape
    assert K == K2, (K, K2)
    tm, Mp, grid_m = _row_tiling(M, max_rows)
    if Mp != M:
        a = jnp.pad(a, ((0, Mp - M), (0, 0)))

    a_spec = pl.BlockSpec((tm, K), lambda i: (i, 0))
    b_spec = pl.BlockSpec((K, N), lambda i: (0, 0))      # weights resident across M tiles
    o_spec = pl.BlockSpec((tm, N), lambda i: (i, 0))

    if scale is None:
        kernel = _gemm_kernel
        args = (a, b)
        in_specs = [a_spec, b_spec]
    else:
        kernel = _bnrelu_gemm_kernel
        s = scale.reshape(1, K).astype(jnp.float32)
        t = shift.reshape(1, K).astype(jnp.float32)
        v_spec = pl.BlockSpec((1, K), lambda i: (0, 0))
        args = (a, s, t, b)
        in_specs = [a_spec, v_spec, v_spec, b_spec]

    out = pl.pallas_call(
        kernel,
        out_shape=jax.ShapeDtypeStruct((Mp, N), jnp.float32),
        grid=(grid_m,),
        in_specs=in_specs,
        out_specs=o_spec,
        compiler_params=pltpu.CompilerParams(
            dimension_semantics=("parallel",)),
    )(*args)
    return out[:M] if Mp != M else out


def _scale_shift_relu_kernel(x_ref, s_ref, t_ref, o_ref):
    o_ref[...] = jnp.maximum(x_ref[...] * s_ref[...] + t_ref[...], 0.0)


def pallas_scale_shift_relu(x2, scale, shift, max_rows=512):
    """x2: (M, C); scale/shift: (C,). relu(x*scale + shift); no channel padding."""
    M, C = x2.shape
    tm, Mp, grid_m = _row_tiling(M, max_rows)
    xp = jnp.pad(x2, ((0, Mp - M), (0, 0))) if Mp != M else x2
    out = pl.pallas_call(
        _scale_shift_relu_kernel,
        out_shape=jax.ShapeDtypeStruct((Mp, C), jnp.float32),
        grid=(grid_m,),
        in_specs=[
            pl.BlockSpec((tm, C), lambda i: (i, 0)),
            pl.BlockSpec((1, C), lambda i: (0, 0)),
            pl.BlockSpec((1, C), lambda i: (0, 0)),
        ],
        out_specs=pl.BlockSpec((tm, C), lambda i: (i, 0)),
        compiler_params=pltpu.CompilerParams(
            dimension_semantics=("parallel",)),
    )(xp.astype(jnp.float32),
      scale.reshape(1, C).astype(jnp.float32),
      shift.reshape(1, C).astype(jnp.float32))
    return out[:M] if Mp != M else out


# ----------------------------------------------------------------------------
# Model building blocks (NHWC)
# ----------------------------------------------------------------------------
def bn_scale_shift(x2, gamma, beta, eps=1e-5):
    """Training-mode BatchNorm folded to per-channel scale/shift.
    Single-pass batch stats (biased variance), computed in f32."""
    x2 = x2.astype(jnp.float32)
    mean = jnp.mean(x2, axis=0)
    mean_sq = jnp.mean(x2 * x2, axis=0)
    var = jnp.maximum(mean_sq - mean * mean, 0.0)
    scale = gamma / jnp.sqrt(var + eps)
    shift = beta - mean * scale
    return scale, shift


def im2col(x, kh, kw, stride, pad, out_dtype=jnp.bfloat16):
    """x: (N, H, W, C) -> ((N*OH*OW, kh*kw*C) in out_dtype, (N, OH, OW))."""
    if pad > 0:
        x = jnp.pad(x, ((0, 0), (pad, pad), (pad, pad), (0, 0)))
    n, h, w, c = x.shape
    oh = (h - kh) // stride + 1
    ow = (w - kw) // stride + 1
    cols = []
    for i in range(kh):
        for j in range(kw):
            cols.append(x[:, i:i + stride * oh:stride, j:j + stride * ow:stride, :])
    patches = jnp.stack(cols, axis=3).astype(out_dtype)   # (N, OH, OW, kh*kw, C)
    # TODO(synk): an implicit-GEMM gather (Element/scalar-prefetch BlockSpec) would avoid
    # materializing the patch tensor in HBM; patch tensors here are <1 MB so this is minor.
    return patches.reshape(n * oh * ow, kh * kw * c), (n, oh, ow)


def conv2d_kxk(x, w_kn, kh, kw, stride=1, pad=0):
    """Bias-free conv: NHWC x, weights pre-reshaped to (kh*kw*cin, cout) bf16."""
    patches, (n, oh, ow) = im2col(x, kh, kw, stride, pad)
    out = pallas_gemm(patches, w_kn)
    return out.reshape(n, oh, ow, w_kn.shape[1])


def bn_relu(x, gamma, beta):
    """Standalone fused scale/shift + ReLU (used when the consumer is a padded conv)."""
    n, h, w, c = x.shape
    x2 = x.reshape(-1, c)
    s, t = bn_scale_shift(x2, gamma, beta)
    return pallas_scale_shift_relu(x2, s, t).reshape(n, h, w, c)


def bn_relu_conv1x1(x, gamma, beta, w_kn):
    """BN + ReLU fused into the 1x1-conv GEMM prologue (no im2col, no zero padding)."""
    n, h, w, c = x.shape
    x2 = x.reshape(-1, c).astype(jnp.float32)
    s, t = bn_scale_shift(x2, gamma, beta)
    out = pallas_gemm(x2, w_kn, s, t)
    return out.reshape(n, h, w, w_kn.shape[1])


def max_pool(x, k, s, p):
    return lax.reduce_window(x, -jnp.inf, lax.max,
                             (1, k, k, 1), (1, s, s, 1),
                             [(0, 0), (p, p), (p, p), (0, 0)])


def avg_pool(x, k, s):
    summed = lax.reduce_window(x, 0.0, lax.add,
                               (1, k, k, 1), (1, s, s, 1), 'VALID')
    return summed / float(k * k)


def sparsenet_exponential_fetch(lst):
    return [lst[len(lst) - 2 ** i]
            for i in range(1 + math.floor(math.log(len(lst), 2)))]


def sparse_block_forward(x, p):
    # pre_conv1x1_block: BN -> ReLU -> conv1x1   (fused into a single GEMM kernel)
    x = bn_relu_conv1x1(x, p['bn1_g'], p['bn1_b'], p['w1'])
    # pre_conv3x3_block: BN -> ReLU -> conv3x3 (pad 1)
    x = bn_relu(x, p['bn2_g'], p['bn2_b'])
    x = conv2d_kxk(x, p['w2'], 3, 3, stride=1, pad=1)
    # dropout_rate = 0.0 -> identity
    return x


def sparse_stage_forward(x, sp, do_transition):
    if do_transition:
        t = sp['trans']
        x = bn_relu_conv1x1(x, t['g'], t['b'], t['w'])   # transition (fused) + avgpool
        x = avg_pool(x, 2, 2)
    outs = [x]
    for bp in sp['blocks']:
        y = sparse_block_forward(x, bp)
        outs.append(y)
        flt_outs = sparsenet_exponential_fetch(outs)
        x = jnp.concatenate(flt_outs, axis=-1)           # channel concat (dim=1 in NCHW)
    return x


def sparsenet_forward(params, x_nchw):
    x = jnp.transpose(x_nchw, (0, 2, 3, 1)).astype(jnp.float32)   # NCHW -> NHWC
    # PreResInitBlock: conv7x7 s2 p3 -> BN -> ReLU -> maxpool3x3 s2 p1
    ib = params['init']
    x = conv2d_kxk(x, ib['w'], 7, 7, stride=2, pad=3)
    x = bn_relu(x, ib['g'], ib['b'])
    x = max_pool(x, 3, 2, 1)
    # stages
    for i, sp in enumerate(params['stages']):
        x = sparse_stage_forward(x, sp, do_transition=(i != 0))
    # PreResActivation: BN -> ReLU
    x = bn_relu(x, params['post']['g'], params['post']['b'])
    # final 7x7 avg pool, stride 1
    x = avg_pool(x, 7, 1)
    # flatten in NCHW order (matches x.view(x.size(0), -1))
    n = x.shape[0]
    x = jnp.transpose(x, (0, 3, 1, 2)).reshape(n, -1)
    # Linear (fc weight stored pre-transposed (in_features, num_classes), bf16)
    logits = pallas_gemm(x, params['fc_w']) + params['fc_b'][None, :]
    return logits


# ----------------------------------------------------------------------------
# Deterministic parameter construction (synthetic, kaiming-uniform convs).
# Weights are reshaped/cast ONCE here (hoisted out of the forward pass).
# ----------------------------------------------------------------------------
def kaiming_uniform(key, shape, fan_in):
    bound = math.sqrt(6.0 / fan_in)
    return jax.random.uniform(key, shape, jnp.float32, -bound, bound)


def conv_weight(key, kh, kw, cin, cout):
    w = kaiming_uniform(key, (kh, kw, cin, cout), cin * kh * kw)    # HWIO
    return w.reshape(kh * kw * cin, cout).astype(jnp.bfloat16)      # (K, N) bf16


def build_params(key, channels, init_block_channels, growth_rate,
                 in_channels, num_classes):
    keys = iter(jax.random.split(key, 64))
    nk = lambda: next(keys)
    params = {}
    c0 = init_block_channels
    params['init'] = {
        'w': conv_weight(nk(), 7, 7, in_channels, c0),
        'g': jnp.ones((c0,), jnp.float32),
        'b': jnp.zeros((c0,), jnp.float32),
    }
    cur = c0
    stages = []
    for i, cps in enumerate(channels):
        sp = {}
        if i != 0:
            sp['trans'] = {
                'g': jnp.ones((cur,), jnp.float32),
                'b': jnp.zeros((cur,), jnp.float32),
                'w': conv_weight(nk(), 1, 1, cur, cur // 2),
            }
            cur = cur // 2
        blocks = []
        for out_ch in cps:
            mid = growth_rate * 4
            blocks.append({
                'bn1_g': jnp.ones((cur,), jnp.float32),
                'bn1_b': jnp.zeros((cur,), jnp.float32),
                'w1': conv_weight(nk(), 1, 1, cur, mid),
                'bn2_g': jnp.ones((mid,), jnp.float32),
                'bn2_b': jnp.zeros((mid,), jnp.float32),
                'w2': conv_weight(nk(), 3, 3, mid, growth_rate),
            })
            cur = out_ch
        sp['blocks'] = blocks
        stages.append(sp)
    params['stages'] = stages
    params['post'] = {'g': jnp.ones((cur,), jnp.float32),
                      'b': jnp.zeros((cur,), jnp.float32)}
    lb = 1.0 / math.sqrt(cur)
    params['fc_w'] = jax.random.uniform(nk(), (cur, num_classes), jnp.float32,
                                        -lb, lb).astype(jnp.bfloat16)
    params['fc_b'] = jax.random.uniform(nk(), (num_classes,), jnp.float32, -lb, lb)
    return params


# ----------------------------------------------------------------------------
if __name__ == "__main__":
    # Small synthetic SparseNet config (channel counts consistent with the
    # sparse exponential-fetch aggregation rule, growth_rate=4):
    channels = [[12, 8, 16], [12, 8, 16]]
    init_block_channels = 8
    growth_rate = 4
    in_channels = 3
    num_classes = 10
    in_size = (56, 56)   # smallest input compatible with the fixed AvgPool2d(7)

    key = jax.random.PRNGKey(0)
    pkey, xkey = jax.random.split(key)
    params = build_params(pkey, channels, init_block_channels, growth_rate,
                          in_channels, num_classes)
    x = jax.random.normal(xkey, (2, in_channels, in_size[0], in_size[1]),
                          dtype=jnp.float32)

    fwd = jax.jit(sparsenet_forward)
    logits = fwd(params, x)
    jax.block_until_ready(logits)
    assert logits.shape == (2, num_classes)
    assert bool(jnp.all(jnp.isfinite(logits)))
    print("KERNEL_OK")
</pallas_src>

<mosaic_0001>
module attributes {stable_mosaic.version = 11 : i64} {
  func.func @_gemm_kernel(%arg0: i32, %arg1: memref<392x147xbf16, #tpu.memory_space<vmem>>, %arg2: memref<147x8xbf16, #tpu.memory_space<vmem>>, %arg3: memref<392x8xf32, #tpu.memory_space<vmem>>) attributes {dimension_semantics = [#tpu.dimension_semantics<parallel>], iteration_bounds = array<i64: 4>, scalar_prefetch = 0 : i64, scratch_operands = 0 : i64, tpu.core_type = #tpu.core_type<tc>, window_params = [{transform_indices = @transform_0, window_bounds = array<i64: 392, 147>}, {pipeline_mode = #tpu.pipeline_mode<synchronous>, transform_indices = @transform_1, window_bounds = array<i64: 147, 8>}, {transform_indices = @transform_2, window_bounds = array<i64: 392, 8>}]} {
    %c0 = arith.constant 0 : index
    %c0_0 = arith.constant 0 : index
    %0 = vector.load %arg1[%c0, %c0_0] : memref<392x147xbf16, #tpu.memory_space<vmem>>, vector<392x147xbf16>
    %c0_1 = arith.constant 0 : index
    %c0_2 = arith.constant 0 : index
    %1 = vector.load %arg2[%c0_1, %c0_2] : memref<147x8xbf16, #tpu.memory_space<vmem>>, vector<147x8xbf16>
    %cst = arith.constant dense<0.000000e+00> : vector<392x8xf32>
    %2 = tpu.matmul %0, %1, %cst {dimension_numbers = #tpu.dot_dimension_numbers<[1], [0], [0], [1], [0, 0, 1, 1], [], []>} : vector<392x147xbf16>, vector<147x8xbf16>, vector<392x8xf32> -> vector<392x8xf32>
    %c0_3 = arith.constant 0 : index
    %c0_4 = arith.constant 0 : index
    %3 = vector.load %arg3[%c0_3, %c0_4] : memref<392x8xf32, #tpu.memory_space<vmem>>, vector<392x8xf32>
    tpu.vector_store %arg3[%c0_3, %c0_4], %2 {strides = array<i32>} : memref<392x8xf32, #tpu.memory_space<vmem>>, vector<392x8xf32>,
    return
  }
  func.func @transform_0(%arg0: i32) -> (i32, i32) {
    %c0_i32 = arith.constant 0 : i32
    %c0_i32_0 = arith.constant 0 : i32
    return %arg0, %c0_i32 : i32, i32
  }
  func.func @transform_1(%arg0: i32) -> (i32, i32) {
    %c0_i32 = arith.constant 0 : i32
    %c0_i32_0 = arith.constant 0 : i32
    %c0_i32_1 = arith.constant 0 : i32
    return %c0_i32, %c0_i32_0 : i32, i32
  }
  func.func @transform_2(%arg0: i32) -> (i32, i32) {
    %c0_i32 = arith.constant 0 : i32
    %c0_i32_0 = arith.constant 0 : i32
    return %arg0, %c0_i32 : i32, i32
  }
}

module attributes {stable_mosaic.version = 11 : i64} {
  func.func @_scale_shift_relu_kernel(%arg0: i32, %arg1: memref<392x8xf32, #tpu.memory_space<vmem>>, %arg2: memref<1x8xf32, #tpu.memory_space<vmem>>, %arg3: memref<1x8xf32, #tpu.memory_space<vmem>>, %arg4: memref<392x8xf32, #tpu.memory_space<vmem>>) attributes {dimension_semantics = [#tpu.dimension_semantics<parallel>], iteration_bounds = array<i64: 4>, scalar_prefetch = 0 : i64, scratch_operands = 0 : i64, tpu.core_type = #tpu.core_type<tc>, window_params = [{transform_indices = @transform_0, window_bounds = array<i64: 392, 8>}, {pipeline_mode = #tpu.pipeline_mode<synchronous>, transform_indices = @transform_1, window_bounds = array<i64: 1, 8>}, {pipeline_mode = #tpu.pipeline_mode<synchronous>, transform_indices = @transform_2, window_bounds = array<i64: 1, 8>}, {transform_indices = @transform_3, window_bounds = array<i64: 392, 8>}]} {
    %c0 = arith.constant 0 : index
    %c0_0 = arith.constant 0 : index
    %0 = vector.load %arg1[%c0, %c0_0] : memref<392x8xf32, #tpu.memory_space<vmem>>, vector<392x8xf32>
    %c0_1 = arith.constant 0 : index
    %c0_2 = arith.constant 0 : index
    %1 = vector.load %arg2[%c0_1, %c0_2] : memref<1x8xf32, #tpu.memory_space<vmem>>, vector<1x8xf32>
    %2 = vector.broadcast %1 : vector<1x8xf32> to vector<392x8xf32>
    %3 = arith.mulf %0, %2 : vector<392x8xf32>
    %c0_3 = arith.constant 0 : index
    %c0_4 = arith.constant 0 : index
    %4 = vector.load %arg3[%c0_3, %c0_4] : memref<1x8xf32, #tpu.memory_space<vmem>>, vector<1x8xf32>
    %5 = vector.broadcast %4 : vector<1x8xf32> to vector<392x8xf32>
    %6 = arith.addf %3, %5 : vector<392x8xf32>
    %cst = arith.constant 0.000000e+00 : f32
    %7 = vector.broadcast %cst : f32 to vector<392x8xf32>
    %8 = arith.maximumf %6, %7 : vector<392x8xf32>
    %c0_5 = arith.constant 0 : index
    %c0_6 = arith.constant 0 : index
    %9 = vector.load %arg4[%c0_5, %c0_6] : memref<392x8xf32, #tpu.memory_space<vmem>>, vector<392x8xf32>
    tpu.vector_store %arg4[%c0_5, %c0_6], %8 {strides = array<i32>} : memref<392x8xf32, #tpu.memory_space<vmem>>, vector<392x8xf32>,
    return
  }
  func.func @transform_0(%arg0: i32) -> (i32, i32) {
    %c0_i32 = arith.constant 0 : i32
    %c0_i32_0 = arith.constant 0 : i32
    return %arg0, %c0_i32 : i32, i32
  }
  func.func @transform_1(%arg0: i32) -> (i32, i32) {
    %c0_i32 = arith.constant 0 : i32
    %c0_i32_0 = arith.constant 0 : i32
    %c0_i32_1 = arith.constant 0 : i32
    return %c0_i32, %c0_i32_0 : i32, i32
  }
  func.func @transform_2(%arg0: i32) -> (i32, i32) {
    %c0_i32 = arith.constant 0 : i32
    %c0_i32_0 = arith.constant 0 : i32
    %c0_i32_1 = arith.constant 0 : i32
    return %c0_i32, %c0_i32_0 : i32, i32
  }
  func.func @transform_3(%arg0: i32) -> (i32, i32) {
    %c0_i32 = arith.constant 0 : i32
    %c0_i32_0 = arith.constant 0 : i32
    return %arg0, %c0_i32 : i32, i32
  }
}

module attributes {stable_mosaic.version = 11 : i64} {
  func.func @_bnrelu_gemm_kernel(%arg0: i32, %arg1: memref<392x8xf32, #tpu.memory_space<vmem>>, %arg2: memref<1x8xf32, #tpu.memory_space<vmem>>, %arg3: memref<1x8xf32, #tpu.memory_space<vmem>>, %arg4: memref<8x16xbf16, #tpu.memory_space<vmem>>, %arg5: memref<392x16xf32, #tpu.memory_space<vmem>>) attributes {dimension_semantics = [#tpu.dimension_semantics<parallel>], iteration_bounds = array<i64: 1>, scalar_prefetch = 0 : i64, scratch_operands = 0 : i64, tpu.core_type = #tpu.core_type<tc>, window_params = [{transform_indices = @transform_0, window_bounds = array<i64: 392, 8>}, {pipeline_mode = #tpu.pipeline_mode<synchronous>, transform_indices = @transform_1, window_bounds = array<i64: 1, 8>}, {pipeline_mode = #tpu.pipeline_mode<synchronous>, transform_indices = @transform_2, window_bounds = array<i64: 1, 8>}, {pipeline_mode = #tpu.pipeline_mode<synchronous>, transform_indices = @transform_3, window_bounds = array<i64: 8, 16>}, {transform_indices = @transform_4, window_bounds = array<i64: 392, 16>}]} {
    %c0 = arith.constant 0 : index
    %c0_0 = arith.constant 0 : index
    %0 = vector.load %arg1[%c0, %c0_0] : memref<392x8xf32, #tpu.memory_space<vmem>>, vector<392x8xf32>
    %c0_1 = arith.constant 0 : index
    %c0_2 = arith.constant 0 : index
    %1 = vector.load %arg2[%c0_1, %c0_2] : memref<1x8xf32, #tpu.memory_space<vmem>>, vector<1x8xf32>
    %2 = vector.broadcast %1 : vector<1x8xf32> to vector<392x8xf32>
    %3 = arith.mulf %0, %2 : vector<392x8xf32>
    %c0_3 = arith.constant 0 : index
    %c0_4 = arith.constant 0 : index
    %4 = vector.load %arg3[%c0_3, %c0_4] : memref<1x8xf32, #tpu.memory_space<vmem>>, vector<1x8xf32>
    %5 = vector.broadcast %4 : vector<1x8xf32> to vector<392x8xf32>
    %6 = arith.addf %3, %5 : vector<392x8xf32>
    %cst = arith.constant 0.000000e+00 : f32
    %7 = vector.broadcast %cst : f32 to vector<392x8xf32>
    %8 = arith.maximumf %6, %7 : vector<392x8xf32>
    %9 = arith.truncf %8 : vector<392x8xf32> to vector<392x8xbf16>
    %c0_5 = arith.constant 0 : index
    %c0_6 = arith.constant 0 : index
    %10 = vector.load %arg4[%c0_5, %c0_6] : memref<8x16xbf16, #tpu.memory_space<vmem>>, vector<8x16xbf16>
    %cst_7 = arith.constant dense<0.000000e+00> : vector<392x16xf32>
    %11 = tpu.matmul %9, %10, %cst_7 {dimension_numbers = #tpu.dot_dimension_numbers<[1], [0], [0], [1], [0, 0, 1, 1], [], []>} : vector<392x8xbf16>, vector<8x16xbf16>, vector<392x16xf32> -> vector<392x16xf32>
    %c0_8 = arith.constant 0 : index
    %c0_9 = arith.constant 0 : index
    %12 = vector.load %arg5[%c0_8, %c0_9] : memref<392x16xf32, #tpu.memory_space<vmem>>, vector<392x16xf32>
    tpu.vector_store %arg5[%c0_8, %c0_9], %11 {strides = array<i32>} : memref<392x16xf32, #tpu.memory_space<vmem>>, vector<392x16xf32>,
    return
  }
  func.func @transform_0(%arg0: i32) -> (i32, i32) {
    %c0_i32 = arith.constant 0 : i32
    %c0_i32_0 = arith.constant 0 : i32
    return %arg0, %c0_i32 : i32, i32
  }
  func.func @transform_1(%arg0: i32) -> (i32, i32) {
    %c0_i32 = arith.constant 0 : i32
    %c0_i32_0 = arith.constant 0 : i32
    %c0_i32_1 = arith.constant 0 : i32
    return %c0_i32, %c0_i32_0 : i32, i32
  }
  func.func @transform_2(%arg0: i32) -> (i32, i32) {
    %c0_i32 = arith.constant 0 : i32
    %c0_i32_0 = arith.constant 0 : i32
    %c0_i32_1 = arith.constant 0 : i32
    return %c0_i32, %c0_i32_0 : i32, i32
  }
  func.func @transform_3(%arg0: i32) -> (i32, i32) {
    %c0_i32 = arith.constant 0 : i32
    %c0_i32_0 = arith.constant 0 : i32
    %c0_i32_1 = arith.constant 0 : i32
    return %c0_i32, %c0_i32_0 : i32, i32
  }
  func.func @transform_4(%arg0: i32) -> (i32, i32) {
    %c0_i32 = arith.constant 0 : i32
    %c0_i32_0 = arith.constant 0 : i32
    return %arg0, %c0_i32 : i32, i32
  }
}

module attributes {stable_mosaic.version = 11 : i64} {
  func.func @_scale_shift_relu_kernel(%arg0: i32, %arg1: memref<392x16xf32, #tpu.memory_space<vmem>>, %arg2: memref<1x16xf32, #tpu.memory_space<vmem>>, %arg3: memref<1x16xf32, #tpu.memory_space<vmem>>, %arg4: memref<392x16xf32, #tpu.memory_space<vmem>>) attributes {dimension_semantics = [#tpu.dimension_semantics<parallel>], iteration_bounds = array<i64: 1>, scalar_prefetch = 0 : i64, scratch_operands = 0 : i64, tpu.core_type = #tpu.core_type<tc>, window_params = [{transform_indices = @transform_0, window_bounds = array<i64: 392, 16>}, {pipeline_mode = #tpu.pipeline_mode<synchronous>, transform_indices = @transform_1, window_bounds = array<i64: 1, 16>}, {pipeline_mode = #tpu.pipeline_mode<synchronous>, transform_indices = @transform_2, window_bounds = array<i64: 1, 16>}, {transform_indices = @transform_3, window_bounds = array<i64: 392, 16>}]} {
    %c0 = arith.constant 0 : index
    %c0_0 = arith.constant 0 : index
    %0 = vector.load %arg1[%c0, %c0_0] : memref<392x16xf32, #tpu.memory_space<vmem>>, vector<392x16xf32>
    %c0_1 = arith.constant 0 : index
    %c0_2 = arith.constant 0 : index
    %1 = vector.load %arg2[%c0_1, %c0_2] : memref<1x16xf32, #tpu.memory_space<vmem>>, vector<1x16xf32>
    %2 = vector.broadcast %1 : vector<1x16xf32> to vector<392x16xf32>
    %3 = arith.mulf %0, %2 : vector<392x16xf32>
    %c0_3 = arith.constant 0 : index
    %c0_4 = arith.constant 0 : index
    %4 = vector.load %arg3[%c0_3, %c0_4] : memref<1x16xf32, #tpu.memory_space<vmem>>, vector<1x16xf32>
    %5 = vector.broadcast %4 : vector<1x16xf32> to vector<392x16xf32>
    %6 = arith.addf %3, %5 : vector<392x16xf32>
    %cst = arith.constant 0.000000e+00 : f32
    %7 = vector.broadcast %cst : f32 to vector<392x16xf32>
    %8 = arith.maximumf %6, %7 : vector<392x16xf32>
    %c0_5 = arith.constant 0 : index
    %c0_6 = arith.constant 0 : index
    %9 = vector.load %arg4[%c0_5, %c0_6] : memref<392x16xf32, #tpu.memory_space<vmem>>, vector<392x16xf32>
    tpu.vector_store %arg4[%c0_5, %c0_6], %8 {strides = array<i32>} : memref<392x16xf32, #tpu.memory_space<vmem>>, vector<392x16xf32>,
    return
  }
  func.func @transform_0(%arg0: i32) -> (i32, i32) {
    %c0_i32 = arith.constant 0 : i32
    %c0_i32_0 = arith.constant 0 : i32
    return %arg0, %c0_i32 : i32, i32
  }
  func.func @transform_1(%arg0: i32) -> (i32, i32) {
    %c0_i32 = arith.constant 0 : i32
    %c0_i32_0 = arith.constant 0 : i32
    %c0_i32_1 = arith.constant 0 : i32
    return %c0_i32, %c0_i32_0 : i32, i32
  }
  func.func @transform_2(%arg0: i32) -> (i32, i32) {
    %c0_i32 = arith.constant 0 : i32
    %c0_i32_0 = arith.constant 0 : i32
    %c0_i32_1 = arith.constant 0 : i32
    return %c0_i32, %c0_i32_0 : i32, i32
  }
  func.func @transform_3(%arg0: i32) -> (i32, i32) {
    %c0_i32 = arith.constant 0 : i32
    %c0_i32_0 = arith.constant 0 : i32
    return %arg0, %c0_i32 : i32, i32
  }
}

module attributes {stable_mosaic.version = 11 : i64} {
  func.func @_gemm_kernel(%arg0: i32, %arg1: memref<392x144xbf16, #tpu.memory_space<vmem>>, %arg2: memref<144x4xbf16, #tpu.memory_space<vmem>>, %arg3: memref<392x4xf32, #tpu.memory_space<vmem>>) attributes {dimension_semantics = [#tpu.dimension_semantics<parallel>], iteration_bounds = array<i64: 1>, scalar_prefetch = 0 : i64, scratch_operands = 0 : i64, tpu.core_type = #tpu.core_type<tc>, window_params = [{transform_indices = @transform_0, window_bounds = array<i64: 392, 144>}, {pipeline_mode = #tpu.pipeline_mode<synchronous>, transform_indices = @transform_1, window_bounds = array<i64: 144, 4>}, {transform_indices = @transform_2, window_bounds = array<i64: 392, 4>}]} {
    %c0 = arith.constant 0 : index
    %c0_0 = arith.constant 0 : index
    %0 = vector.load %arg1[%c0, %c0_0] : memref<392x144xbf16, #tpu.memory_space<vmem>>, vector<392x144xbf16>
    %c0_1 = arith.constant 0 : index
    %c0_2 = arith.constant 0 : index
    %1 = vector.load %arg2[%c0_1, %c0_2] : memref<144x4xbf16, #tpu.memory_space<vmem>>, vector<144x4xbf16>
    %cst = arith.constant dense<0.000000e+00> : vector<392x4xf32>
    %2 = tpu.matmul %0, %1, %cst {dimension_numbers = #tpu.dot_dimension_numbers<[1], [0], [0], [1], [0, 0, 1, 1], [], []>} : vector<392x144xbf16>, vector<144x4xbf16>, vector<392x4xf32> -> vector<392x4xf32>
    %c0_3 = arith.constant 0 : index
    %c0_4 = arith.constant 0 : index
    %3 = vector.load %arg3[%c0_3, %c0_4] : memref<392x4xf32, #tpu.memory_space<vmem>>, vector<392x4xf32>
    tpu.vector_store %arg3[%c0_3, %c0_4], %2 {strides = array<i32>} : memref<392x4xf32, #tpu.memory_space<vmem>>, vector<392x4xf32>,
    return
  }
  func.func @transform_0(%arg0: i32) -> (i32, i32) {
    %c0_i32 = arith.constant 0 : i32
    %c0_i32_0 = arith.constant 0 : i32
    return %arg0, %c0_i32 : i32, i32
  }
  func.func @transform_1(%arg0: i32) -> (i32, i32) {
    %c0_i32 = arith.constant 0 : i32
    %c0_i32_0 = arith.constant 0 : i32
    %c0_i32_1 = arith.constant 0 : i32
    return %c0_i32, %c0_i32_0 : i32, i32
  }
  func.func @transform_2(%arg0: i32) -> (i32, i32) {
    %c0_i32 = arith.constant 0 : i32
    %c0_i32_0 = arith.constant 0 : i32
    return %arg0, %c0_i32 : i32, i32
  }
}

module attributes {stable_mosaic.version = 11 : i64} {
  func.func @_bnrelu_gemm_kernel(%arg0: i32, %arg1: memref<392x12xf32, #tpu.memory_space<vmem>>, %arg2: memref<1x12xf32, #tpu.memory_space<vmem>>, %arg3: memref<1x12xf32, #tpu.memory_space<vmem>>, %arg4: memref<12x16xbf16, #tpu.memory_space<vmem>>, %arg5: memref<392x16xf32, #tpu.memory_space<vmem>>) attributes {dimension_semantics = [#tpu.dimension_semantics<parallel>], iteration_bounds = array<i64: 1>, scalar_prefetch = 0 : i64, scratch_operands = 0 : i64, tpu.core_type = #tpu.core_type<tc>, window_params = [{transform_indices = @transform_0, window_bounds = array<i64: 392, 12>}, {pipeline_mode = #tpu.pipeline_mode<synchronous>, transform_indices = @transform_1, window_bounds = array<i64: 1, 12>}, {pipeline_mode = #tpu.pipeline_mode<synchronous>, transform_indices = @transform_2, window_bounds = array<i64: 1, 12>}, {pipeline_mode = #tpu.pipeline_mode<synchronous>, transform_indices = @transform_3, window_bounds = array<i64: 12, 16>}, {transform_indices = @transform_4, window_bounds = array<i64: 392, 16>}]} {
    %c0 = arith.constant 0 : index
    %c0_0 = arith.constant 0 : index
    %0 = vector.load %arg1[%c0, %c0_0] : memref<392x12xf32, #tpu.memory_space<vmem>>, vector<392x12xf32>
    %c0_1 = arith.constant 0 : index
    %c0_2 = arith.constant 0 : index
    %1 = vector.load %arg2[%c0_1, %c0_2] : memref<1x12xf32, #tpu.memory_space<vmem>>, vector<1x12xf32>
    %2 = vector.broadcast %1 : vector<1x12xf32> to vector<392x12xf32>
    %3 = arith.mulf %0, %2 : vector<392x12xf32>
    %c0_3 = arith.constant 0 : index
    %c0_4 = arith.constant 0 : index
    %4 = vector.load %arg3[%c0_3, %c0_4] : memref<1x12xf32, #tpu.memory_space<vmem>>, vector<1x12xf32>
    %5 = vector.broadcast %4 : vector<1x12xf32> to vector<392x12xf32>
    %6 = arith.addf %3, %5 : vector<392x12xf32>
    %cst = arith.constant 0.000000e+00 : f32
    %7 = vector.broadcast %cst : f32 to vector<392x12xf32>
    %8 = arith.maximumf %6, %7 : vector<392x12xf32>
    %9 = arith.truncf %8 : vector<392x12xf32> to vector<392x12xbf16>
    %c0_5 = arith.constant 0 : index
    %c0_6 = arith.constant 0 : index
    %10 = vector.load %arg4[%c0_5, %c0_6] : memref<12x16xbf16, #tpu.memory_space<vmem>>, vector<12x16xbf16>
    %cst_7 = arith.constant dense<0.000000e+00> : vector<392x16xf32>
    %11 = tpu.matmul %9, %10, %cst_7 {dimension_numbers = #tpu.dot_dimension_numbers<[1], [0], [0], [1], [0, 0, 1, 1], [], []>} : vector<392x12xbf16>, vector<12x16xbf16>, vector<392x16xf32> -> vector<392x16xf32>
    %c0_8 = arith.constant 0 : index
    %c0_9 = arith.constant 0 : index
    %12 = vector.load %arg5[%c0_8, %c0_9] : memref<392x16xf32, #tpu.memory_space<vmem>>, vector<392x16xf32>
    tpu.vector_store %arg5[%c0_8, %c0_9], %11 {strides = array<i32>} : memref<392x16xf32, #tpu.memory_space<vmem>>, vector<392x16xf32>,
    return
  }
  func.func @transform_0(%arg0: i32) -> (i32, i32) {
    %c0_i32 = arith.constant 0 : i32
    %c0_i32_0 = arith.constant 0 : i32
    return %arg0, %c0_i32 : i32, i32
  }
  func.func @transform_1(%arg0: i32) -> (i32, i32) {
    %c0_i32 = arith.constant 0 : i32
    %c0_i32_0 = arith.constant 0 : i32
    %c0_i32_1 = arith.constant 0 : i32
    return %c0_i32, %c0_i32_0 : i32, i32
  }
  func.func @transform_2(%arg0: i32) -> (i32, i32) {
    %c0_i32 = arith.constant 0 : i32
    %c0_i32_0 = arith.constant 0 : i32
    %c0_i32_1 = arith.constant 0 : i32
    return %c0_i32, %c0_i32_0 : i32, i32
  }
  func.func @transform_3(%arg0: i32) -> (i32, i32) {
    %c0_i32 = arith.constant 0 : i32
    %c0_i32_0 = arith.constant 0 : i32
    %c0_i32_1 = arith.constant 0 : i32
    return %c0_i32, %c0_i32_0 : i32, i32
  }
  func.func @transform_4(%arg0: i32) -> (i32, i32) {
    %c0_i32 = arith.constant 0 : i32
    %c0_i32_0 = arith.constant 0 : i32
    return %arg0, %c0_i32 : i32, i32
  }
}

module attributes {stable_mosaic.version = 11 : i64} {
  func.func @_bnrelu_gemm_kernel(%arg0: i32, %arg1: memref<392x16xf32, #tpu.memory_space<vmem>>, %arg2: memref<1x16xf32, #tpu.memory_space<vmem>>, %arg3: memref<1x16xf32, #tpu.memory_space<vmem>>, %arg4: memref<16x8xbf16, #tpu.memory_space<vmem>>, %arg5: memref<392x8xf32, #tpu.memory_space<vmem>>) attributes {dimension_semantics = [#tpu.dimension_semantics<parallel>], iteration_bounds = array<i64: 1>, scalar_prefetch = 0 : i64, scratch_operands = 0 : i64, tpu.core_type = #tpu.core_type<tc>, window_params = [{transform_indices = @transform_0, window_bounds = array<i64: 392, 16>}, {pipeline_mode = #tpu.pipeline_mode<synchronous>, transform_indices = @transform_1, window_bounds = array<i64: 1, 16>}, {pipeline_mode = #tpu.pipeline_mode<synchronous>, transform_indices = @transform_2, window_bounds = array<i64: 1, 16>}, {pipeline_mode = #tpu.pipeline_mode<synchronous>, transform_indices = @transform_3, window_bounds = array<i64: 16, 8>}, {transform_indices = @transform_4, window_bounds = array<i64: 392, 8>}]} {
    %c0 = arith.constant 0 : index
    %c0_0 = arith.constant 0 : index
    %0 = vector.load %arg1[%c0, %c0_0] : memref<392x16xf32, #tpu.memory_space<vmem>>, vector<392x16xf32>
    %c0_1 = arith.constant 0 : index
    %c0_2 = arith.constant 0 : index
    %1 = vector.load %arg2[%c0_1, %c0_2] : memref<1x16xf32, #tpu.memory_space<vmem>>, vector<1x16xf32>
    %2 = vector.broadcast %1 : vector<1x16xf32> to vector<392x16xf32>
    %3 = arith.mulf %0, %2 : vector<392x16xf32>
    %c0_3 = arith.constant 0 : index
    %c0_4 = arith.constant 0 : index
    %4 = vector.load %arg3[%c0_3, %c0_4] : memref<1x16xf32, #tpu.memory_space<vmem>>, vector<1x16xf32>
    %5 = vector.broadcast %4 : vector<1x16xf32> to vector<392x16xf32>
    %6 = arith.addf %3, %5 : vector<392x16xf32>
    %cst = arith.constant 0.000000e+00 : f32
    %7 = vector.broadcast %cst : f32 to vector<392x16xf32>
    %8 = arith.maximumf %6, %7 : vector<392x16xf32>
    %9 = arith.truncf %8 : vector<392x16xf32> to vector<392x16xbf16>
    %c0_5 = arith.constant 0 : index
    %c0_6 = arith.constant 0 : index
    %10 = vector.load %arg4[%c0_5, %c0_6] : memref<16x8xbf16, #tpu.memory_space<vmem>>, vector<16x8xbf16>
    %cst_7 = arith.constant dense<0.000000e+00> : vector<392x8xf32>
    %11 = tpu.matmul %9, %10, %cst_7 {dimension_numbers = #tpu.dot_dimension_numbers<[1], [0], [0], [1], [0, 0, 1, 1], [], []>} : vector<392x16xbf16>, vector<16x8xbf16>, vector<392x8xf32> -> vector<392x8xf32>
    %c0_8 = arith.constant 0 : index
    %c0_9 = arith.constant 0 : index
    %12 = vector.load %arg5[%c0_8, %c0_9] : memref<392x8xf32, #tpu.memory_space<vmem>>, vector<392x8xf32>
    tpu.vector_store %arg5[%c0_8, %c0_9], %11 {strides = array<i32>} : memref<392x8xf32, #tpu.memory_space<vmem>>, vector<392x8xf32>,
    return
  }
  func.func @transform_0(%arg0: i32) -> (i32, i32) {
    %c0_i32 = arith.constant 0 : i32
    %c0_i32_0 = arith.constant 0 : i32
    return %arg0, %c0_i32 : i32, i32
  }
  func.func @transform_1(%arg0: i32) -> (i32, i32) {
    %c0_i32 = arith.constant 0 : i32
    %c0_i32_0 = arith.constant 0 : i32
    %c0_i32_1 = arith.constant 0 : i32
    return %c0_i32, %c0_i32_0 : i32, i32
  }
  func.func @transform_2(%arg0: i32) -> (i32, i32) {
    %c0_i32 = arith.constant 0 : i32
    %c0_i32_0 = arith.constant 0 : i32
    %c0_i32_1 = arith.constant 0 : i32
    return %c0_i32, %c0_i32_0 : i32, i32
  }
  func.func @transform_3(%arg0: i32) -> (i32, i32) {
    %c0_i32 = arith.constant 0 : i32
    %c0_i32_0 = arith.constant 0 : i32
    %c0_i32_1 = arith.constant 0 : i32
    return %c0_i32, %c0_i32_0 : i32, i32
  }
  func.func @transform_4(%arg0: i32) -> (i32, i32) {
    %c0_i32 = arith.constant 0 : i32
    %c0_i32_0 = arith.constant 0 : i32
    return %arg0, %c0_i32 : i32, i32
  }
}

module attributes {stable_mosaic.version = 11 : i64} {
  func.func @_bnrelu_gemm_kernel(%arg0: i32, %arg1: memref<104x8xf32, #tpu.memory_space<vmem>>, %arg2: memref<1x8xf32, #tpu.memory_space<vmem>>, %arg3: memref<1x8xf32, #tpu.memory_space<vmem>>, %arg4: memref<8x16xbf16, #tpu.memory_space<vmem>>, %arg5: memref<104x16xf32, #tpu.memory_space<vmem>>) attributes {dimension_semantics = [#tpu.dimension_semantics<parallel>], iteration_bounds = array<i64: 1>, scalar_prefetch = 0 : i64, scratch_operands = 0 : i64, tpu.core_type = #tpu.core_type<tc>, window_params = [{transform_indices = @transform_0, window_bounds = array<i64: 104, 8>}, {pipeline_mode = #tpu.pipeline_mode<synchronous>, transform_indices = @transform_1, window_bounds = array<i64: 1, 8>}, {pipeline_mode = #tpu.pipeline_mode<synchronous>, transform_indices = @transform_2, window_bounds = array<i64: 1, 8>}, {pipeline_mode = #tpu.pipeline_mode<synchronous>, transform_indices = @transform_3, window_bounds = array<i64: 8, 16>}, {transform_indices = @transform_4, window_bounds = array<i64: 104, 16>}]} {
    %c0 = arith.constant 0 : index
    %c0_0 = arith.constant 0 : index
    %0 = vector.load %arg1[%c0, %c0_0] : memref<104x8xf32, #tpu.memory_space<vmem>>, vector<104x8xf32>
    %c0_1 = arith.constant 0 : index
    %c0_2 = arith.constant 0 : index
    %1 = vector.load %arg2[%c0_1, %c0_2] : memref<1x8xf32, #tpu.memory_space<vmem>>, vector<1x8xf32>
    %2 = vector.broadcast %1 : vector<1x8xf32> to vector<104x8xf32>
    %3 = arith.mulf %0, %2 : vector<104x8xf32>
    %c0_3 = arith.constant 0 : index
    %c0_4 = arith.constant 0 : index
    %4 = vector.load %arg3[%c0_3, %c0_4] : memref<1x8xf32, #tpu.memory_space<vmem>>, vector<1x8xf32>
    %5 = vector.broadcast %4 : vector<1x8xf32> to vector<104x8xf32>
    %6 = arith.addf %3, %5 : vector<104x8xf32>
    %cst = arith.constant 0.000000e+00 : f32
    %7 = vector.broadcast %cst : f32 to vector<104x8xf32>
    %8 = arith.maximumf %6, %7 : vector<104x8xf32>
    %9 = arith.truncf %8 : vector<104x8xf32> to vector<104x8xbf16>
    %c0_5 = arith.constant 0 : index
    %c0_6 = arith.constant 0 : index
    %10 = vector.load %arg4[%c0_5, %c0_6] : memref<8x16xbf16, #tpu.memory_space<vmem>>, vector<8x16xbf16>
    %cst_7 = arith.constant dense<0.000000e+00> : vector<104x16xf32>
    %11 = tpu.matmul %9, %10, %cst_7 {dimension_numbers = #tpu.dot_dimension_numbers<[1], [0], [0], [1], [0, 0, 1, 1], [], []>} : vector<104x8xbf16>, vector<8x16xbf16>, vector<104x16xf32> -> vector<104x16xf32>
    %c0_8 = arith.constant 0 : index
    %c0_9 = arith.constant 0 : index
    %12 = vector.load %arg5[%c0_8, %c0_9] : memref<104x16xf32, #tpu.memory_space<vmem>>, vector<104x16xf32>
    tpu.vector_store %arg5[%c0_8, %c0_9], %11 {strides = array<i32>} : memref<104x16xf32, #tpu.memory_space<vmem>>, vector<104x16xf32>,
    return
  }
  func.func @transform_0(%arg0: i32) -> (i32, i32) {
    %c0_i32 = arith.constant 0 : i32
    %c0_i32_0 = arith.constant 0 : i32
    return %arg0, %c0_i32 : i32, i32
  }
  func.func @transform_1(%arg0: i32) -> (i32, i32) {
    %c0_i32 = arith.constant 0 : i32
    %c0_i32_0 = arith.constant 0 : i32
    %c0_i32_1 = arith.constant 0 : i32
    return %c0_i32, %c0_i32_0 : i32, i32
  }
  func.func @transform_2(%arg0: i32) -> (i32, i32) {
    %c0_i32 = arith.constant 0 : i32
    %c0_i32_0 = arith.constant 0 : i32
    %c0_i32_1 = arith.constant 0 : i32
    return %c0_i32, %c0_i32_0 : i32, i32
  }
  func.func @transform_3(%arg0: i32) -> (i32, i32) {
    %c0_i32 = arith.constant 0 : i32
    %c0_i32_0 = arith.constant 0 : i32
    %c0_i32_1 = arith.constant 0 : i32
    return %c0_i32, %c0_i32_0 : i32, i32
  }
  func.func @transform_4(%arg0: i32) -> (i32, i32) {
    %c0_i32 = arith.constant 0 : i32
    %c0_i32_0 = arith.constant 0 : i32
    return %arg0, %c0_i32 : i32, i32
  }
}

module attributes {stable_mosaic.version = 11 : i64} {
  func.func @_scale_shift_relu_kernel(%arg0: i32, %arg1: memref<104x16xf32, #tpu.memory_space<vmem>>, %arg2: memref<1x16xf32, #tpu.memory_space<vmem>>, %arg3: memref<1x16xf32, #tpu.memory_space<vmem>>, %arg4: memref<104x16xf32, #tpu.memory_space<vmem>>) attributes {dimension_semantics = [#tpu.dimension_semantics<parallel>], iteration_bounds = array<i64: 1>, scalar_prefetch = 0 : i64, scratch_operands = 0 : i64, tpu.core_type = #tpu.core_type<tc>, window_params = [{transform_indices = @transform_0, window_bounds = array<i64: 104, 16>}, {pipeline_mode = #tpu.pipeline_mode<synchronous>, transform_indices = @transform_1, window_bounds = array<i64: 1, 16>}, {pipeline_mode = #tpu.pipeline_mode<synchronous>, transform_indices = @transform_2, window_bounds = array<i64: 1, 16>}, {transform_indices = @transform_3, window_bounds = array<i64: 104, 16>}]} {
    %c0 = arith.constant 0 : index
    %c0_0 = arith.constant 0 : index
    %0 = vector.load %arg1[%c0, %c0_0] : memref<104x16xf32, #tpu.memory_space<vmem>>, vector<104x16xf32>
    %c0_1 = arith.constant 0 : index
    %c0_2 = arith.constant 0 : index
    %1 = vector.load %arg2[%c0_1, %c0_2] : memref<1x16xf32, #tpu.memory_space<vmem>>, vector<1x16xf32>
    %2 = vector.broadcast %1 : vector<1x16xf32> to vector<104x16xf32>
    %3 = arith.mulf %0, %2 : vector<104x16xf32>
    %c0_3 = arith.constant 0 : index
    %c0_4 = arith.constant 0 : index
    %4 = vector.load %arg3[%c0_3, %c0_4] : memref<1x16xf32, #tpu.memory_space<vmem>>, vector<1x16xf32>
    %5 = vector.broadcast %4 : vector<1x16xf32> to vector<104x16xf32>
    %6 = arith.addf %3, %5 : vector<104x16xf32>
    %cst = arith.constant 0.000000e+00 : f32
    %7 = vector.broadcast %cst : f32 to vector<104x16xf32>
    %8 = arith.maximumf %6, %7 : vector<104x16xf32>
    %c0_5 = arith.constant 0 : index
    %c0_6 = arith.constant 0 : index
    %9 = vector.load %arg4[%c0_5, %c0_6] : memref<104x16xf32, #tpu.memory_space<vmem>>, vector<104x16xf32>
    tpu.vector_store %arg4[%c0_5, %c0_6], %8 {strides = array<i32>} : memref<104x16xf32, #tpu.memory_space<vmem>>, vector<104x16xf32>,
    return
  }
  func.func @transform_0(%arg0: i32) -> (i32, i32) {
    %c0_i32 = arith.constant 0 : i32
    %c0_i32_0 = arith.constant 0 : i32
    return %arg0, %c0_i32 : i32, i32
  }
  func.func @transform_1(%arg0: i32) -> (i32, i32) {
    %c0_i32 = arith.constant 0 : i32
    %c0_i32_0 = arith.constant 0 : i32
    %c0_i32_1 = arith.constant 0 : i32
    return %c0_i32, %c0_i32_0 : i32, i32
  }
  func.func @transform_2(%arg0: i32) -> (i32, i32) {
    %c0_i32 = arith.constant 0 : i32
    %c0_i32_0 = arith.constant 0 : i32
    %c0_i32_1 = arith.constant 0 : i32
    return %c0_i32, %c0_i32_0 : i32, i32
  }
  func.func @transform_3(%arg0: i32) -> (i32, i32) {
    %c0_i32 = arith.constant 0 : i32
    %c0_i32_0 = arith.constant 0 : i32
    return %arg0, %c0_i32 : i32, i32
  }
}

module attributes {stable_mosaic.version = 11 : i64} {
  func.func @_gemm_kernel(%arg0: i32, %arg1: memref<104x144xbf16, #tpu.memory_space<vmem>>, %arg2: memref<144x4xbf16, #tpu.memory_space<vmem>>, %arg3: memref<104x4xf32, #tpu.memory_space<vmem>>) attributes {dimension_semantics = [#tpu.dimension_semantics<parallel>], iteration_bounds = array<i64: 1>, scalar_prefetch = 0 : i64, scratch_operands = 0 : i64, tpu.core_type = #tpu.core_type<tc>, window_params = [{transform_indices = @transform_0, window_bounds = array<i64: 104, 144>}, {pipeline_mode = #tpu.pipeline_mode<synchronous>, transform_indices = @transform_1, window_bounds = array<i64: 144, 4>}, {transform_indices = @transform_2, window_bounds = array<i64: 104, 4>}]} {
    %c0 = arith.constant 0 : index
    %c0_0 = arith.constant 0 : index
    %0 = vector.load %arg1[%c0, %c0_0] : memref<104x144xbf16, #tpu.memory_space<vmem>>, vector<104x144xbf16>
    %c0_1 = arith.constant 0 : index
    %c0_2 = arith.constant 0 : index
    %1 = vector.load %arg2[%c0_1, %c0_2] : memref<144x4xbf16, #tpu.memory_space<vmem>>, vector<144x4xbf16>
    %cst = arith.constant dense<0.000000e+00> : vector<104x4xf32>
    %2 = tpu.matmul %0, %1, %cst {dimension_numbers = #tpu.dot_dimension_numbers<[1], [0], [0], [1], [0, 0, 1, 1], [], []>} : vector<104x144xbf16>, vector<144x4xbf16>, vector<104x4xf32> -> vector<104x4xf32>
    %c0_3 = arith.constant 0 : index
    %c0_4 = arith.constant 0 : index
    %3 = vector.load %arg3[%c0_3, %c0_4] : memref<104x4xf32, #tpu.memory_space<vmem>>, vector<104x4xf32>
    tpu.vector_store %arg3[%c0_3, %c0_4], %2 {strides = array<i32>} : memref<104x4xf32, #tpu.memory_space<vmem>>, vector<104x4xf32>,
    return
  }
  func.func @transform_0(%arg0: i32) -> (i32, i32) {
    %c0_i32 = arith.constant 0 : i32
    %c0_i32_0 = arith.constant 0 : i32
    return %arg0, %c0_i32 : i32, i32
  }
  func.func @transform_1(%arg0: i32) -> (i32, i32) {
    %c0_i32 = arith.constant 0 : i32
    %c0_i32_0 = arith.constant 0 : i32
    %c0_i32_1 = arith.constant 0 : i32
    return %c0_i32, %c0_i32_0 : i32, i32
  }
  func.func @transform_2(%arg0: i32) -> (i32, i32) {
    %c0_i32 = arith.constant 0 : i32
    %c0_i32_0 = arith.constant 0 : i32
    return %arg0, %c0_i32 : i32, i32
  }
}

module attributes {stable_mosaic.version = 11 : i64} {
  func.func @_bnrelu_gemm_kernel(%arg0: i32, %arg1: memref<104x12xf32, #tpu.memory_space<vmem>>, %arg2: memref<1x12xf32, #tpu.memory_space<vmem>>, %arg3: memref<1x12xf32, #tpu.memory_space<vmem>>, %arg4: memref<12x16xbf16, #tpu.memory_space<vmem>>, %arg5: memref<104x16xf32, #tpu.memory_space<vmem>>) attributes {dimension_semantics = [#tpu.dimension_semantics<parallel>], iteration_bounds = array<i64: 1>, scalar_prefetch = 0 : i64, scratch_operands = 0 : i64, tpu.core_type = #tpu.core_type<tc>, window_params = [{transform_indices = @transform_0, window_bounds = array<i64: 104, 12>}, {pipeline_mode = #tpu.pipeline_mode<synchronous>, transform_indices = @transform_1, window_bounds = array<i64: 1, 12>}, {pipeline_mode = #tpu.pipeline_mode<synchronous>, transform_indices = @transform_2, window_bounds = array<i64: 1, 12>}, {pipeline_mode = #tpu.pipeline_mode<synchronous>, transform_indices = @transform_3, window_bounds = array<i64: 12, 16>}, {transform_indices = @transform_4, window_bounds = array<i64: 104, 16>}]} {
    %c0 = arith.constant 0 : index
    %c0_0 = arith.constant 0 : index
    %0 = vector.load %arg1[%c0, %c0_0] : memref<104x12xf32, #tpu.memory_space<vmem>>, vector<104x12xf32>
    %c0_1 = arith.constant 0 : index
    %c0_2 = arith.constant 0 : index
    %1 = vector.load %arg2[%c0_1, %c0_2] : memref<1x12xf32, #tpu.memory_space<vmem>>, vector<1x12xf32>
    %2 = vector.broadcast %1 : vector<1x12xf32> to vector<104x12xf32>
    %3 = arith.mulf %0, %2 : vector<104x12xf32>
    %c0_3 = arith.constant 0 : index
    %c0_4 = arith.constant 0 : index
    %4 = vector.load %arg3[%c0_3, %c0_4] : memref<1x12xf32, #tpu.memory_space<vmem>>, vector<1x12xf32>
    %5 = vector.broadcast %4 : vector<1x12xf32> to vector<104x12xf32>
    %6 = arith.addf %3, %5 : vector<104x12xf32>
    %cst = arith.constant 0.000000e+00 : f32
    %7 = vector.broadcast %cst : f32 to vector<104x12xf32>
    %8 = arith.maximumf %6, %7 : vector<104x12xf32>
    %9 = arith.truncf %8 : vector<104x12xf32> to vector<104x12xbf16>
    %c0_5 = arith.constant 0 : index
    %c0_6 = arith.constant 0 : index
    %10 = vector.load %arg4[%c0_5, %c0_6] : memref<12x16xbf16, #tpu.memory_space<vmem>>, vector<12x16xbf16>
    %cst_7 = arith.constant dense<0.000000e+00> : vector<104x16xf32>
    %11 = tpu.matmul %9, %10, %cst_7 {dimension_numbers = #tpu.dot_dimension_numbers<[1], [0], [0], [1], [0, 0, 1, 1], [], []>} : vector<104x12xbf16>, vector<12x16xbf16>, vector<104x16xf32> -> vector<104x16xf32>
    %c0_8 = arith.constant 0 : index
    %c0_9 = arith.constant 0 : index
    %12 = vector.load %arg5[%c0_8, %c0_9] : memref<104x16xf32, #tpu.memory_space<vmem>>, vector<104x16xf32>
    tpu.vector_store %arg5[%c0_8, %c0_9], %11 {strides = array<i32>} : memref<104x16xf32, #tpu.memory_space<vmem>>, vector<104x16xf32>,
    return
  }
  func.func @transform_0(%arg0: i32) -> (i32, i32) {
    %c0_i32 = arith.constant 0 : i32
    %c0_i32_0 = arith.constant 0 : i32
    return %arg0, %c0_i32 : i32, i32
  }
  func.func @transform_1(%arg0: i32) -> (i32, i32) {
    %c0_i32 = arith.constant 0 : i32
    %c0_i32_0 = arith.constant 0 : i32
    %c0_i32_1 = arith.constant 0 : i32
    return %c0_i32, %c0_i32_0 : i32, i32
  }
  func.func @transform_2(%arg0: i32) -> (i32, i32) {
    %c0_i32 = arith.constant 0 : i32
    %c0_i32_0 = arith.constant 0 : i32
    %c0_i32_1 = arith.constant 0 : i32
    return %c0_i32, %c0_i32_0 : i32, i32
  }
  func.func @transform_3(%arg0: i32) -> (i32, i32) {
    %c0_i32 = arith.constant 0 : i32
    %c0_i32_0 = arith.constant 0 : i32
    %c0_i32_1 = arith.constant 0 : i32
    return %c0_i32, %c0_i32_0 : i32, i32
  }
  func.func @transform_4(%arg0: i32) -> (i32, i32) {
    %c0_i32 = arith.constant 0 : i32
    %c0_i32_0 = arith.constant 0 : i32
    return %arg0, %c0_i32 : i32, i32
  }
}

module attributes {stable_mosaic.version = 11 : i64} {
  func.func @_gemm_kernel(%arg0: i32, %arg1: memref<8x16xf32, #tpu.memory_space<vmem>>, %arg2: memref<16x10xbf16, #tpu.memory_space<vmem>>, %arg3: memref<8x10xf32, #tpu.memory_space<vmem>>) attributes {dimension_semantics = [#tpu.dimension_semantics<parallel>], iteration_bounds = array<i64: 1>, scalar_prefetch = 0 : i64, scratch_operands = 0 : i64, tpu.core_type = #tpu.core_type<tc>, window_params = [{transform_indices = @transform_0, window_bounds = array<i64: 8, 16>}, {pipeline_mode = #tpu.pipeline_mode<synchronous>, transform_indices = @transform_1, window_bounds = array<i64: 16, 10>}, {transform_indices = @transform_2, window_bounds = array<i64: 8, 10>}]} {
    %c0 = arith.constant 0 : index
    %c0_0 = arith.constant 0 : index
    %0 = vector.load %arg1[%c0, %c0_0] : memref<8x16xf32, #tpu.memory_space<vmem>>, vector<8x16xf32>
    %1 = arith.truncf %0 : vector<8x16xf32> to vector<8x16xbf16>
    %c0_1 = arith.constant 0 : index
    %c0_2 = arith.constant 0 : index
    %2 = vector.load %arg2[%c0_1, %c0_2] : memref<16x10xbf16, #tpu.memory_space<vmem>>, vector<16x10xbf16>
    %cst = arith.constant dense<0.000000e+00> : vector<8x10xf32>
    %3 = tpu.matmul %1, %2, %cst {dimension_numbers = #tpu.dot_dimension_numbers<[1], [0], [0], [1], [0, 0, 1, 1], [], []>} : vector<8x16xbf16>, vector<16x10xbf16>, vector<8x10xf32> -> vector<8x10xf32>
    %c0_3 = arith.constant 0 : index
    %c0_4 = arith.constant 0 : index
    %4 = vector.load %arg3[%c0_3, %c0_4] : memref<8x10xf32, #tpu.memory_space<vmem>>, vector<8x10xf32>
    tpu.vector_store %arg3[%c0_3, %c0_4], %3 {strides = array<i32>} : memref<8x10xf32, #tpu.memory_space<vmem>>, vector<8x10xf32>,
    return
  }
  func.func @transform_0(%arg0: i32) -> (i32, i32) {
    %c0_i32 = arith.constant 0 : i32
    %c0_i32_0 = arith.constant 0 : i32
    return %arg0, %c0_i32 : i32, i32
  }
  func.func @transform_1(%arg0: i32) -> (i32, i32) {
    %c0_i32 = arith.constant 0 : i32
    %c0_i32_0 = arith.constant 0 : i32
    %c0_i32_1 = arith.constant 0 : i32
    return %c0_i32, %c0_i32_0 : i32, i32
  }
  func.func @transform_2(%arg0: i32) -> (i32, i32) {
    %c0_i32 = arith.constant 0 : i32
    %c0_i32_0 = arith.constant 0 : i32
    return %arg0, %c0_i32 : i32, i32
  }
}

</mosaic_0001>

<bundles_post_ra>
// kernel: sparsenet_forward.23
= control target key start
LH: loop header
LB: loop body
LE: loop exit
PB: predicated region body
PF: predicated region fallthrough
CT: control target
= control target key end

     0   :  { %s1154_s9 = smov 0   ;;  %s1384_s0 = inlined_call_operand.vmem [shape: bf16[1568,147], index: 0, kind: input, shape index: {}]   ;;  %s1385_s1 = inlined_call_operand.vmem [shape: bf16[147,8], index: 1, kind: input, shape index: {}]   ;;  %s1386_s2 = inlined_call_operand.vmem [shape: f32[1568,8], index: 2, kind: output, shape index: {}]  }
   0x1 LB: > { %s919_s10 = sadd.s32 4294967295, %s1135_s9   ;;  %p923_p0 = scmp.ge.s32.totalorder %s1135_s9, 1  ;;  %s1135_s9 = sphi %s1154_s9, %s12_s9  }
   0x2   : > { %p114_p1 = scmp.lt.s32.totalorder %s1135_s9, 5 }
   0x4   : > { %p115_p2 = pnand %p923_p0, %p114_p1 }
   0x5   : > { %v1045_v0 = vld [vmem:[%s1385_s1] sm:$0xff] (!%p115_p2)   ;;  %v1137_v1 = vmov (!%p115_p2), 0   ;;  %v1046_v2 = vld [vmem:[%s1385_s1 + $0x8] sm:$0xff] (!%p115_p2)   ;;  %v1047_v3 = vld [vmem:[%s1385_s1 + $0x10] sm:$0xff] (!%p115_p2)   ;;  %s137_s17 = smul.u32 (!%p115_p2), 49, %s919_s10  ;;  %vm498_vm0 = vcmask (!%p115_p2), 154624  }
   0x6   : > { %118 = sbr.rel (%p115_p2) target bundleno = 357 (0x165), region = 28  ;;  %581 = vmatprep.subr.bf16.mxu0 (!%p115_p2), %v1137_v1  ;;  %1015 = vmatprep.subr.bf16.mxu1 (!%p115_p2), %v1137_v1  ;;  %v1048_v4 = vld [vmem:[%s1385_s1 + $0x18] sm:$0xff] (!%p115_p2)   ;;  %v1049_v5 = vld [vmem:[%s1385_s1 + $0x20] sm:$0xff] (!%p115_p2)   ;;  %v1050_v8 = vld [vmem:[%s1385_s1 + $0x28] sm:$0xff] (!%p115_p2)   ;;  %vm574_vm1 = vcmask (!%p115_p2), 1040384   ;;  %vm575_vm2 = vcmask (!%p115_p2), 1041408  }
   0x7   : > { %582 = vmatpush1.bf16.msra.mxu0 (!%p115_p2), %v1045_v0  ;;  %1025 = vmatpush1.bf16.msra.mxu1 (!%p115_p2), %v1045_v0  ;;  %p138_p3 = scmp.lt.s32.totalorder (!%p115_p2), %s137_s17, 195  ;;  %v1051_v9 = vld [vmem:[%s1385_s1 + $0x30] sm:$0xff] (!%p115_p2)   ;;  %v1052_v10 = vld [vmem:[%s1385_s1 + $0x38] sm:$0xff] (!%p115_p2)   ;;  %v1138_v11 = vmov (!%p115_p2), 65535   ;;  %v1053_v13 = vld [vmem:[%s1385_s1 + $0x40] sm:$0xff] (!%p115_p2)   ;;  %vm813_vm3 = vcmask (!%p115_p2), 64512  }
   0x8   : > { %583 = vmatprep.subr.bf16.mxu0 (!%p115_p2), %v1137_v1  ;;  %1016 = vmatprep.subr.bf16.mxu1 (!%p115_p2), %v1137_v1  ;;  %v576_v12 = vsel (!%p115_p2), %vm574_vm1, 4294967295, %v1138_v11  ;;  %v1054_v14 = vld [vmem:[%s1385_s1 + $0x48] ss:$0 sps:$4 sm:$0x33] (!%p115_p2)  }
   0x9   : > { %v577_v15 = vsel (!%p115_p2), %vm575_vm2, %v576_v12, 0 }
   0xa   : > { %v579_v16 = vand.u32 (!%p115_p2), %v1054_v14, %v577_v15 }
   0xb   : > { %584 = vmatpush1.bf16.msra.mxu0 (!%p115_p2), %v1046_v2  ;;  %1026 = vmatpush1.bf16.msra.mxu1 (!%p115_p2), %v1046_v2 }
   0xc   : > { %585 = vmatprep.subr.bf16.mxu0 (!%p115_p2), %v1137_v1  ;;  %1017 = vmatprep.subr.bf16.mxu1 (!%p115_p2), %v1137_v1 }
   0xd   : > { %s1388_s17 = smov (!%p138_p3, %s137_s17), 195 }
   0xe   : > { %s1014_s20 = sshll.u32 %s1388_s17, 3 }
   0xf   : > { %586 = vmatpush1.bf16.msra.mxu0 %v1047_v3  ;;  %1027 = vmatpush1.bf16.msra.mxu1 %v1047_v3  ;;  %s1182_s23 = scalar_lea.vmem %s1384_s0, %s1014_s20  ;;  %s1281_s11 = scalar_lea.vmem %s1386_s2, %s1014_s20 }
  0x10   : > { %587 = vmatprep.subr.bf16.mxu0 %v1137_v1  ;;  %1018 = vmatprep.subr.bf16.mxu1 %v1137_v1  ;;  %v1057_v6 = vld [vmem:[%s1182_s23 + $0x4] ss:$8 sps:$4 sm:$0xff]   ;;  %v1060_v7 = vld [vmem:[%s1182_s23 + $0xd4] ss:$8 sps:$4 sm:$0xff]   ;;  %v1055_v17 = vld [vmem:[%s1182_s23] ss:$8 sps:$4 sm:$0xff]  }
  0x11   : > { %987 = vmatprep.mubr.msk.bf16.mxu0 %vm498_vm0, %v1057_v6  ;;  %1000 = vmatprep.mubr.msk.bf16.mxu1 %vm498_vm0, %v1060_v7  ;;  %v1058_v18 = vld [vmem:[%s1182_s23 + $0xd0] ss:$8 sps:$4 sm:$0xff]   ;;  %v1061_v19 = vld [vmem:[%s1182_s23 + $0x14] ss:$8 sps:$4 sm:$0xff]   ;;  %v1064_v20 = vld [vmem:[%s1182_s23 + $0xe4] ss:$8 sps:$4 sm:$0xff]  }
  0x12   : > { %v1063_v21 = vld [vmem:[%s1182_s23 + $0x10] ss:$8 sps:$4 sm:$0xff]   ;;  %v1066_v22 = vld [vmem:[%s1182_s23 + $0xe0] ss:$8 sps:$4 sm:$0xff]   ;;  %v1067_v23 = vld [vmem:[%s1182_s23 + $0x24] ss:$8 sps:$4 sm:$0xff]  }
  0x13   : > { %588 = vmatpush1.bf16.msra.mxu0 %v1048_v4  ;;  %1028 = vmatpush1.bf16.msra.mxu1 %v1048_v4  ;;  %v1070_v24 = vld [vmem:[%s1182_s23 + $0xf4] ss:$8 sps:$4 sm:$0xff]   ;;  %v1069_v25 = vld [vmem:[%s1182_s23 + $0x20] ss:$8 sps:$4 sm:$0xff]   ;;  %v1072_v26 = vld [vmem:[%s1182_s23 + $0xf0] ss:$8 sps:$4 sm:$0xff]  }
  0x14   : > { %589 = vmatprep.subr.bf16.mxu0 %v1137_v1  ;;  %1019 = vmatprep.subr.bf16.mxu1 %v1137_v1  ;;  %v1073_v27 = vld [vmem:[%s1182_s23 + $0x34] ss:$8 sps:$4 sm:$0xff]   ;;  %v1076_v28 = vld [vmem:[%s1182_s23 + $0x104] ss:$8 sps:$4 sm:$0xff]   ;;  %v1075_v29 = vld [vmem:[%s1182_s23 + $0x30] ss:$8 sps:$4 sm:$0xff]  }
  0x15   : > { %v1078_v30 = vld [vmem:[%s1182_s23 + $0x100] ss:$8 sps:$4 sm:$0xff]   ;;  %v1079_v31 = vld [vmem:[%s1182_s23 + $0x44] ss:$8 sps:$4 sm:$0xff]   ;;  %v1082_v32 = vld [vmem:[%s1182_s23 + $0x114] ss:$8 sps:$4 sm:$0xff]  }
  0x16   : > { %v1081_v33 = vld [vmem:[%s1182_s23 + $0x40] ss:$8 sps:$4 sm:$0xff]   ;;  %v1084_v34 = vld [vmem:[%s1182_s23 + $0x110] ss:$8 sps:$4 sm:$0xff]   ;;  %v1085_v35 = vld [vmem:[%s1182_s23 + $0x54] ss:$8 sps:$4 sm:$0xff]  }
  0x17   : > { %590 = vmatpush1.bf16.msra.mxu0 %v1049_v5  ;;  %1029 = vmatpush1.bf16.msra.mxu1 %v1049_v5  ;;  %v1088_v36 = vld [vmem:[%s1182_s23 + $0x124] ss:$8 sps:$4 sm:$0xff]   ;;  %v1087_v37 = vld [vmem:[%s1182_s23 + $0x50] ss:$8 sps:$4 sm:$0xff]   ;;  %v1090_v38 = vld [vmem:[%s1182_s23 + $0x120] ss:$8 sps:$4 sm:$0xff]  }
  0x18   : > { %591 = vmatprep.subr.bf16.mxu0 %v1137_v1  ;;  %1020 = vmatprep.subr.bf16.mxu1 %v1137_v1  ;;  %v1091_v39 = vld [vmem:[%s1182_s23 + $0x64] ss:$8 sps:$4 sm:$0xff]   ;;  %v1094_v40 = vld [vmem:[%s1182_s23 + $0x134] ss:$8 sps:$4 sm:$0xff]   ;;  %v1093_v41 = vld [vmem:[%s1182_s23 + $0x60] ss:$8 sps:$4 sm:$0xff]  }
  0x19   : > { %v1096_v42 = vld [vmem:[%s1182_s23 + $0x130] ss:$8 sps:$4 sm:$0xff]   ;;  %v1097_v43 = vld [vmem:[%s1182_s23 + $0x74] ss:$8 sps:$4 sm:$0xff]   ;;  %v1100_v44 = vld [vmem:[%s1182_s23 + $0x144] ss:$8 sps:$4 sm:$0xff]  }
  0x1a   : > { %v1099_v45 = vld [vmem:[%s1182_s23 + $0x70] ss:$8 sps:$4 sm:$0xff]   ;;  %v1102_v46 = vld [vmem:[%s1182_s23 + $0x140] ss:$8 sps:$4 sm:$0xff]   ;;  %v1103_v47 = vld [vmem:[%s1182_s23 + $0x84] ss:$8 sps:$4 sm:$0xff]  }
  0x1b   : > { %592 = vmatpush1.bf16.msra.mxu0 %v1050_v8  ;;  %1030 = vmatpush1.bf16.msra.mxu1 %v1050_v8  ;;  %v1106_v48 = vld [vmem:[%s1182_s23 + $0x154] ss:$8 sps:$4 sm:$0xff]   ;;  %v1105_v49 = vld [vmem:[%s1182_s23 + $0x80] ss:$8 sps:$4 sm:$0xff]   ;;  %v1108_v50 = vld [vmem:[%s1182_s23 + $0x150] ss:$8 sps:$4 sm:$0xff]  }
  0x1c   : > { %593 = vmatprep.subr.bf16.mxu0 %v1137_v1  ;;  %1021 = vmatprep.subr.bf16.mxu1 %v1137_v1  ;;  %v1109_v51 = vld [vmem:[%s1182_s23 + $0x94] ss:$8 sps:$4 sm:$0xff]   ;;  %v1112_v52 = vld [vmem:[%s1182_s23 + $0x164] ss:$8 sps:$4 sm:$0xff]   ;;  %v1111_v53 = vld [vmem:[%s1182_s23 + $0x90] ss:$8 sps:$4 sm:$0xff]  }
  0x1d   : > { %v1114_v54 = vld [vmem:[%s1182_s23 + $0x160] ss:$8 sps:$4 sm:$0xff]   ;;  %v1115_v55 = vld [vmem:[%s1182_s23 + $0xa4] ss:$8 sps:$4 sm:$0xff]   ;;  %v1118_v56 = vld [vmem:[%s1182_s23 + $0x174] ss:$8 sps:$4 sm:$0xff]  }
  0x1e   : > { %v199_v57 = vld [vmem:[%s1182_s23 + $0x180] sm:$0xff]  ;;  %v1120_v59 = vld [vmem:[%s1182_s23 + $0x170] ss:$8 sps:$4 sm:$0xff]   ;;  %v1121_v60 = vld [vmem:[%s1182_s23 + $0xb4] ss:$8 sps:$4 sm:$0xff]  }
  0x1f   : > { %594 = vmatpush1.bf16.msra.mxu0 %v1051_v9  ;;  %1031 = vmatpush1.bf16.msra.mxu1 %v1051_v9  ;;  %v1117_v58 = vld [vmem:[%s1182_s23 + $0xa0] ss:$8 sps:$4 sm:$0xff]   ;;  %v976_v61 = vcombine.high %v199_v57, %v199_v57  ;;  %v1123_v62 = vld [vmem:[%s1182_s23 + $0xb0] ss:$8 sps:$4 sm:$0xff]   ;;  %v975_v63 = vcombine.low %v199_v57, %v199_v57  ;;  %v1126_v0 = vld [vmem:[%s1182_s23 + $0xc4] ss:$8 sps:$4 sm:$0xff]  }
  0x20   : > { %595 = vmatprep.subr.bf16.mxu0 %v1137_v1  ;;  %1022 = vmatprep.subr.bf16.mxu1 %v1137_v1 }
  0x23   : > { %596 = vmatpush1.bf16.msra.mxu0 %v1052_v10  ;;  %1032 = vmatpush1.bf16.msra.mxu1 %v1052_v10 }
  0x24   : > { %597 = vmatprep.subr.bf16.mxu0 %v1137_v1  ;;  %1023 = vmatprep.subr.bf16.mxu1 %v1137_v1 }
  0x27   : > { %598 = vmatpush1.bf16.msra.mxu0 %v1053_v13  ;;  %1033 = vmatpush1.bf16.msra.mxu1 %v1053_v13 }
  0x28   : > { %599 = vmatprep.subr.bf16.mxu0 %v1137_v1  ;;  %1024 = vmatprep.subr.bf16.mxu1 %v1137_v1  ;;  %v1128_v1 = vld [vmem:[%s1182_s23 + $0xc0] ss:$8 sps:$4 sm:$0xff]  }
  0x2b   : > { %600 = vmatpush1.bf16.msra.mxu0 %v579_v16  ;;  %1034 = vmatpush1.bf16.msra.mxu1 %v579_v16 }
  0x2e   : > { %614 = vmatmul.mubr.bf16.vlgmr.msra.gmra.mrb[0].mxu0 %v1055_v17  ;;  %718 = vmatmul.mubr.bf16.vlgmr.msra.gmra.mrb[0].mxu1 %v1058_v18 }
  0x2f   : > { %988 = vmatprep.mubr.msk.bf16.mxu0 %vm498_vm0, %v1061_v19  ;;  %1001 = vmatprep.mubr.msk.bf16.mxu1 %vm498_vm0, %v1064_v20 }
  0x36   : > { %622 = vmatmul.mubr.bf16.gmra.mrb[4].mxu0 %v1063_v21  ;;  %726 = vmatmul.mubr.bf16.gmra.mrb[4].mxu1 %v1066_v22 }
  0x37   : > { %989 = vmatprep.mubr.msk.bf16.mxu0 %vm498_vm0, %v1067_v23  ;;  %1002 = vmatprep.mubr.msk.bf16.mxu1 %vm498_vm0, %v1070_v24 }
  0x3e   : > { %630 = vmatmul.mubr.bf16.gmra.mrb[8].mxu0 %v1069_v25  ;;  %734 = vmatmul.mubr.bf16.gmra.mrb[8].mxu1 %v1072_v26 }
  0x3f   : > { %990 = vmatprep.mubr.msk.bf16.mxu0 %vm498_vm0, %v1073_v27  ;;  %1003 = vmatprep.mubr.msk.bf16.mxu1 %vm498_vm0, %v1076_v28 }
  0x46   : > { %638 = vmatmul.mubr.bf16.gmra.mrb[12].mxu0 %v1075_v29  ;;  %742 = vmatmul.mubr.bf16.gmra.mrb[12].mxu1 %v1078_v30 }
  0x47   : > { %991 = vmatprep.mubr.msk.bf16.mxu0 %vm498_vm0, %v1079_v31  ;;  %1004 = vmatprep.mubr.msk.bf16.mxu1 %vm498_vm0, %v1082_v32 }
  0x4e   : > { %646 = vmatmul.mubr.bf16.gmra.mrb[16].mxu0 %v1081_v33  ;;  %750 = vmatmul.mubr.bf16.gmra.mrb[16].mxu1 %v1084_v34 }
  0x4f   : > { %992 = vmatprep.mubr.msk.bf16.mxu0 %vm498_vm0, %v1085_v35  ;;  %1005 = vmatprep.mubr.msk.bf16.mxu1 %vm498_vm0, %v1088_v36 }
  0x56   : > { %654 = vmatmul.mubr.bf16.gmra.mrb[20].mxu0 %v1087_v37  ;;  %758 = vmatmul.mubr.bf16.gmra.mrb[20].mxu1 %v1090_v38 }
  0x57   : > { %993 = vmatprep.mubr.msk.bf16.mxu0 %vm498_vm0, %v1091_v39  ;;  %1006 = vmatprep.mubr.msk.bf16.mxu1 %vm498_vm0, %v1094_v40 }
  0x5e   : > { %662 = vmatmul.mubr.bf16.gmra.mrb[24].mxu0 %v1093_v41  ;;  %766 = vmatmul.mubr.bf16.gmra.mrb[24].mxu1 %v1096_v42 }
  0x5f   : > { %994 = vmatprep.mubr.msk.bf16.mxu0 %vm498_vm0, %v1097_v43  ;;  %1007 = vmatprep.mubr.msk.bf16.mxu1 %vm498_vm0, %v1100_v44 }
  0x66   : > { %670 = vmatmul.mubr.bf16.gmra.mrb[28].mxu0 %v1099_v45  ;;  %774 = vmatmul.mubr.bf16.gmra.mrb[28].mxu1 %v1102_v46 }
  0x67   : > { %995 = vmatprep.mubr.msk.bf16.mxu0 %vm498_vm0, %v1103_v47  ;;  %1008 = vmatprep.mubr.msk.bf16.mxu1 %vm498_vm0, %v1106_v48 }
  0x6e   : > { %678 = vmatmul.mubr.bf16.gmra.mrb[32].mxu0 %v1105_v49  ;;  %782 = vmatmul.mubr.bf16.gmra.mrb[32].mxu1 %v1108_v50 }
  0x6f   : > { %996 = vmatprep.mubr.msk.bf16.mxu0 %vm498_vm0, %v1109_v51  ;;  %1009 = vmatprep.mubr.msk.bf16.mxu1 %vm498_vm0, %v1112_v52 }
  0x76   : > { %686 = vmatmul.mubr.bf16.gmra.mrb[36].mxu0 %v1111_v53  ;;  %790 = vmatmul.mubr.bf16.gmra.mrb[36].mxu1 %v1114_v54 }
  0x77   : > { %997 = vmatprep.mubr.msk.bf16.mxu0 %vm498_vm0, %v1115_v55  ;;  %1010 = vmatprep.mubr.msk.bf16.mxu1 %vm498_vm0, %v1118_v56 }
  0x7e   : > { %694 = vmatmul.mubr.bf16.gmra.mrb[40].mxu0 %v1117_v58  ;;  %798 = vmatmul.mubr.bf16.gmra.mrb[40].mxu1 %v1120_v59 }
  0x7f   : > { %998 = vmatprep.mubr.msk.bf16.mxu0 %vm498_vm0, %v1121_v60  ;;  %1011 = vmatprep.mubr.msk.bf16.mxu1 %vm498_vm0, %v976_v61 }
  0x86   : > { %702 = vmatmul.mubr.bf16.gmra.mrb[44].mxu0 %v1123_v62  ;;  %806 = vmatmul.mubr.bf16.gmra.mrb[44].mxu1 %v975_v63 }
  0x87   : > { %999 = vmatprep.mubr.msk.bf16.mxu0 %vm498_vm0, %v1126_v0 }
  0x8e   : > { %710 = vmatmul.mubr.bf16.gmra.mrb[48].mxu0 %v1128_v1 }
 0x101   : > { %v615_v2 = vpop.f32.mrb[0].mxu0  ;;  %v719_v3 = vpop.f32.mrb[0].mxu1 }
 0x102   : > { %814 = vst.msk [vmem:[%s1281_s11] sm:$0xff] %vm813_vm3, %v615_v2  ;;  %v617_v4 = vpop.f32.mrb[1].mxu0  ;;  %840 = vst.msk [vmem:[%s1281_s11 + $0xd0] sm:$0xff] %vm813_vm3, %v719_v3  ;;  %v721_v5 = vpop.f32.mrb[1].mxu1 }
 0x103   : > { %v618_v6 = vpop.f32.mrb[2].mxu0  ;;  %v722_v7 = vpop.f32.mrb[2].mxu1 }
 0x104   : > { %815 = vst.msk [vmem:[%s1281_s11 + $0x8] sm:$0xff] %vm813_vm3, %v618_v6  ;;  %v620_v8 = vpop.f32.mrb[3].mxu0  ;;  %841 = vst.msk [vmem:[%s1281_s11 + $0xd8] sm:$0xff] %vm813_vm3, %v722_v7  ;;  %v724_v9 = vpop.f32.mrb[3].mxu1 }
 0x109   : > { %v623_v10 = vpop.f32.mrb[4].mxu0  ;;  %v727_v11 = vpop.f32.mrb[4].mxu1 }
 0x10a   : > { %816 = vst.msk [vmem:[%s1281_s11 + $0x10] sm:$0xff] %vm813_vm3, %v623_v10  ;;  %v625_v12 = vpop.f32.mrb[5].mxu0  ;;  %842 = vst.msk [vmem:[%s1281_s11 + $0xe0] sm:$0xff] %vm813_vm3, %v727_v11  ;;  %v729_v13 = vpop.f32.mrb[5].mxu1 }
 0x10b   : > { %v626_v14 = vpop.f32.mrb[6].mxu0  ;;  %v730_v15 = vpop.f32.mrb[6].mxu1 }
 0x10c   : > { %817 = vst.msk [vmem:[%s1281_s11 + $0x18] sm:$0xff] %vm813_vm3, %v626_v14  ;;  %v628_v16 = vpop.f32.mrb[7].mxu0  ;;  %843 = vst.msk [vmem:[%s1281_s11 + $0xe8] sm:$0xff] %vm813_vm3, %v730_v15  ;;  %v732_v17 = vpop.f32.mrb[7].mxu1 }
 0x111   : > { %v631_v18 = vpop.f32.mrb[8].mxu0  ;;  %v735_v19 = vpop.f32.mrb[8].mxu1 }
 0x112   : > { %818 = vst.msk [vmem:[%s1281_s11 + $0x20] sm:$0xff] %vm813_vm3, %v631_v18  ;;  %v633_v20 = vpop.f32.mrb[9].mxu0  ;;  %844 = vst.msk [vmem:[%s1281_s11 + $0xf0] sm:$0xff] %vm813_vm3, %v735_v19  ;;  %v737_v21 = vpop.f32.mrb[9].mxu1 }
 0x113   : > { %v634_v22 = vpop.f32.mrb[10].mxu0  ;;  %v738_v23 = vpop.f32.mrb[10].mxu1 }
 0x114   : > { %819 = vst.msk [vmem:[%s1281_s11 + $0x28] sm:$0xff] %vm813_vm3, %v634_v22  ;;  %v636_v24 = vpop.f32.mrb[11].mxu0  ;;  %845 = vst.msk [vmem:[%s1281_s11 + $0xf8] sm:$0xff] %vm813_vm3, %v738_v23  ;;  %v740_v25 = vpop.f32.mrb[11].mxu1 }
 0x119   : > { %v639_v26 = vpop.f32.mrb[12].mxu0  ;;  %v743_v27 = vpop.f32.mrb[12].mxu1 }
 0x11a   : > { %820 = vst.msk [vmem:[%s1281_s11 + $0x30] sm:$0xff] %vm813_vm3, %v639_v26  ;;  %v641_v28 = vpop.f32.mrb[13].mxu0  ;;  %846 = vst.msk [vmem:[%s1281_s11 + $0x100] sm:$0xff] %vm813_vm3, %v743_v27  ;;  %v745_v29 = vpop.f32.mrb[13].mxu1 }
 0x11b   : > { %v642_v30 = vpop.f32.mrb[14].mxu0  ;;  %v746_v31 = vpop.f32.mrb[14].mxu1 }
 0x11c   : > { %821 = vst.msk [vmem:[%s1281_s11 + $0x38] sm:$0xff] %vm813_vm3, %v642_v30  ;;  %v644_v32 = vpop.f32.mrb[15].mxu0  ;;  %847 = vst.msk [vmem:[%s1281_s11 + $0x108] sm:$0xff] %vm813_vm3, %v746_v31  ;;  %v748_v33 = vpop.f32.mrb[15].mxu1 }
 0x121   : > { %v647_v34 = vpop.f32.mrb[16].mxu0  ;;  %v751_v35 = vpop.f32.mrb[16].mxu1 }
 0x122   : > { %822 = vst.msk [vmem:[%s1281_s11 + $0x40] sm:$0xff] %vm813_vm3, %v647_v34  ;;  %v649_v36 = vpop.f32.mrb[17].mxu0  ;;  %848 = vst.msk [vmem:[%s1281_s11 + $0x110] sm:$0xff] %vm813_vm3, %v751_v35  ;;  %v753_v37 = vpop.f32.mrb[17].mxu1 }
 0x123   : > { %v650_v38 = vpop.f32.mrb[18].mxu0  ;;  %v754_v39 = vpop.f32.mrb[18].mxu1 }
 0x124   : > { %823 = vst.msk [vmem:[%s1281_s11 + $0x48] sm:$0xff] %vm813_vm3, %v650_v38  ;;  %v652_v40 = vpop.f32.mrb[19].mxu0  ;;  %849 = vst.msk [vmem:[%s1281_s11 + $0x118] sm:$0xff] %vm813_vm3, %v754_v39  ;;  %v756_v41 = vpop.f32.mrb[19].mxu1 }
 0x129   : > { %v655_v42 = vpop.f32.mrb[20].mxu0  ;;  %v759_v43 = vpop.f32.mrb[20].mxu1 }
 0x12a   : > { %824 = vst.msk [vmem:[%s1281_s11 + $0x50] sm:$0xff] %vm813_vm3, %v655_v42  ;;  %v657_v44 = vpop.f32.mrb[21].mxu0  ;;  %850 = vst.msk [vmem:[%s1281_s11 + $0x120] sm:$0xff] %vm813_vm3, %v759_v43  ;;  %v761_v45 = vpop.f32.mrb[21].mxu1 }
 0x12b   : > { %v658_v46 = vpop.f32.mrb[22].mxu0  ;;  %v762_v47 = vpop.f32.mrb[22].mxu1 }
 0x12c   : > { %825 = vst.msk [vmem:[%s1281_s11 + $0x58] sm:$0xff] %vm813_vm3, %v658_v46  ;;  %v660_v48 = vpop.f32.mrb[23].mxu0  ;;  %851 = vst.msk [vmem:[%s1281_s11 + $0x128] sm:$0xff] %vm813_vm3, %v762_v47  ;;  %v764_v49 = vpop.f32.mrb[23].mxu1 }
 0x131   : > { %v663_v50 = vpop.f32.mrb[24].mxu0  ;;  %v767_v51 = vpop.f32.mrb[24].mxu1 }
 0x132   : > { %826 = vst.msk [vmem:[%s1281_s11 + $0x60] sm:$0xff] %vm813_vm3, %v663_v50  ;;  %v665_v52 = vpop.f32.mrb[25].mxu0  ;;  %852 = vst.msk [vmem:[%s1281_s11 + $0x130] sm:$0xff] %vm813_vm3, %v767_v51  ;;  %v769_v53 = vpop.f32.mrb[25].mxu1 }
 0x133   : > { %v666_v54 = vpop.f32.mrb[26].mxu0  ;;  %v770_v55 = vpop.f32.mrb[26].mxu1 }
 0x134   : > { %827 = vst.msk [vmem:[%s1281_s11 + $0x68] sm:$0xff] %vm813_vm3, %v666_v54  ;;  %v668_v56 = vpop.f32.mrb[27].mxu0  ;;  %853 = vst.msk [vmem:[%s1281_s11 + $0x138] sm:$0xff] %vm813_vm3, %v770_v55  ;;  %v772_v57 = vpop.f32.mrb[27].mxu1 }
 0x139   : > { %v671_v58 = vpop.f32.mrb[28].mxu0  ;;  %v775_v59 = vpop.f32.mrb[28].mxu1 }
 0x13a   : > { %828 = vst.msk [vmem:[%s1281_s11 + $0x70] sm:$0xff] %vm813_vm3, %v671_v58  ;;  %v673_v60 = vpop.f32.mrb[29].mxu0  ;;  %854 = vst.msk [vmem:[%s1281_s11 + $0x140] sm:$0xff] %vm813_vm3, %v775_v59  ;;  %v777_v61 = vpop.f32.mrb[29].mxu1 }
 0x13b   : > { %v674_v62 = vpop.f32.mrb[30].mxu0  ;;  %v778_v63 = vpop.f32.mrb[30].mxu1 }
 0x13c   : > { %829 = vst.msk [vmem:[%s1281_s11 + $0x78] sm:$0xff] %vm813_vm3, %v674_v62  ;;  %v676_v0 = vpop.f32.mrb[31].mxu0  ;;  %855 = vst.msk [vmem:[%s1281_s11 + $0x148] sm:$0xff] %vm813_vm3, %v778_v63  ;;  %v780_v1 = vpop.f32.mrb[31].mxu1 }
 0x141   : > { %v679_v2 = vpop.f32.mrb[32].mxu0  ;;  %v783_v3 = vpop.f32.mrb[32].mxu1 }
 0x142   : > { %830 = vst.msk [vmem:[%s1281_s11 + $0x80] sm:$0xff] %vm813_vm3, %v679_v2  ;;  %v681_v4 = vpop.f32.mrb[33].mxu0  ;;  %856 = vst.msk [vmem:[%s1281_s11 + $0x150] sm:$0xff] %vm813_vm3, %v783_v3  ;;  %v785_v5 = vpop.f32.mrb[33].mxu1 }
 0x143   : > { %v682_v6 = vpop.f32.mrb[34].mxu0  ;;  %v786_v7 = vpop.f32.mrb[34].mxu1 }
 0x144   : > { %831 = vst.msk [vmem:[%s1281_s11 + $0x88] sm:$0xff] %vm813_vm3, %v682_v6  ;;  %v684_v8 = vpop.f32.mrb[35].mxu0  ;;  %857 = vst.msk [vmem:[%s1281_s11 + $0x158] sm:$0xff] %vm813_vm3, %v786_v7  ;;  %v788_v9 = vpop.f32.mrb[35].mxu1 }
 0x149   : > { %v687_v10 = vpop.f32.mrb[36].mxu0  ;;  %v791_v11 = vpop.f32.mrb[36].mxu1 }
 0x14a   : > { %832 = vst.msk [vmem:[%s1281_s11 + $0x90] sm:$0xff] %vm813_vm3, %v687_v10  ;;  %v689_v12 = vpop.f32.mrb[37].mxu0  ;;  %858 = vst.msk [vmem:[%s1281_s11 + $0x160] sm:$0xff] %vm813_vm3, %v791_v11  ;;  %v793_v13 = vpop.f32.mrb[37].mxu1 }
 0x14b   : > { %v690_v14 = vpop.f32.mrb[38].mxu0  ;;  %v794_v15 = vpop.f32.mrb[38].mxu1 }
 0x14c   : > { %833 = vst.msk [vmem:[%s1281_s11 + $0x98] sm:$0xff] %vm813_vm3, %v690_v14  ;;  %v692_v16 = vpop.f32.mrb[39].mxu0  ;;  %859 = vst.msk [vmem:[%s1281_s11 + $0x168] sm:$0xff] %vm813_vm3, %v794_v15  ;;  %v796_v17 = vpop.f32.mrb[39].mxu1 }
 0x151   : > { %v695_v18 = vpop.f32.mrb[40].mxu0  ;;  %v799_v19 = vpop.f32.mrb[40].mxu1 }
 0x152   : > { %834 = vst.msk [vmem:[%s1281_s11 + $0xa0] sm:$0xff] %vm813_vm3, %v695_v18  ;;  %v697_v20 = vpop.f32.mrb[41].mxu0  ;;  %860 = vst.msk [vmem:[%s1281_s11 + $0x170] sm:$0xff] %vm813_vm3, %v799_v19  ;;  %v801_v21 = vpop.f32.mrb[41].mxu1 }
 0x153   : > { %v698_v22 = vpop.f32.mrb[42].mxu0  ;;  %v802_v23 = vpop.f32.mrb[42].mxu1 }
 0x154   : > { %835 = vst.msk [vmem:[%s1281_s11 + $0xa8] sm:$0xff] %vm813_vm3, %v698_v22  ;;  %v700_v24 = vpop.f32.mrb[43].mxu0  ;;  %861 = vst.msk [vmem:[%s1281_s11 + $0x178] sm:$0xff] %vm813_vm3, %v802_v23  ;;  %v804_v25 = vpop.f32.mrb[43].mxu1 }
 0x159   : > { %v703_v26 = vpop.f32.mrb[44].mxu0  ;;  %v807_v27 = vpop.f32.mrb[44].mxu1 }
 0x15a   : > { %836 = vst.msk [vmem:[%s1281_s11 + $0xb0] sm:$0xff] %vm813_vm3, %v703_v26  ;;  %v705_v28 = vpop.f32.mrb[45].mxu0  ;;  %862 = vst.msk [vmem:[%s1281_s11 + $0x180] sm:$0xff] %vm813_vm3, %v807_v27  ;;  %v809_v29 = vpop.f32.mrb[45].mxu1 }
 0x15b   : > { %v706_v30 = vpop.f32.mrb[46].mxu0  ;;  %v810_v31 = vpop.f32.mrb[46].mxu1 }
 0x15c   : > { %837 = vst.msk [vmem:[%s1281_s11 + $0xb8] sm:$0xff] %vm813_vm3, %v706_v30  ;;  %v708_v32 = vpop.f32.mrb[47].mxu0  ;;  %v811_v33 = vpop.f32.mrb[47].mxu1 }
 0x161   : > { %v711_v34 = vpop.f32.mrb[48].mxu0 }
 0x162   : > { %838 = vst.msk [vmem:[%s1281_s11 + $0xc0] sm:$0xff] %vm813_vm3, %v711_v34  ;;  %v713_v35 = vpop.f32.mrb[49].mxu0 }
 0x163   : > { %v714_v36 = vpop.f32.mrb[50].mxu0 }
 0x164   : > { %839 = vst.msk [vmem:[%s1281_s11 + $0xc8] sm:$0xff] %vm813_vm3, %v714_v36  ;;  %v716_v37 = vpop.f32.mrb[51].mxu0 }
 0x165 PF: > { %s12_s9 = sadd.s32 1, %s1135_s9  }
 0x166   : > { %p9_p4 = scmp.ge.s32.totalorder %s12_s9, 6  }
 0x168   :  { %11 = sbr.rel (!%p9_p4) target bundleno = 1 (0x1), region = 58 }

// kernel: sparsenet_forward.24
= control target key start
LH: loop header
LB: loop body
LE: loop exit
PB: predicated region body
PF: predicated region fallthrough
CT: control target
= control target key end

     0   :  { %s537_s12 = smov 0   ;;  %s813_s0 = inlined_call_operand.vmem [shape: f32[1568,8], index: 0, kind: input, shape index: {}]   ;;  %s814_s1 = inlined_call_operand.vmem [shape: f32[1,8], index: 1, kind: input, shape index: {}]   ;;  %s815_s2 = inlined_call_operand.vmem [shape: f32[1,8], index: 2, kind: input, shape index: {}]   ;;  %s816_s3 = inlined_call_operand.vmem [shape: f32[1568,8], index: 3, kind: output, shape index: {}]  }
   0x1 LB: > { %s490_s13 = sadd.s32 4294967295, %s515_s12   ;;  %p494_p0 = scmp.ge.s32.totalorder %s515_s12, 1  ;;  %s515_s12 = sphi %s537_s12, %s13_s12  }
   0x2   : > { %p138_p1 = scmp.lt.s32.totalorder %s515_s12, 5 }
   0x4   : > { %p139_p2 = pnand %p494_p0, %p138_p1 }
   0x5   : > { %s162_s14 = smul.u32 (!%p139_p2), 49, %s490_s13  ;;  %v548_v0 = vld [vmem:[%s814_s1] ss:$0 sm:$0xff] (!%p139_p2)  ;;  %vm384_vm0 = vcmask (!%p139_p2), 64512  }
   0x6   : > { %142 = sbr.rel (%p139_p2) target bundleno = 60 (0x3c), region = 32  ;;  %v558_v1 = vld [vmem:[%s815_s2] ss:$0 sm:$0xff] (!%p139_p2) }
   0x7   : > { %p163_p3 = scmp.lt.s32.totalorder (!%p139_p2), %s162_s14, 195 }
   0xd   : > { %s818_s14 = smov (!%p163_p3, %s162_s14), 195 }
   0xe   : > { %s495_s15 = sshll.u32 %s818_s14, 3 }
   0xf   : > { %s553_s20 = scalar_lea.vmem %s813_s0, %s495_s15  ;;  %s581_s25 = scalar_lea.vmem %s816_s3, %s495_s15 }
  0x10   : > { %v174_v2 = vld [vmem:[%s553_s20] sm:$0xff]  ;;  %v175_v3 = vld [vmem:[%s553_s20 + $0x8] sm:$0xff]  ;;  %v176_v4 = vld [vmem:[%s553_s20 + $0x10] sm:$0xff] }
  0x11   : > { %v230_v5 = vmul.f32 %v548_v0, %v174_v2  ;;  %v231_v6 = vmul.f32 %v548_v0, %v175_v3  ;;  %v232_v7 = vmul.f32 %v548_v0, %v176_v4  ;;  %v177_v8 = vld [vmem:[%s553_s20 + $0x18] sm:$0xff]  ;;  %v178_v9 = vld [vmem:[%s553_s20 + $0x20] sm:$0xff]  ;;  %v179_v10 = vld [vmem:[%s553_s20 + $0x28] sm:$0xff] }
  0x12   : > { %v233_v11 = vmul.f32 %v548_v0, %v177_v8  ;;  %v234_v12 = vmul.f32 %v548_v0, %v178_v9  ;;  %v235_v13 = vmul.f32 %v548_v0, %v179_v10  ;;  %v180_v14 = vld [vmem:[%s553_s20 + $0x30] sm:$0xff]  ;;  %v181_v15 = vld [vmem:[%s553_s20 + $0x38] sm:$0xff]  ;;  %v182_v24 = vld [vmem:[%s553_s20 + $0x40] sm:$0xff] }
  0x13   : > { %v286_v16 = vadd.f32 %v558_v1, %v230_v5  ;;  %v287_v17 = vadd.f32 %v558_v1, %v231_v6  ;;  %v288_v18 = vadd.f32 %v558_v1, %v232_v7  ;;  %v236_v19 = vmul.f32 %v548_v0, %v180_v14  ;;  %v183_v25 = vld [vmem:[%s553_s20 + $0x48] sm:$0xff]  ;;  %v184_v26 = vld [vmem:[%s553_s20 + $0x50] sm:$0xff]  ;;  %v185_v31 = vld [vmem:[%s553_s20 + $0x58] sm:$0xff] }
  0x14   : > { %v289_v20 = vadd.f32 %v558_v1, %v233_v11  ;;  %v290_v21 = vadd.f32 %v558_v1, %v234_v12  ;;  %v291_v22 = vadd.f32 %v558_v1, %v235_v13  ;;  %v237_v23 = vmul.f32 %v548_v0, %v181_v15  ;;  %v186_v32 = vld [vmem:[%s553_s20 + $0x60] sm:$0xff]  ;;  %v187_v33 = vld [vmem:[%s553_s20 + $0x68] sm:$0xff]  ;;  %v188_v38 = vld [vmem:[%s553_s20 + $0x70] sm:$0xff] }
  0x15   : > { %v335_v27 = vmax.f32 %v286_v16, 0.0  ;;  %v336_v28 = vmax.f32 %v287_v17, 0.0  ;;  %v337_v29 = vmax.f32 %v288_v18, 0.0  ;;  %v292_v30 = vadd.f32 %v558_v1, %v236_v19  ;;  %v189_v43 = vld [vmem:[%s553_s20 + $0x78] sm:$0xff]  ;;  %v190_v56 = vld [vmem:[%s553_s20 + $0x80] sm:$0xff]  ;;  %v191_v57 = vld [vmem:[%s553_s20 + $0x88] sm:$0xff] }
  0x16   : > { %v338_v34 = vmax.f32 %v289_v20, 0.0  ;;  %v339_v35 = vmax.f32 %v290_v21, 0.0  ;;  %v340_v36 = vmax.f32 %v291_v22, 0.0  ;;  %v293_v37 = vadd.f32 %v558_v1, %v237_v23  ;;  %v192_v58 = vld [vmem:[%s553_s20 + $0x90] sm:$0xff]  ;;  %v193_v63 = vld [vmem:[%s553_s20 + $0x98] sm:$0xff]  ;;  %v194_v2 = vld [vmem:[%s553_s20 + $0xa0] sm:$0xff] }
  0x17   : > { %385 = vst.msk [vmem:[%s581_s25] sm:$0xff] %vm384_vm0, %v335_v27  ;;  %386 = vst.msk [vmem:[%s581_s25 + $0x8] sm:$0xff] %vm384_vm0, %v336_v28  ;;  %v341_v39 = vmax.f32 %v292_v30, 0.0  ;;  %v238_v40 = vmul.f32 %v548_v0, %v182_v24  ;;  %v239_v41 = vmul.f32 %v548_v0, %v183_v25  ;;  %v240_v42 = vmul.f32 %v548_v0, %v184_v26  ;;  %v195_v3 = vld [vmem:[%s553_s20 + $0xa8] sm:$0xff]  ;;  %v196_v8 = vld [vmem:[%s553_s20 + $0xb0] sm:$0xff] }
  0x18   : > { %387 = vst.msk [vmem:[%s581_s25 + $0x10] sm:$0xff] %vm384_vm0, %v337_v29  ;;  %388 = vst.msk [vmem:[%s581_s25 + $0x18] sm:$0xff] %vm384_vm0, %v338_v34  ;;  %v342_v44 = vmax.f32 %v293_v37, 0.0  ;;  %v241_v45 = vmul.f32 %v548_v0, %v185_v31  ;;  %v242_v46 = vmul.f32 %v548_v0, %v186_v32  ;;  %v243_v47 = vmul.f32 %v548_v0, %v187_v33  ;;  %v197_v13 = vld [vmem:[%s553_s20 + $0xb8] sm:$0xff]  ;;  %v198_v26 = vld [vmem:[%s553_s20 + $0xc0] sm:$0xff] }
  0x19   : > { %389 = vst.msk [vmem:[%s581_s25 + $0x20] sm:$0xff] %vm384_vm0, %v339_v35  ;;  %390 = vst.msk [vmem:[%s581_s25 + $0x28] sm:$0xff] %vm384_vm0, %v340_v36  ;;  %v294_v48 = vadd.f32 %v558_v1, %v238_v40  ;;  %v295_v49 = vadd.f32 %v558_v1, %v239_v41  ;;  %v296_v50 = vadd.f32 %v558_v1, %v240_v42  ;;  %v199_v27 = vld [vmem:[%s553_s20 + $0xc8] sm:$0xff]  ;;  %v200_v28 = vld [vmem:[%s553_s20 + $0xd0] sm:$0xff] }
  0x1a   : > { %391 = vst.msk [vmem:[%s581_s25 + $0x30] sm:$0xff] %vm384_vm0, %v341_v39  ;;  %v244_v51 = vmul.f32 %v548_v0, %v188_v38  ;;  %392 = vst.msk [vmem:[%s581_s25 + $0x38] sm:$0xff] %vm384_vm0, %v342_v44  ;;  %v297_v52 = vadd.f32 %v558_v1, %v241_v45  ;;  %v298_v53 = vadd.f32 %v558_v1, %v242_v46  ;;  %v201_v33 = vld [vmem:[%s553_s20 + $0xd8] sm:$0xff]  ;;  %v202_v34 = vld [vmem:[%s553_s20 + $0xe0] sm:$0xff] }
  0x1b   : > { %v299_v54 = vadd.f32 %v558_v1, %v243_v47  ;;  %v245_v55 = vmul.f32 %v548_v0, %v189_v43  ;;  %v343_v59 = vmax.f32 %v294_v48, 0.0  ;;  %v344_v60 = vmax.f32 %v295_v49, 0.0  ;;  %v203_v35 = vld [vmem:[%s553_s20 + $0xe8] sm:$0xff]  ;;  %v204_v40 = vld [vmem:[%s553_s20 + $0xf0] sm:$0xff]  ;;  %v205_v45 = vld [vmem:[%s553_s20 + $0xf8] sm:$0xff] }
  0x1c   : > { %v345_v61 = vmax.f32 %v296_v50, 0.0  ;;  %v300_v62 = vadd.f32 %v558_v1, %v244_v51  ;;  %v346_v4 = vmax.f32 %v297_v52, 0.0  ;;  %v347_v5 = vmax.f32 %v298_v53, 0.0 }
  0x1d   : > { %v348_v6 = vmax.f32 %v299_v54, 0.0  ;;  %v301_v7 = vadd.f32 %v558_v1, %v245_v55  ;;  %393 = vst.msk [vmem:[%s581_s25 + $0x40] sm:$0xff] %vm384_vm0, %v343_v59  ;;  %394 = vst.msk [vmem:[%s581_s25 + $0x48] sm:$0xff] %vm384_vm0, %v344_v60  ;;  %v246_v10 = vmul.f32 %v548_v0, %v190_v56  ;;  %v247_v11 = vmul.f32 %v548_v0, %v191_v57  ;;  %v207_v59 = vld [vmem:[%s553_s20 + $0x108] sm:$0xff]  ;;  %v208_v60 = vld [vmem:[%s553_s20 + $0x110] sm:$0xff] }
  0x1e   : > { %395 = vst.msk [vmem:[%s581_s25 + $0x50] sm:$0xff] %vm384_vm0, %v345_v61  ;;  %v349_v9 = vmax.f32 %v300_v62, 0.0  ;;  %v248_v12 = vmul.f32 %v548_v0, %v192_v58  ;;  %396 = vst.msk [vmem:[%s581_s25 + $0x58] sm:$0xff] %vm384_vm0, %v346_v4  ;;  %v249_v15 = vmul.f32 %v548_v0, %v193_v63  ;;  %v250_v16 = vmul.f32 %v548_v0, %v194_v2  ;;  %v206_v58 = vld [vmem:[%s553_s20 + $0x100] sm:$0xff] }
  0x1f   : > { %397 = vst.msk [vmem:[%s581_s25 + $0x60] sm:$0xff] %vm384_vm0, %v347_v5  ;;  %398 = vst.msk [vmem:[%s581_s25 + $0x68] sm:$0xff] %vm384_vm0, %v348_v6  ;;  %v350_v14 = vmax.f32 %v301_v7, 0.0  ;;  %v251_v17 = vmul.f32 %v548_v0, %v195_v3  ;;  %v302_v18 = vadd.f32 %v558_v1, %v246_v10  ;;  %v303_v19 = vadd.f32 %v558_v1, %v247_v11  ;;  %v209_v3 = vld [vmem:[%s553_s20 + $0x118] sm:$0xff]  ;;  %v210_v4 = vld [vmem:[%s553_s20 + $0x120] sm:$0xff] }
  0x20   : > { %399 = vst.msk [vmem:[%s581_s25 + $0x70] sm:$0xff] %vm384_vm0, %v349_v9  ;;  %v304_v20 = vadd.f32 %v558_v1, %v248_v12  ;;  %v252_v21 = vmul.f32 %v548_v0, %v196_v8  ;;  %v305_v22 = vadd.f32 %v558_v1, %v249_v15  ;;  %v306_v23 = vadd.f32 %v558_v1, %v250_v16  ;;  %v211_v5 = vld [vmem:[%s553_s20 + $0x128] sm:$0xff]  ;;  %v212_v10 = vld [vmem:[%s553_s20 + $0x130] sm:$0xff]  ;;  %v213_v15 = vld [vmem:[%s553_s20 + $0x138] sm:$0xff] }
  0x21   : > { %400 = vst.msk [vmem:[%s581_s25 + $0x78] sm:$0xff] %vm384_vm0, %v350_v14  ;;  %v307_v24 = vadd.f32 %v558_v1, %v251_v17  ;;  %v253_v25 = vmul.f32 %v548_v0, %v197_v13  ;;  %v351_v29 = vmax.f32 %v302_v18, 0.0  ;;  %v352_v30 = vmax.f32 %v303_v19, 0.0 }
  0x22   : > { %v353_v31 = vmax.f32 %v304_v20, 0.0  ;;  %v308_v32 = vadd.f32 %v558_v1, %v252_v21  ;;  %v354_v36 = vmax.f32 %v305_v22, 0.0  ;;  %v355_v37 = vmax.f32 %v306_v23, 0.0 }
  0x23   : > { %v356_v38 = vmax.f32 %v307_v24, 0.0  ;;  %v309_v39 = vadd.f32 %v558_v1, %v253_v25  ;;  %401 = vst.msk [vmem:[%s581_s25 + $0x80] sm:$0xff] %vm384_vm0, %v351_v29  ;;  %402 = vst.msk [vmem:[%s581_s25 + $0x88] sm:$0xff] %vm384_vm0, %v352_v30  ;;  %v254_v42 = vmul.f32 %v548_v0, %v198_v26  ;;  %v255_v43 = vmul.f32 %v548_v0, %v199_v27  ;;  %v215_v29 = vld [vmem:[%s553_s20 + $0x148] sm:$0xff]  ;;  %v216_v30 = vld [vmem:[%s553_s20 + $0x150] sm:$0xff] }
  0x24   : > { %403 = vst.msk [vmem:[%s581_s25 + $0x90] sm:$0xff] %vm384_vm0, %v353_v31  ;;  %v357_v41 = vmax.f32 %v308_v32, 0.0  ;;  %v256_v44 = vmul.f32 %v548_v0, %v200_v28  ;;  %404 = vst.msk [vmem:[%s581_s25 + $0x98] sm:$0xff] %vm384_vm0, %v354_v36  ;;  %v257_v47 = vmul.f32 %v548_v0, %v201_v33  ;;  %v258_v48 = vmul.f32 %v548_v0, %v202_v34  ;;  %v214_v28 = vld [vmem:[%s553_s20 + $0x140] sm:$0xff] }
  0x25   : > { %405 = vst.msk [vmem:[%s581_s25 + $0xa0] sm:$0xff] %vm384_vm0, %v355_v37  ;;  %406 = vst.msk [vmem:[%s581_s25 + $0xa8] sm:$0xff] %vm384_vm0, %v356_v38  ;;  %v358_v46 = vmax.f32 %v309_v39, 0.0  ;;  %v259_v49 = vmul.f32 %v548_v0, %v203_v35  ;;  %v310_v50 = vadd.f32 %v558_v1, %v254_v42  ;;  %v311_v51 = vadd.f32 %v558_v1, %v255_v43  ;;  %v217_v35 = vld [vmem:[%s553_s20 + $0x158] sm:$0xff]  ;;  %v218_v36 = vld [vmem:[%s553_s20 + $0x160] sm:$0xff] }
  0x26   : > { %407 = vst.msk [vmem:[%s581_s25 + $0xb0] sm:$0xff] %vm384_vm0, %v357_v41  ;;  %v312_v52 = vadd.f32 %v558_v1, %v256_v44  ;;  %v260_v53 = vmul.f32 %v548_v0, %v204_v40  ;;  %v313_v54 = vadd.f32 %v558_v1, %v257_v47  ;;  %v314_v55 = vadd.f32 %v558_v1, %v258_v48  ;;  %v219_v37 = vld [vmem:[%s553_s20 + $0x168] sm:$0xff]  ;;  %v220_v42 = vld [vmem:[%s553_s20 + $0x170] sm:$0xff]  ;;  %v221_v47 = vld [vmem:[%s553_s20 + $0x178] sm:$0xff] }
  0x27   : > { %408 = vst.msk [vmem:[%s581_s25 + $0xb8] sm:$0xff] %vm384_vm0, %v358_v46  ;;  %v315_v56 = vadd.f32 %v558_v1, %v259_v49  ;;  %v261_v57 = vmul.f32 %v548_v0, %v205_v45  ;;  %v359_v61 = vmax.f32 %v310_v50, 0.0  ;;  %v360_v62 = vmax.f32 %v311_v51, 0.0 }
  0x28   : > { %v361_v63 = vmax.f32 %v312_v52, 0.0  ;;  %v316_v2 = vadd.f32 %v558_v1, %v260_v53  ;;  %v362_v6 = vmax.f32 %v313_v54, 0.0  ;;  %v363_v7 = vmax.f32 %v314_v55, 0.0 }
  0x29   : > { %v364_v8 = vmax.f32 %v315_v56, 0.0  ;;  %v317_v9 = vadd.f32 %v558_v1, %v261_v57  ;;  %409 = vst.msk [vmem:[%s581_s25 + $0xc0] sm:$0xff] %vm384_vm0, %v359_v61  ;;  %410 = vst.msk [vmem:[%s581_s25 + $0xc8] sm:$0xff] %vm384_vm0, %v360_v62  ;;  %v262_v12 = vmul.f32 %v548_v0, %v206_v58  ;;  %v263_v13 = vmul.f32 %v548_v0, %v207_v59 }
  0x2a   : > { %411 = vst.msk [vmem:[%s581_s25 + $0xd0] sm:$0xff] %vm384_vm0, %v361_v63  ;;  %v365_v11 = vmax.f32 %v316_v2, 0.0  ;;  %v264_v14 = vmul.f32 %v548_v0, %v208_v60  ;;  %412 = vst.msk [vmem:[%s581_s25 + $0xd8] sm:$0xff] %vm384_vm0, %v362_v6  ;;  %v265_v17 = vmul.f32 %v548_v0, %v209_v3  ;;  %v266_v18 = vmul.f32 %v548_v0, %v210_v4  ;;  %v222_v60 = vld [vmem:[%s553_s20 + $0x180] sm:$0xff] }
  0x2b   : > { %413 = vst.msk [vmem:[%s581_s25 + $0xe0] sm:$0xff] %vm384_vm0, %v363_v7  ;;  %414 = vst.msk [vmem:[%s581_s25 + $0xe8] sm:$0xff] %vm384_vm0, %v364_v8  ;;  %v366_v16 = vmax.f32 %v317_v9, 0.0  ;;  %v267_v19 = vmul.f32 %v548_v0, %v211_v5  ;;  %v318_v20 = vadd.f32 %v558_v1, %v262_v12  ;;  %v319_v21 = vadd.f32 %v558_v1, %v263_v13 }
  0x2c   : > { %415 = vst.msk [vmem:[%s581_s25 + $0xf0] sm:$0xff] %vm384_vm0, %v365_v11  ;;  %v320_v22 = vadd.f32 %v558_v1, %v264_v14  ;;  %v268_v23 = vmul.f32 %v548_v0, %v212_v10  ;;  %v321_v24 = vadd.f32 %v558_v1, %v265_v17  ;;  %v322_v25 = vadd.f32 %v558_v1, %v266_v18 }
  0x2d   : > { %416 = vst.msk [vmem:[%s581_s25 + $0xf8] sm:$0xff] %vm384_vm0, %v366_v16  ;;  %v323_v26 = vadd.f32 %v558_v1, %v267_v19  ;;  %v269_v27 = vmul.f32 %v548_v0, %v213_v15  ;;  %v367_v31 = vmax.f32 %v318_v20, 0.0  ;;  %v368_v32 = vmax.f32 %v319_v21, 0.0 }
  0x2e   : > { %v369_v33 = vmax.f32 %v320_v22, 0.0  ;;  %v324_v34 = vadd.f32 %v558_v1, %v268_v23  ;;  %v370_v38 = vmax.f32 %v321_v24, 0.0  ;;  %v371_v39 = vmax.f32 %v322_v25, 0.0 }
  0x2f   : > { %v372_v40 = vmax.f32 %v323_v26, 0.0  ;;  %v325_v41 = vadd.f32 %v558_v1, %v269_v27  ;;  %417 = vst.msk [vmem:[%s581_s25 + $0x100] sm:$0xff] %vm384_vm0, %v367_v31  ;;  %418 = vst.msk [vmem:[%s581_s25 + $0x108] sm:$0xff] %vm384_vm0, %v368_v32  ;;  %v270_v44 = vmul.f32 %v548_v0, %v214_v28  ;;  %v271_v45 = vmul.f32 %v548_v0, %v215_v29 }
  0x30   : > { %419 = vst.msk [vmem:[%s581_s25 + $0x110] sm:$0xff] %vm384_vm0, %v369_v33  ;;  %v373_v43 = vmax.f32 %v324_v34, 0.0  ;;  %v272_v46 = vmul.f32 %v548_v0, %v216_v30  ;;  %420 = vst.msk [vmem:[%s581_s25 + $0x118] sm:$0xff] %vm384_vm0, %v370_v38  ;;  %v273_v49 = vmul.f32 %v548_v0, %v217_v35  ;;  %v274_v50 = vmul.f32 %v548_v0, %v218_v36 }
  0x31   : > { %421 = vst.msk [vmem:[%s581_s25 + $0x120] sm:$0xff] %vm384_vm0, %v371_v39  ;;  %422 = vst.msk [vmem:[%s581_s25 + $0x128] sm:$0xff] %vm384_vm0, %v372_v40  ;;  %v374_v48 = vmax.f32 %v325_v41, 0.0  ;;  %v275_v51 = vmul.f32 %v548_v0, %v219_v37  ;;  %v326_v52 = vadd.f32 %v558_v1, %v270_v44  ;;  %v327_v53 = vadd.f32 %v558_v1, %v271_v45 }
  0x32   : > { %423 = vst.msk [vmem:[%s581_s25 + $0x130] sm:$0xff] %vm384_vm0, %v373_v43  ;;  %v328_v54 = vadd.f32 %v558_v1, %v272_v46  ;;  %v276_v55 = vmul.f32 %v548_v0, %v220_v42  ;;  %v329_v56 = vadd.f32 %v558_v1, %v273_v49  ;;  %v330_v57 = vadd.f32 %v558_v1, %v274_v50 }
  0x33   : > { %424 = vst.msk [vmem:[%s581_s25 + $0x138] sm:$0xff] %vm384_vm0, %v374_v48  ;;  %v331_v58 = vadd.f32 %v558_v1, %v275_v51  ;;  %v277_v59 = vmul.f32 %v548_v0, %v221_v47  ;;  %v375_v61 = vmax.f32 %v326_v52, 0.0  ;;  %v376_v62 = vmax.f32 %v327_v53, 0.0 }
  0x34   : > { %v377_v63 = vmax.f32 %v328_v54, 0.0  ;;  %v332_v2 = vadd.f32 %v558_v1, %v276_v55  ;;  %v378_v3 = vmax.f32 %v329_v56, 0.0  ;;  %v379_v4 = vmax.f32 %v330_v57, 0.0 }
  0x35   : > { %v380_v5 = vmax.f32 %v331_v58, 0.0  ;;  %v333_v6 = vadd.f32 %v558_v1, %v277_v59  ;;  %425 = vst.msk [vmem:[%s581_s25 + $0x140] sm:$0xff] %vm384_vm0, %v375_v61  ;;  %426 = vst.msk [vmem:[%s581_s25 + $0x148] sm:$0xff] %vm384_vm0, %v376_v62  ;;  %v278_v8 = vmul.f32 %v548_v0, %v222_v60 }
  0x36   : > { %427 = vst.msk [vmem:[%s581_s25 + $0x150] sm:$0xff] %vm384_vm0, %v377_v63  ;;  %v381_v7 = vmax.f32 %v332_v2, 0.0  ;;  %428 = vst.msk [vmem:[%s581_s25 + $0x158] sm:$0xff] %vm384_vm0, %v378_v3 }
  0x37   : > { %429 = vst.msk [vmem:[%s581_s25 + $0x160] sm:$0xff] %vm384_vm0, %v379_v4  ;;  %430 = vst.msk [vmem:[%s581_s25 + $0x168] sm:$0xff] %vm384_vm0, %v380_v5  ;;  %v382_v9 = vmax.f32 %v333_v6, 0.0  ;;  %v334_v10 = vadd.f32 %v558_v1, %v278_v8 }
  0x38   : > { %431 = vst.msk [vmem:[%s581_s25 + $0x170] sm:$0xff] %vm384_vm0, %v381_v7 }
  0x39   : > { %432 = vst.msk [vmem:[%s581_s25 + $0x178] sm:$0xff] %vm384_vm0, %v382_v9  ;;  %v383_v11 = vmax.f32 %v334_v10, 0.0 }
  0x3b   : > { %433 = vst.msk [vmem:[%s581_s25 + $0x180] sm:$0xff] %vm384_vm0, %v383_v11 }
  0x3c PF: > { %s13_s12 = sadd.s32 1, %s515_s12  }
  0x3d   : > { %p10_p4 = scmp.ge.s32.totalorder %s13_s12, 6  }
  0x3f   :  { %12 = sbr.rel (!%p10_p4) target bundleno = 1 (0x1), region = 62 }

// kernel: sparsenet_forward.26
= control target key start
LH: loop header
LB: loop body
LE: loop exit
PB: predicated region body
PF: predicated region fallthrough
CT: control target
= control target key end

     0   :  { %vm224_vm0 = vcmask 130048   ;;  %s751_s0 = inlined_call_operand.vmem [shape: f32[392,16], index: 0, kind: input, shape index: {}]   ;;  %s752_s1 = inlined_call_operand.vmem [shape: f32[1,16], index: 1, kind: input, shape index: {}]   ;;  %s753_s2 = inlined_call_operand.vmem [shape: f32[1,16], index: 2, kind: input, shape index: {}]   ;;  %s754_s3 = inlined_call_operand.vmem [shape: f32[392,16], index: 3, kind: output, shape index: {}]  }
   0x1   :  { %v14_v0 = vld [vmem:[%s751_s0] sm:$0xff]  ;;  %v15_v4 = vld [vmem:[%s751_s0 + $0x8] sm:$0xff]  ;;  %v16_v5 = vld [vmem:[%s751_s0 + $0x10] sm:$0xff] }
   0x2   :  { %v306_v1 = vld [vmem:[%s752_s1] ss:$0 sm:$0xff]  ;;  %v17_v6 = vld [vmem:[%s751_s0 + $0x18] sm:$0xff]  ;;  %v19_v11 = vld [vmem:[%s751_s0 + $0x28] sm:$0xff] }
   0x3   :  { %v311_v2 = vld [vmem:[%s753_s2] ss:$0 sm:$0xff]  ;;  %v70_v3 = vmul.f32 %v306_v1, %v14_v0  ;;  %v71_v7 = vmul.f32 %v306_v1, %v15_v4  ;;  %v72_v8 = vmul.f32 %v306_v1, %v16_v5  ;;  %v73_v9 = vmul.f32 %v306_v1, %v17_v6  ;;  %v20_v12 = vld [vmem:[%s751_s0 + $0x30] sm:$0xff]  ;;  %v21_v17 = vld [vmem:[%s751_s0 + $0x38] sm:$0xff] }
   0x4   :  { %v18_v10 = vld [vmem:[%s751_s0 + $0x20] sm:$0xff]  ;;  %v75_v15 = vmul.f32 %v306_v1, %v19_v11  ;;  %v76_v16 = vmul.f32 %v306_v1, %v20_v12  ;;  %v77_v21 = vmul.f32 %v306_v1, %v21_v17  ;;  %v23_v27 = vld [vmem:[%s751_s0 + $0x48] sm:$0xff]  ;;  %v24_v28 = vld [vmem:[%s751_s0 + $0x50] sm:$0xff] }
   0x5   :  { %v126_v13 = vadd.f32 %v311_v2, %v70_v3  ;;  %v74_v14 = vmul.f32 %v306_v1, %v18_v10  ;;  %v127_v18 = vadd.f32 %v311_v2, %v71_v7  ;;  %v128_v19 = vadd.f32 %v311_v2, %v72_v8  ;;  %v22_v22 = vld [vmem:[%s751_s0 + $0x40] sm:$0xff]  ;;  %v25_v29 = vld [vmem:[%s751_s0 + $0x58] sm:$0xff]  ;;  %v27_v35 = vld [vmem:[%s751_s0 + $0x68] sm:$0xff] }
   0x6   :  { %v129_v20 = vadd.f32 %v311_v2, %v73_v9  ;;  %v131_v25 = vadd.f32 %v311_v2, %v75_v15  ;;  %v132_v26 = vadd.f32 %v311_v2, %v76_v16  ;;  %v133_v33 = vadd.f32 %v311_v2, %v77_v21  ;;  %v26_v34 = vld [vmem:[%s751_s0 + $0x60] sm:$0xff]  ;;  %v28_v36 = vld [vmem:[%s751_s0 + $0x70] sm:$0xff]  ;;  %v29_v41 = vld [vmem:[%s751_s0 + $0x78] sm:$0xff] }
   0x7   :  { %v175_v23 = vmax.f32 %v126_v13, 0.0  ;;  %v130_v24 = vadd.f32 %v311_v2, %v74_v14  ;;  %v176_v30 = vmax.f32 %v127_v18, 0.0  ;;  %v177_v31 = vmax.f32 %v128_v19, 0.0  ;;  %v30_v54 = vld [vmem:[%s751_s0 + $0x80] sm:$0xff]  ;;  %v31_v59 = vld [vmem:[%s751_s0 + $0x88] sm:$0xff]  ;;  %v32_v60 = vld [vmem:[%s751_s0 + $0x90] sm:$0xff] }
   0x8   :  { %v178_v32 = vmax.f32 %v129_v20, 0.0  ;;  %v180_v38 = vmax.f32 %v131_v25, 0.0  ;;  %v181_v39 = vmax.f32 %v132_v26, 0.0  ;;  %v78_v40 = vmul.f32 %v306_v1, %v22_v22  ;;  %v33_v61 = vld [vmem:[%s751_s0 + $0x98] sm:$0xff]  ;;  %v34_v4 = vld [vmem:[%s751_s0 + $0xa0] sm:$0xff]  ;;  %v35_v5 = vld [vmem:[%s751_s0 + $0xa8] sm:$0xff] }
   0x9   :  { %225 = vst.msk [vmem:[%s754_s3] sm:$0xff] %vm224_vm0, %v175_v23  ;;  %v179_v37 = vmax.f32 %v130_v24, 0.0  ;;  %226 = vst.msk [vmem:[%s754_s3 + $0x8] sm:$0xff] %vm224_vm0, %v176_v30  ;;  %v182_v42 = vmax.f32 %v133_v33, 0.0  ;;  %v79_v43 = vmul.f32 %v306_v1, %v23_v27  ;;  %v80_v44 = vmul.f32 %v306_v1, %v24_v28  ;;  %v36_v6 = vld [vmem:[%s751_s0 + $0xb0] sm:$0xff]  ;;  %v37_v11 = vld [vmem:[%s751_s0 + $0xb8] sm:$0xff] }
   0xa   :  { %227 = vst.msk [vmem:[%s754_s3 + $0x10] sm:$0xff] %vm224_vm0, %v177_v31  ;;  %228 = vst.msk [vmem:[%s754_s3 + $0x18] sm:$0xff] %vm224_vm0, %v178_v32  ;;  %v81_v45 = vmul.f32 %v306_v1, %v25_v29  ;;  %v134_v46 = vadd.f32 %v311_v2, %v78_v40  ;;  %v82_v47 = vmul.f32 %v306_v1, %v26_v34  ;;  %v38_v24 = vld [vmem:[%s751_s0 + $0xc0] sm:$0xff]  ;;  %v39_v29 = vld [vmem:[%s751_s0 + $0xc8] sm:$0xff] }
   0xb   :  { %229 = vst.msk [vmem:[%s754_s3 + $0x20] sm:$0xff] %vm224_vm0, %v179_v37  ;;  %230 = vst.msk [vmem:[%s754_s3 + $0x28] sm:$0xff] %vm224_vm0, %v180_v38  ;;  %v83_v48 = vmul.f32 %v306_v1, %v27_v35  ;;  %v84_v49 = vmul.f32 %v306_v1, %v28_v36  ;;  %v135_v50 = vadd.f32 %v311_v2, %v79_v43  ;;  %v40_v30 = vld [vmem:[%s751_s0 + $0xd0] sm:$0xff]  ;;  %v41_v31 = vld [vmem:[%s751_s0 + $0xd8] sm:$0xff] }
   0xc   :  { %231 = vst.msk [vmem:[%s754_s3 + $0x30] sm:$0xff] %vm224_vm0, %v181_v39  ;;  %232 = vst.msk [vmem:[%s754_s3 + $0x38] sm:$0xff] %vm224_vm0, %v182_v42  ;;  %v136_v51 = vadd.f32 %v311_v2, %v80_v44  ;;  %v137_v52 = vadd.f32 %v311_v2, %v81_v45  ;;  %v85_v53 = vmul.f32 %v306_v1, %v29_v41  ;;  %v183_v55 = vmax.f32 %v134_v46, 0.0  ;;  %v42_v36 = vld [vmem:[%s751_s0 + $0xe0] sm:$0xff]  ;;  %v43_v37 = vld [vmem:[%s751_s0 + $0xe8] sm:$0xff] }
   0xd   :  { %v138_v56 = vadd.f32 %v311_v2, %v82_v47  ;;  %v139_v57 = vadd.f32 %v311_v2, %v83_v48  ;;  %v140_v58 = vadd.f32 %v311_v2, %v84_v49  ;;  %v184_v62 = vmax.f32 %v135_v50, 0.0  ;;  %v44_v38 = vld [vmem:[%s751_s0 + $0xf0] sm:$0xff]  ;;  %v45_v43 = vld [vmem:[%s751_s0 + $0xf8] sm:$0xff] }
   0xe   :  { %v185_v63 = vmax.f32 %v136_v51, 0.0  ;;  %v186_v0 = vmax.f32 %v137_v52, 0.0  ;;  %v141_v3 = vadd.f32 %v311_v2, %v85_v53  ;;  %233 = vst.msk [vmem:[%s754_s3 + $0x40] sm:$0xff] %vm224_vm0, %v183_v55  ;;  %v86_v10 = vmul.f32 %v306_v1, %v30_v54 }
   0xf   :  { %v187_v7 = vmax.f32 %v138_v56, 0.0  ;;  %v188_v8 = vmax.f32 %v139_v57, 0.0  ;;  %v189_v9 = vmax.f32 %v140_v58, 0.0  ;;  %234 = vst.msk [vmem:[%s754_s3 + $0x48] sm:$0xff] %vm224_vm0, %v184_v62  ;;  %v87_v13 = vmul.f32 %v306_v1, %v31_v59  ;;  %v46_v56 = vld [vmem:[%s751_s0 + $0x100] sm:$0xff]  ;;  %v48_v62 = vld [vmem:[%s751_s0 + $0x110] sm:$0xff] }
  0x10   :  { %235 = vst.msk [vmem:[%s754_s3 + $0x50] sm:$0xff] %vm224_vm0, %v185_v63  ;;  %236 = vst.msk [vmem:[%s754_s3 + $0x58] sm:$0xff] %vm224_vm0, %v186_v0  ;;  %v190_v12 = vmax.f32 %v141_v3, 0.0  ;;  %v88_v14 = vmul.f32 %v306_v1, %v32_v60  ;;  %v89_v15 = vmul.f32 %v306_v1, %v33_v61  ;;  %v142_v16 = vadd.f32 %v311_v2, %v86_v10  ;;  %v47_v61 = vld [vmem:[%s751_s0 + $0x108] sm:$0xff]  ;;  %v49_v63 = vld [vmem:[%s751_s0 + $0x118] sm:$0xff] }
  0x11   :  { %237 = vst.msk [vmem:[%s754_s3 + $0x60] sm:$0xff] %vm224_vm0, %v187_v7  ;;  %238 = vst.msk [vmem:[%s754_s3 + $0x68] sm:$0xff] %vm224_vm0, %v188_v8  ;;  %v90_v17 = vmul.f32 %v306_v1, %v34_v4  ;;  %v91_v18 = vmul.f32 %v306_v1, %v35_v5  ;;  %v92_v19 = vmul.f32 %v306_v1, %v36_v6  ;;  %v50_v6 = vld [vmem:[%s751_s0 + $0x120] sm:$0xff]  ;;  %v51_v7 = vld [vmem:[%s751_s0 + $0x128] sm:$0xff] }
  0x12   :  { %239 = vst.msk [vmem:[%s754_s3 + $0x70] sm:$0xff] %vm224_vm0, %v189_v9  ;;  %240 = vst.msk [vmem:[%s754_s3 + $0x78] sm:$0xff] %vm224_vm0, %v190_v12  ;;  %v143_v20 = vadd.f32 %v311_v2, %v87_v13  ;;  %v144_v21 = vadd.f32 %v311_v2, %v88_v14  ;;  %v145_v22 = vadd.f32 %v311_v2, %v89_v15  ;;  %v191_v25 = vmax.f32 %v142_v16, 0.0  ;;  %v52_v8 = vld [vmem:[%s751_s0 + $0x130] sm:$0xff]  ;;  %v53_v13 = vld [vmem:[%s751_s0 + $0x138] sm:$0xff] }
  0x13   :  { %v93_v23 = vmul.f32 %v306_v1, %v37_v11  ;;  %v146_v26 = vadd.f32 %v311_v2, %v90_v17  ;;  %v147_v27 = vadd.f32 %v311_v2, %v91_v18  ;;  %v148_v28 = vadd.f32 %v311_v2, %v92_v19 }
  0x14   :  { %v192_v32 = vmax.f32 %v143_v20, 0.0  ;;  %v193_v33 = vmax.f32 %v144_v21, 0.0  ;;  %v194_v34 = vmax.f32 %v145_v22, 0.0  ;;  %241 = vst.msk [vmem:[%s754_s3 + $0x80] sm:$0xff] %vm224_vm0, %v191_v25  ;;  %v94_v42 = vmul.f32 %v306_v1, %v38_v24 }
  0x15   :  { %v149_v35 = vadd.f32 %v311_v2, %v93_v23  ;;  %v195_v39 = vmax.f32 %v146_v26, 0.0  ;;  %v196_v40 = vmax.f32 %v147_v27, 0.0  ;;  %v197_v41 = vmax.f32 %v148_v28, 0.0  ;;  %v54_v26 = vld [vmem:[%s751_s0 + $0x140] sm:$0xff] }
  0x16   :  { %242 = vst.msk [vmem:[%s754_s3 + $0x88] sm:$0xff] %vm224_vm0, %v192_v32  ;;  %243 = vst.msk [vmem:[%s754_s3 + $0x90] sm:$0xff] %vm224_vm0, %v193_v33  ;;  %v95_v45 = vmul.f32 %v306_v1, %v39_v29  ;;  %v96_v46 = vmul.f32 %v306_v1, %v40_v30  ;;  %v97_v47 = vmul.f32 %v306_v1, %v41_v31  ;;  %v55_v31 = vld [vmem:[%s751_s0 + $0x148] sm:$0xff]  ;;  %v56_v32 = vld [vmem:[%s751_s0 + $0x150] sm:$0xff] }
  0x17   :  { %244 = vst.msk [vmem:[%s754_s3 + $0x98] sm:$0xff] %vm224_vm0, %v194_v34  ;;  %v198_v44 = vmax.f32 %v149_v35, 0.0  ;;  %245 = vst.msk [vmem:[%s754_s3 + $0xa0] sm:$0xff] %vm224_vm0, %v195_v39  ;;  %v150_v48 = vadd.f32 %v311_v2, %v94_v42  ;;  %v98_v49 = vmul.f32 %v306_v1, %v42_v36  ;;  %v99_v50 = vmul.f32 %v306_v1, %v43_v37  ;;  %v57_v33 = vld [vmem:[%s751_s0 + $0x158] sm:$0xff]  ;;  %v59_v39 = vld [vmem:[%s751_s0 + $0x168] sm:$0xff] }
  0x18   :  { %246 = vst.msk [vmem:[%s754_s3 + $0xa8] sm:$0xff] %vm224_vm0, %v196_v40  ;;  %247 = vst.msk [vmem:[%s754_s3 + $0xb0] sm:$0xff] %vm224_vm0, %v197_v41  ;;  %v100_v51 = vmul.f32 %v306_v1, %v44_v38  ;;  %v151_v52 = vadd.f32 %v311_v2, %v95_v45  ;;  %v152_v53 = vadd.f32 %v311_v2, %v96_v46  ;;  %v58_v38 = vld [vmem:[%s751_s0 + $0x160] sm:$0xff]  ;;  %v60_v40 = vld [vmem:[%s751_s0 + $0x170] sm:$0xff] }
  0x19   :  { %248 = vst.msk [vmem:[%s754_s3 + $0xb8] sm:$0xff] %vm224_vm0, %v198_v44  ;;  %v153_v54 = vadd.f32 %v311_v2, %v97_v47  ;;  %v101_v55 = vmul.f32 %v306_v1, %v45_v43  ;;  %v199_v57 = vmax.f32 %v150_v48, 0.0  ;;  %v154_v58 = vadd.f32 %v311_v2, %v98_v49  ;;  %v61_v45 = vld [vmem:[%s751_s0 + $0x178] sm:$0xff] }
  0x1a   :  { %v155_v59 = vadd.f32 %v311_v2, %v99_v50  ;;  %v156_v60 = vadd.f32 %v311_v2, %v100_v51  ;;  %v200_v0 = vmax.f32 %v151_v52, 0.0  ;;  %v201_v3 = vmax.f32 %v152_v53, 0.0 }
  0x1b   :  { %v202_v4 = vmax.f32 %v153_v54, 0.0  ;;  %v157_v5 = vadd.f32 %v311_v2, %v101_v55  ;;  %249 = vst.msk [vmem:[%s754_s3 + $0xc0] sm:$0xff] %vm224_vm0, %v199_v57  ;;  %v203_v9 = vmax.f32 %v154_v58, 0.0  ;;  %v102_v12 = vmul.f32 %v306_v1, %v46_v56  ;;  %v62_v58 = vld [vmem:[%s751_s0 + $0x180] sm:$0xff] }
  0x1c   :  { %v204_v10 = vmax.f32 %v155_v59, 0.0  ;;  %v205_v11 = vmax.f32 %v156_v60, 0.0  ;;  %250 = vst.msk [vmem:[%s754_s3 + $0xc8] sm:$0xff] %vm224_vm0, %v200_v0  ;;  %251 = vst.msk [vmem:[%s754_s3 + $0xd0] sm:$0xff] %vm224_vm0, %v201_v3  ;;  %v103_v15 = vmul.f32 %v306_v1, %v47_v61  ;;  %v104_v16 = vmul.f32 %v306_v1, %v48_v62 }
  0x1d   :  { %252 = vst.msk [vmem:[%s754_s3 + $0xd8] sm:$0xff] %vm224_vm0, %v202_v4  ;;  %v206_v14 = vmax.f32 %v157_v5, 0.0  ;;  %v105_v17 = vmul.f32 %v306_v1, %v49_v63  ;;  %253 = vst.msk [vmem:[%s754_s3 + $0xe0] sm:$0xff] %vm224_vm0, %v203_v9  ;;  %v158_v18 = vadd.f32 %v311_v2, %v102_v12  ;;  %v106_v19 = vmul.f32 %v306_v1, %v50_v6 }
  0x1e   :  { %254 = vst.msk [vmem:[%s754_s3 + $0xe8] sm:$0xff] %vm224_vm0, %v204_v10  ;;  %255 = vst.msk [vmem:[%s754_s3 + $0xf0] sm:$0xff] %vm224_vm0, %v205_v11  ;;  %v107_v20 = vmul.f32 %v306_v1, %v51_v7  ;;  %v108_v21 = vmul.f32 %v306_v1, %v52_v8  ;;  %v159_v22 = vadd.f32 %v311_v2, %v103_v15 }
  0x1f   :  { %256 = vst.msk [vmem:[%s754_s3 + $0xf8] sm:$0xff] %vm224_vm0, %v206_v14  ;;  %v160_v23 = vadd.f32 %v311_v2, %v104_v16  ;;  %v161_v24 = vadd.f32 %v311_v2, %v105_v17  ;;  %v109_v25 = vmul.f32 %v306_v1, %v53_v13  ;;  %v207_v27 = vmax.f32 %v158_v18, 0.0 }
  0x20   :  { %v162_v28 = vadd.f32 %v311_v2, %v106_v19  ;;  %v163_v29 = vadd.f32 %v311_v2, %v107_v20  ;;  %v164_v30 = vadd.f32 %v311_v2, %v108_v21  ;;  %v208_v34 = vmax.f32 %v159_v22, 0.0 }
  0x21   :  { %v209_v35 = vmax.f32 %v160_v23, 0.0  ;;  %v210_v36 = vmax.f32 %v161_v24, 0.0  ;;  %v165_v37 = vadd.f32 %v311_v2, %v109_v25  ;;  %257 = vst.msk [vmem:[%s754_s3 + $0x100] sm:$0xff] %vm224_vm0, %v207_v27  ;;  %v110_v44 = vmul.f32 %v306_v1, %v54_v26 }
  0x22   :  { %v211_v41 = vmax.f32 %v162_v28, 0.0  ;;  %v212_v42 = vmax.f32 %v163_v29, 0.0  ;;  %v213_v43 = vmax.f32 %v164_v30, 0.0  ;;  %258 = vst.msk [vmem:[%s754_s3 + $0x108] sm:$0xff] %vm224_vm0, %v208_v34  ;;  %v111_v47 = vmul.f32 %v306_v1, %v55_v31 }
  0x23   :  { %259 = vst.msk [vmem:[%s754_s3 + $0x110] sm:$0xff] %vm224_vm0, %v209_v35  ;;  %260 = vst.msk [vmem:[%s754_s3 + $0x118] sm:$0xff] %vm224_vm0, %v210_v36  ;;  %v214_v46 = vmax.f32 %v165_v37, 0.0  ;;  %v112_v48 = vmul.f32 %v306_v1, %v56_v32  ;;  %v113_v49 = vmul.f32 %v306_v1, %v57_v33  ;;  %v166_v50 = vadd.f32 %v311_v2, %v110_v44 }
  0x24   :  { %261 = vst.msk [vmem:[%s754_s3 + $0x120] sm:$0xff] %vm224_vm0, %v211_v41  ;;  %262 = vst.msk [vmem:[%s754_s3 + $0x128] sm:$0xff] %vm224_vm0, %v212_v42  ;;  %v114_v51 = vmul.f32 %v306_v1, %v58_v38  ;;  %v115_v52 = vmul.f32 %v306_v1, %v59_v39  ;;  %v116_v53 = vmul.f32 %v306_v1, %v60_v40 }
  0x25   :  { %263 = vst.msk [vmem:[%s754_s3 + $0x130] sm:$0xff] %vm224_vm0, %v213_v43  ;;  %264 = vst.msk [vmem:[%s754_s3 + $0x138] sm:$0xff] %vm224_vm0, %v214_v46  ;;  %v167_v54 = vadd.f32 %v311_v2, %v111_v47  ;;  %v168_v55 = vadd.f32 %v311_v2, %v112_v48  ;;  %v169_v56 = vadd.f32 %v311_v2, %v113_v49  ;;  %v215_v59 = vmax.f32 %v166_v50, 0.0 }
  0x26   :  { %v117_v57 = vmul.f32 %v306_v1, %v61_v45  ;;  %v170_v60 = vadd.f32 %v311_v2, %v114_v51  ;;  %v171_v61 = vadd.f32 %v311_v2, %v115_v52  ;;  %v172_v62 = vadd.f32 %v311_v2, %v116_v53 }
  0x27   :  { %v216_v63 = vmax.f32 %v167_v54, 0.0  ;;  %v217_v0 = vmax.f32 %v168_v55, 0.0  ;;  %v218_v3 = vmax.f32 %v169_v56, 0.0  ;;  %265 = vst.msk [vmem:[%s754_s3 + $0x140] sm:$0xff] %vm224_vm0, %v215_v59  ;;  %v118_v8 = vmul.f32 %v306_v1, %v62_v58 }
  0x28   :  { %v173_v4 = vadd.f32 %v311_v2, %v117_v57  ;;  %v219_v5 = vmax.f32 %v170_v60, 0.0  ;;  %v220_v6 = vmax.f32 %v171_v61, 0.0  ;;  %v221_v7 = vmax.f32 %v172_v62, 0.0 }
  0x29   :  { %266 = vst.msk [vmem:[%s754_s3 + $0x148] sm:$0xff] %vm224_vm0, %v216_v63  ;;  %267 = vst.msk [vmem:[%s754_s3 + $0x150] sm:$0xff] %vm224_vm0, %v217_v0  ;;  %v174_v1 = vadd.f32 %v311_v2, %v118_v8 }
  0x2a   :  { %268 = vst.msk [vmem:[%s754_s3 + $0x158] sm:$0xff] %vm224_vm0, %v218_v3  ;;  %v222_v9 = vmax.f32 %v173_v4, 0.0  ;;  %269 = vst.msk [vmem:[%s754_s3 + $0x160] sm:$0xff] %vm224_vm0, %v219_v5 }
  0x2b   :  { %270 = vst.msk [vmem:[%s754_s3 + $0x168] sm:$0xff] %vm224_vm0, %v220_v6  ;;  %271 = vst.msk [vmem:[%s754_s3 + $0x170] sm:$0xff] %vm224_vm0, %v221_v7  ;;  %v223_v10 = vmax.f32 %v174_v1, 0.0 }
  0x2c   :  { %272 = vst.msk [vmem:[%s754_s3 + $0x178] sm:$0xff] %vm224_vm0, %v222_v9 }
  0x2d   :  { %273 = vst.msk [vmem:[%s754_s3 + $0x180] sm:$0xff] %vm224_vm0, %v223_v10 }

// kernel: sparsenet_forward.25
= control target key start
LH: loop header
LB: loop body
LE: loop exit
PB: predicated region body
PF: predicated region fallthrough
CT: control target
= control target key end

     0   :  { %vm330_vm0 = vcmask 1043456   ;;  %v779_v0 = vmov 0.0   ;;  %vm780_vm1 = vmmov 0   ;;  %vm254_vm2 = vcmask 64512   ;;  %s1385_s3 = inlined_call_operand.vmem [shape: bf16[8,16], index: 3, kind: input, shape index: {}]   ;;  %s1386_s0 = inlined_call_operand.vmem [shape: f32[392,8], index: 0, kind: input, shape index: {}]   ;;  %s1387_s1 = inlined_call_operand.vmem [shape: f32[1,8], index: 1, kind: input, shape index: {}]   ;;  %s1388_s2 = inlined_call_operand.vmem [shape: f32[1,8], index: 2, kind: input, shape index: {}]   ;;  %s1389_s4 = inlined_call_operand.vmem [shape: f32[392,16], index: 4, kind: output, shape index: {}]  }
   0x1   :  { %673 = vmatprep.subr.bf16.mxu0 %v779_v0  ;;  %v253_v1 = vld [vmem:[%s1385_s3] sm:$0xf]  ;;  %675 = vmatprep.mubr.msk.bf16.mxu0 %vm780_vm1, %v779_v0  ;;  %v19_v3 = vld [vmem:[%s1386_s0 + $0x8] sm:$0xff]  ;;  %v44_v7 = vld [vmem:[%s1386_s0 + $0xd0] sm:$0xff]  ;;  %vm566_vm3 = vcmask 130048  }
   0x2   :  { %v18_v2 = vld [vmem:[%s1386_s0] sm:$0xff]  ;;  %v332_v4 = vsel %vm330_vm0, %v253_v1, 0  ;;  %775 = vmatprep.subr.bf16.mxu1 %v779_v0  ;;  %727 = vmatprep.mubr.msk.bf16.mxu1 %vm780_vm1, %v779_v0  ;;  %v45_v10 = vld [vmem:[%s1386_s0 + $0xd8] sm:$0xff]  ;;  %v20_v12 = vld [vmem:[%s1386_s0 + $0x10] sm:$0xff] }
   0x3   :  { %v821_v5 = vld [vmem:[%s1387_s1] ss:$0 sm:$0xff]  ;;  %674 = vmatpush3.bf16.msra.mxu0 %v332_v4  ;;  %776 = vmatpush3.bf16.msra.mxu1 %v332_v4  ;;  %v21_v13 = vld [vmem:[%s1386_s0 + $0x18] sm:$0xff]  ;;  %v47_v18 = vld [vmem:[%s1386_s0 + $0xe8] sm:$0xff] }
   0x4   :  { %v826_v6 = vld [vmem:[%s1388_s2] ss:$0 sm:$0xff]  ;;  %v74_v8 = vmul.f32 %v821_v5, %v18_v2  ;;  %v75_v9 = vmul.f32 %v821_v5, %v19_v3  ;;  %v100_v11 = vmul.f32 %v821_v5, %v44_v7  ;;  %v101_v14 = vmul.f32 %v821_v5, %v45_v10  ;;  %v23_v34 = vld [vmem:[%s1386_s0 + $0x28] sm:$0xff]  ;;  %v48_v36 = vld [vmem:[%s1386_s0 + $0xf0] sm:$0xff] }
   0x5   :  { %v76_v15 = vmul.f32 %v821_v5, %v20_v12  ;;  %v77_v16 = vmul.f32 %v821_v5, %v21_v13  ;;  %v46_v17 = vld [vmem:[%s1386_s0 + $0xe0] sm:$0xff]  ;;  %v103_v25 = vmul.f32 %v821_v5, %v47_v18  ;;  %v49_v37 = vld [vmem:[%s1386_s0 + $0xf8] sm:$0xff]  ;;  %v79_v42 = vmul.f32 %v821_v5, %v23_v34  ;;  %v24_v47 = vld [vmem:[%s1386_s0 + $0x30] sm:$0xff] }
   0x6   :  { %v130_v19 = vadd.f32 %v826_v6, %v74_v8  ;;  %v131_v20 = vadd.f32 %v826_v6, %v75_v9  ;;  %v156_v21 = vadd.f32 %v826_v6, %v100_v11  ;;  %v102_v22 = vmul.f32 %v821_v5, %v46_v17  ;;  %v22_v33 = vld [vmem:[%s1386_s0 + $0x20] sm:$0xff]  ;;  %v25_v48 = vld [vmem:[%s1386_s0 + $0x38] sm:$0xff]  ;;  %v51_v50 = vld [vmem:[%s1386_s0 + $0x108] sm:$0xff] }
   0x7   :  { %v157_v23 = vadd.f32 %v826_v6, %v101_v14  ;;  %v132_v24 = vadd.f32 %v826_v6, %v76_v15  ;;  %v133_v29 = vadd.f32 %v826_v6, %v77_v16  ;;  %v159_v32 = vadd.f32 %v826_v6, %v103_v25  ;;  %v50_v49 = vld [vmem:[%s1386_s0 + $0x100] sm:$0xff]  ;;  %v27_v52 = vld [vmem:[%s1386_s0 + $0x48] sm:$0xff]  ;;  %v52_v57 = vld [vmem:[%s1386_s0 + $0x110] sm:$0xff] }
   0x8   :  { %v179_v26 = vmax.f32 %v130_v19, 0.0  ;;  %v180_v27 = vmax.f32 %v131_v20, 0.0  ;;  %v205_v28 = vmax.f32 %v156_v21, 0.0  ;;  %v158_v31 = vadd.f32 %v826_v6, %v102_v22  ;;  %v26_v51 = vld [vmem:[%s1386_s0 + $0x40] sm:$0xff]  ;;  %v53_v58 = vld [vmem:[%s1386_s0 + $0x118] sm:$0xff]  ;;  %v28_v11 = vld [vmem:[%s1386_s0 + $0x50] sm:$0xff] }
   0x9   :  { %v206_v30 = vmax.f32 %v157_v23, 0.0  ;;  %v181_v39 = vmax.f32 %v132_v24, 0.0  ;;  %v182_v40 = vmax.f32 %v133_v29, 0.0  ;;  %v78_v41 = vmul.f32 %v821_v5, %v22_v33  ;;  %v29_v19 = vld [vmem:[%s1386_s0 + $0x58] sm:$0xff]  ;;  %v54_v20 = vld [vmem:[%s1386_s0 + $0x120] sm:$0xff]  ;;  %v55_v29 = vld [vmem:[%s1386_s0 + $0x128] sm:$0xff] }
   0xa   :  { %v228_v35 = vpack.c.bf16 %v180_v27, %v179_v26  ;;  %v207_v43 = vmax.f32 %v158_v31, 0.0  ;;  %v208_v44 = vmax.f32 %v159_v32, 0.0  ;;  %v104_v45 = vmul.f32 %v821_v5, %v48_v36 }
   0xb   :  { %v241_v38 = vpack.c.bf16 %v206_v30, %v205_v28  ;;  %v105_v46 = vmul.f32 %v821_v5, %v49_v37  ;;  %v229_v53 = vpack.c.bf16 %v182_v40, %v181_v39  ;;  %v134_v54 = vadd.f32 %v826_v6, %v78_v41  ;;  %v30_v40 = vld [vmem:[%s1386_s0 + $0x60] sm:$0xff]  ;;  %v35_v41 = vld [vmem:[%s1386_s0 + $0x88] sm:$0xff] }
   0xc   :  { %676 = vmatmul.mubr.msk.bf16.vlgmr.msra.gmra.mrb[0].mxu0 %vm254_vm2, %v228_v35  ;;  %v135_v55 = vadd.f32 %v826_v6, %v79_v42  ;;  %v80_v56 = vmul.f32 %v821_v5, %v24_v47  ;;  %v242_v59 = vpack.c.bf16 %v208_v44, %v207_v43  ;;  %v160_v60 = vadd.f32 %v826_v6, %v104_v45  ;;  %v60_v44 = vld [vmem:[%s1386_s0 + $0x150] sm:$0xff]  ;;  %v61_v45 = vld [vmem:[%s1386_s0 + $0x158] sm:$0xff] }
   0xd   :  { %728 = vmatmul.mubr.msk.bf16.vlgmr.msra.gmra.mrb[0].mxu1 %vm254_vm2, %v241_v38  ;;  %679 = vmatprep.mubr.msk.bf16.mxu0 %vm780_vm1, %v779_v0  ;;  %v161_v61 = vadd.f32 %v826_v6, %v105_v46  ;;  %v81_v62 = vmul.f32 %v821_v5, %v25_v48  ;;  %v106_v63 = vmul.f32 %v821_v5, %v50_v49  ;;  %v183_v8 = vmax.f32 %v134_v54, 0.0  ;;  %v34_v38 = vld [vmem:[%s1386_s0 + $0x80] sm:$0xff]  ;;  %v31_v49 = vld [vmem:[%s1386_s0 + $0x68] sm:$0xff] }
   0xe   :  { %731 = vmatprep.mubr.msk.bf16.mxu1 %vm780_vm1, %v779_v0  ;;  %v107_v1 = vmul.f32 %v821_v5, %v51_v50  ;;  %v82_v2 = vmul.f32 %v821_v5, %v26_v51  ;;  %v83_v3 = vmul.f32 %v821_v5, %v27_v52  ;;  %v108_v4 = vmul.f32 %v821_v5, %v52_v57  ;;  %v56_v57 = vld [vmem:[%s1386_s0 + $0x130] sm:$0xff] }
   0xf   :  { %v109_v7 = vmul.f32 %v821_v5, %v53_v58  ;;  %v184_v9 = vmax.f32 %v135_v55, 0.0  ;;  %v136_v10 = vadd.f32 %v826_v6, %v80_v56  ;;  %v209_v12 = vmax.f32 %v160_v60, 0.0  ;;  %v36_v55 = vld [vmem:[%s1386_s0 + $0x90] sm:$0xff] }
  0x10   :  { %v210_v13 = vmax.f32 %v161_v61, 0.0  ;;  %v137_v14 = vadd.f32 %v826_v6, %v81_v62  ;;  %v162_v15 = vadd.f32 %v826_v6, %v106_v63  ;;  %v163_v16 = vadd.f32 %v826_v6, %v107_v1  ;;  %v37_v61 = vld [vmem:[%s1386_s0 + $0x98] sm:$0xff]  ;;  %v62_v62 = vld [vmem:[%s1386_s0 + $0x160] sm:$0xff] }
  0x11   :  { %v138_v17 = vadd.f32 %v826_v6, %v82_v2  ;;  %v139_v18 = vadd.f32 %v826_v6, %v83_v3  ;;  %v164_v21 = vadd.f32 %v826_v6, %v108_v4  ;;  %v165_v22 = vadd.f32 %v826_v6, %v109_v7  ;;  %v63_v4 = vld [vmem:[%s1386_s0 + $0x168] sm:$0xff] }
  0x12   :  { %v84_v23 = vmul.f32 %v821_v5, %v28_v11  ;;  %v230_v24 = vpack.c.bf16 %v184_v9, %v183_v8  ;;  %v185_v25 = vmax.f32 %v136_v10, 0.0  ;;  %v243_v26 = vpack.c.bf16 %v210_v13, %v209_v12 }
  0x13   :  { %v186_v27 = vmax.f32 %v137_v14, 0.0  ;;  %v85_v28 = vmul.f32 %v821_v5, %v29_v19  ;;  %v110_v30 = vmul.f32 %v821_v5, %v54_v20  ;;  %v211_v31 = vmax.f32 %v162_v15, 0.0  ;;  %v38_v15 = vld [vmem:[%s1386_s0 + $0xa0] sm:$0xff]  ;;  %v39_v20 = vld [vmem:[%s1386_s0 + $0xa8] sm:$0xff] }
  0x14   :  { %680 = vmatmul.mubr.msk.bf16.gmra.mrb[4].mxu0 %vm254_vm2, %v229_v53  ;;  %v212_v32 = vmax.f32 %v163_v16, 0.0  ;;  %v187_v33 = vmax.f32 %v138_v17, 0.0  ;;  %v188_v34 = vmax.f32 %v139_v18, 0.0  ;;  %v213_v35 = vmax.f32 %v164_v21, 0.0  ;;  %v64_v21 = vld [vmem:[%s1386_s0 + $0x170] sm:$0xff] }
  0x15   :  { %732 = vmatmul.mubr.msk.bf16.gmra.mrb[4].mxu1 %vm254_vm2, %v242_v59  ;;  %683 = vmatprep.mubr.msk.bf16.mxu0 %vm780_vm1, %v779_v0  ;;  %v214_v36 = vmax.f32 %v165_v22, 0.0  ;;  %v953_v37 = vadd.f32 %v826_v6, %v84_v23  ;;  %v111_v39 = vmul.f32 %v821_v5, %v55_v29  ;;  %v970_v42 = vadd.f32 %v826_v6, %v85_v28 }
  0x16   :  { %735 = vmatprep.mubr.msk.bf16.mxu1 %vm780_vm1, %v779_v0  ;;  %v973_v43 = vadd.f32 %v826_v6, %v110_v30  ;;  %v231_v46 = vpack.c.bf16 %v186_v27, %v185_v25  ;;  %v244_v47 = vpack.c.bf16 %v212_v32, %v211_v31  ;;  %v983_v48 = vpack.c.bf16 %v188_v34, %v187_v33  ;;  %v40_v27 = vld [vmem:[%s1386_s0 + $0xb0] sm:$0xff]  ;;  %v41_v32 = vld [vmem:[%s1386_s0 + $0xb8] sm:$0xff] }
  0x17   :  { %v90_v50 = vmul.f32 %v821_v5, %v34_v38  ;;  %v989_v51 = vpack.c.bf16 %v214_v36, %v213_v35  ;;  %v189_v52 = vmax.f32 %v953_v37, 0.0  ;;  %v993_v53 = vmul.f32 %v821_v5, %v30_v40  ;;  %v32_v37 = vld [vmem:[%s1386_s0 + $0x70] sm:$0xff] }
  0x18   :  { %v91_v54 = vmul.f32 %v821_v5, %v35_v41  ;;  %v1000_v56 = vadd.f32 %v826_v6, %v111_v39  ;;  %v116_v59 = vmul.f32 %v821_v5, %v60_v44  ;;  %v117_v60 = vmul.f32 %v821_v5, %v61_v45  ;;  %v66_v44 = vld [vmem:[%s1386_s0 + $0x180] sm:$0xff] }
  0x19   :  { %v146_v58 = vadd.f32 %v826_v6, %v90_v50  ;;  %v190_v63 = vmax.f32 %v970_v42, 0.0  ;;  %v215_v1 = vmax.f32 %v973_v43, 0.0  ;;  %v1017_v2 = vmul.f32 %v821_v5, %v31_v49  ;;  %v42_v50 = vld [vmem:[%s1386_s0 + $0xc0] sm:$0xff]  ;;  %v33_v42 = vld [vmem:[%s1386_s0 + $0x78] sm:$0xff]  ;;  %v59_v43 = vld [vmem:[%s1386_s0 + $0x148] sm:$0xff] }
  0x1a   :  { %v147_v3 = vadd.f32 %v826_v6, %v91_v54  ;;  %v172_v8 = vadd.f32 %v826_v6, %v116_v59  ;;  %v173_v9 = vadd.f32 %v826_v6, %v117_v60  ;;  %v92_v10 = vmul.f32 %v821_v5, %v36_v55  ;;  %v43_v54 = vld [vmem:[%s1386_s0 + $0xc8] sm:$0xff]  ;;  %v57_v55 = vld [vmem:[%s1386_s0 + $0x138] sm:$0xff] }
  0x1b   :  { %v195_v7 = vmax.f32 %v146_v58, 0.0  ;;  %v1027_v11 = vmul.f32 %v821_v5, %v56_v57  ;;  %v93_v13 = vmul.f32 %v821_v5, %v37_v61  ;;  %v118_v14 = vmul.f32 %v821_v5, %v62_v62 }
  0x1c   :  { %684 = vmatmul.mubr.msk.bf16.gmra.mrb[8].mxu0 %vm254_vm2, %v230_v24  ;;  %v196_v12 = vmax.f32 %v147_v3, 0.0  ;;  %v221_v16 = vmax.f32 %v172_v8, 0.0  ;;  %v222_v17 = vmax.f32 %v173_v9, 0.0  ;;  %v148_v18 = vadd.f32 %v826_v6, %v92_v10 }
  0x1d   :  { %736 = vmatmul.mubr.msk.bf16.gmra.mrb[8].mxu1 %vm254_vm2, %v243_v26  ;;  %687 = vmatprep.mubr.msk.bf16.mxu0 %vm780_vm1, %v779_v0  ;;  %v119_v19 = vmul.f32 %v821_v5, %v63_v4  ;;  %v216_v22 = vmax.f32 %v1000_v56, 0.0  ;;  %v149_v24 = vadd.f32 %v826_v6, %v93_v13  ;;  %v174_v25 = vadd.f32 %v826_v6, %v118_v14  ;;  %v65_v26 = vld [vmem:[%s1386_s0 + $0x178] sm:$0xff] }
  0x1e   :  { %739 = vmatprep.mubr.msk.bf16.mxu1 %vm780_vm1, %v779_v0  ;;  %v1047_v23 = vpack.c.bf16 %v196_v12, %v195_v7  ;;  %v1059_v28 = vpack.c.bf16 %v222_v17, %v221_v16  ;;  %v197_v29 = vmax.f32 %v148_v18, 0.0  ;;  %v94_v31 = vmul.f32 %v821_v5, %v38_v15 }
  0x1f   :  { %v175_v30 = vadd.f32 %v826_v6, %v119_v19  ;;  %v198_v33 = vmax.f32 %v149_v24, 0.0  ;;  %v223_v34 = vmax.f32 %v174_v25, 0.0  ;;  %v95_v35 = vmul.f32 %v821_v5, %v39_v20 }
  0x20   :  { %v120_v36 = vmul.f32 %v821_v5, %v64_v21  ;;  %v150_v39 = vadd.f32 %v826_v6, %v94_v31  ;;  %v121_v40 = vmul.f32 %v821_v5, %v65_v26  ;;  %v96_v41 = vmul.f32 %v821_v5, %v40_v27 }
  0x21   :  { %v224_v38 = vmax.f32 %v175_v30, 0.0  ;;  %v1074_v45 = vpack.c.bf16 %v198_v33, %v197_v29  ;;  %v97_v49 = vmul.f32 %v821_v5, %v41_v32  ;;  %v122_v3 = vmul.f32 %v821_v5, %v66_v44 }
  0x22   :  { %v199_v57 = vmax.f32 %v150_v39, 0.0  ;;  %v177_v58 = vadd.f32 %v826_v6, %v121_v40  ;;  %v152_v59 = vadd.f32 %v826_v6, %v96_v41  ;;  %v98_v8 = vmul.f32 %v821_v5, %v42_v50 }
  0x23   :  { %v1088_v56 = vpack.c.bf16 %v224_v38, %v223_v34  ;;  %v153_v62 = vadd.f32 %v826_v6, %v97_v49  ;;  %v99_v9 = vmul.f32 %v821_v5, %v43_v54  ;;  %v113_v10 = vmul.f32 %v821_v5, %v57_v55 }
  0x24   :  { %688 = vmatmul.mubr.msk.bf16.gmra.mrb[12].mxu0 %vm254_vm2, %v231_v46  ;;  %v151_v46 = vadd.f32 %v826_v6, %v95_v35  ;;  %v226_v4 = vmax.f32 %v177_v58, 0.0  ;;  %v201_v7 = vmax.f32 %v152_v59, 0.0  ;;  %v1104_v14 = vadd.f32 %v826_v6, %v122_v3 }
  0x25   :  { %740 = vmatmul.mubr.msk.bf16.gmra.mrb[12].mxu1 %vm254_vm2, %v244_v47  ;;  %691 = vmatprep.mubr.msk.bf16.mxu0 %vm780_vm1, %v779_v0  ;;  %v176_v47 = vadd.f32 %v826_v6, %v120_v36  ;;  %v202_v13 = vmax.f32 %v153_v62, 0.0  ;;  %v154_v15 = vadd.f32 %v826_v6, %v98_v8  ;;  %v155_v16 = vadd.f32 %v826_v6, %v99_v9 }
  0x26   :  { %743 = vmatprep.mubr.msk.bf16.mxu1 %vm780_vm1, %v779_v0  ;;  %v200_v60 = vmax.f32 %v151_v46, 0.0  ;;  %v233_v18 = vpack.c.bf16 %v190_v63, %v189_v52  ;;  %v143_v19 = vadd.f32 %v826_v6, %v1017_v2  ;;  %v246_v24 = vpack.c.bf16 %v216_v22, %v215_v1  ;;  %v58_v52 = vld [vmem:[%s1386_s0 + $0x140] sm:$0xff] }
  0x27   :  { %v225_v61 = vmax.f32 %v176_v47, 0.0  ;;  %v239_v17 = vpack.c.bf16 %v202_v13, %v201_v7  ;;  %v203_v20 = vmax.f32 %v154_v15, 0.0  ;;  %v204_v21 = vmax.f32 %v155_v16, 0.0 }
  0x28   :  { %v238_v12 = vpack.c.bf16 %v200_v60, %v199_v57  ;;  %v168_v25 = vadd.f32 %v826_v6, %v1027_v11  ;;  %v169_v26 = vadd.f32 %v826_v6, %v113_v10  ;;  %v192_v1 = vmax.f32 %v143_v19, 0.0 }
  0x29   :  { %v88_v2 = vmul.f32 %v821_v5, %v32_v37  ;;  %v89_v11 = vmul.f32 %v821_v5, %v33_v42  ;;  %v114_v29 = vmul.f32 %v821_v5, %v58_v52  ;;  %v115_v30 = vmul.f32 %v821_v5, %v59_v43 }
  0x2a   :  { %v217_v22 = vmax.f32 %v168_v25, 0.0  ;;  %v218_v27 = vmax.f32 %v169_v26, 0.0 }
  0x2b   :  { %v144_v32 = vadd.f32 %v826_v6, %v88_v2  ;;  %v145_v33 = vadd.f32 %v826_v6, %v89_v11  ;;  %v170_v35 = vadd.f32 %v826_v6, %v114_v29  ;;  %v171_v36 = vadd.f32 %v826_v6, %v115_v30 }
  0x2c   :  { %692 = vmatmul.mubr.msk.bf16.gmra.mrb[16].mxu0 %vm254_vm2, %v983_v48  ;;  %v251_v48 = vpack.c.bf16 %v226_v4, %v225_v61  ;;  %v247_v34 = vpack.c.bf16 %v218_v27, %v217_v22 }
  0x2d   :  { %744 = vmatmul.mubr.msk.bf16.gmra.mrb[16].mxu1 %vm254_vm2, %v989_v51  ;;  %695 = vmatprep.mubr.msk.bf16.mxu0 %vm780_vm1, %v779_v0  ;;  %v142_v51 = vadd.f32 %v826_v6, %v993_v53  ;;  %v240_v53 = vpack.c.bf16 %v204_v21, %v203_v20  ;;  %v193_v38 = vmax.f32 %v144_v32, 0.0  ;;  %v194_v39 = vmax.f32 %v145_v33, 0.0 }
  0x2e   :  { %747 = vmatprep.mubr.msk.bf16.mxu1 %vm780_vm1, %v779_v0  ;;  %v219_v5 = vmax.f32 %v170_v35, 0.0  ;;  %v220_v40 = vmax.f32 %v171_v36, 0.0  ;;  %v227_v6 = vmax.f32 %v1104_v14, 0.0 }
  0x2f   :  { %v191_v63 = vmax.f32 %v142_v51, 0.0  ;;  %v235_v41 = vpack.c.bf16 %v194_v39, %v193_v38 }
  0x30   :  { %v248_v44 = vpack.c.bf16 %v220_v40, %v219_v5 }
  0x31   :  { %v234_v31 = vpack.c.bf16 %v192_v1, %v191_v63 }
  0x34   :  { %696 = vmatmul.mubr.msk.bf16.gmra.mrb[20].mxu0 %vm254_vm2, %v233_v18 }
  0x35   :  { %748 = vmatmul.mubr.msk.bf16.gmra.mrb[20].mxu1 %vm254_vm2, %v246_v24  ;;  %699 = vmatprep.mubr.msk.bf16.mxu0 %vm780_vm1, %v779_v0 }
  0x36   :  { %751 = vmatprep.mubr.msk.bf16.mxu1 %vm780_vm1, %v779_v0 }
  0x3c   :  { %700 = vmatmul.mubr.msk.bf16.gmra.mrb[24].mxu0 %vm254_vm2, %v234_v31 }
  0x3d   :  { %752 = vmatmul.mubr.msk.bf16.gmra.mrb[24].mxu1 %vm254_vm2, %v247_v34  ;;  %703 = vmatprep.mubr.msk.bf16.mxu0 %vm780_vm1, %v779_v0 }
  0x3e   :  { %755 = vmatprep.mubr.msk.bf16.mxu1 %vm780_vm1, %v779_v0 }
  0x44   :  { %704 = vmatmul.mubr.msk.bf16.gmra.mrb[28].mxu0 %vm254_vm2, %v235_v41 }
  0x45   :  { %756 = vmatmul.mubr.msk.bf16.gmra.mrb[28].mxu1 %vm254_vm2, %v248_v44  ;;  %707 = vmatprep.mubr.msk.bf16.mxu0 %vm780_vm1, %v779_v0 }
  0x46   :  { %759 = vmatprep.mubr.msk.bf16.mxu1 %vm780_vm1, %v779_v0 }
  0x4c   :  { %708 = vmatmul.mubr.msk.bf16.gmra.mrb[32].mxu0 %vm254_vm2, %v1047_v23  ;;  %v252_v23 = vpack.c.bf16 %v227_v6, %v227_v6 }
  0x4d   :  { %760 = vmatmul.mubr.msk.bf16.gmra.mrb[32].mxu1 %vm254_vm2, %v1059_v28  ;;  %711 = vmatprep.mubr.msk.bf16.mxu0 %vm780_vm1, %v779_v0 }
  0x4e   :  { %763 = vmatprep.mubr.msk.bf16.mxu1 %vm780_vm1, %v779_v0 }
  0x54   :  { %712 = vmatmul.mubr.msk.bf16.gmra.mrb[36].mxu0 %vm254_vm2, %v1074_v45 }
  0x55   :  { %764 = vmatmul.mubr.msk.bf16.gmra.mrb[36].mxu1 %vm254_vm2, %v1088_v56  ;;  %715 = vmatprep.mubr.msk.bf16.mxu0 %vm780_vm1, %v779_v0 }
  0x56   :  { %767 = vmatprep.mubr.msk.bf16.mxu1 %vm780_vm1, %v779_v0 }
  0x5c   :  { %716 = vmatmul.mubr.msk.bf16.gmra.mrb[40].mxu0 %vm254_vm2, %v238_v12 }
  0x5d   :  { %768 = vmatmul.mubr.msk.bf16.gmra.mrb[40].mxu1 %vm254_vm2, %v251_v48  ;;  %719 = vmatprep.mubr.msk.bf16.mxu0 %vm780_vm1, %v779_v0 }
  0x5e   :  { %771 = vmatprep.mubr.msk.bf16.mxu1 %vm780_vm1, %v779_v0 }
  0x64   :  { %720 = vmatmul.mubr.msk.bf16.gmra.mrb[44].mxu0 %vm254_vm2, %v239_v17 }
  0x65   :  { %772 = vmatmul.mubr.msk.bf16.gmra.mrb[44].mxu1 %vm254_vm2, %v252_v23  ;;  %723 = vmatprep.mubr.msk.bf16.mxu0 %vm780_vm1, %v779_v0 }
  0x6c   :  { %724 = vmatmul.mubr.msk.bf16.gmra.mrb[48].mxu0 %vm254_vm2, %v240_v53 }
  0xdf   :  { %v368_v28 = vpop.f32.mrb[0].mxu0 }
  0xe0   :  { %567 = vst.msk [vmem:[%s1389_s4] sm:$0xff] %vm566_vm3, %v368_v28  ;;  %v677_v45 = vpop.f32.mrb[1].mxu0  ;;  %v472_v46 = vpop.f32.mrb[0].mxu1 }
  0xe1   :  { %v371_v47 = vpop.f32.mrb[2].mxu0  ;;  %593 = vst.msk [vmem:[%s1389_s4 + $0xd0] sm:$0xff] %vm566_vm3, %v472_v46  ;;  %v729_v49 = vpop.f32.mrb[1].mxu1 }
  0xe2   :  { %568 = vst.msk [vmem:[%s1389_s4 + $0x8] sm:$0xff] %vm566_vm3, %v371_v47  ;;  %v678_v0 = vpop.f32.mrb[3].mxu0  ;;  %v475_v50 = vpop.f32.mrb[2].mxu1 }
  0xe3   :  { %594 = vst.msk [vmem:[%s1389_s4 + $0xd8] sm:$0xff] %vm566_vm3, %v475_v50  ;;  %v730_v54 = vpop.f32.mrb[3].mxu1 }
  0xe7   :  { %v376_v55 = vpop.f32.mrb[4].mxu0 }
  0xe8   :  { %569 = vst.msk [vmem:[%s1389_s4 + $0x10] sm:$0xff] %vm566_vm3, %v376_v55  ;;  %v681_v56 = vpop.f32.mrb[5].mxu0  ;;  %v480_v57 = vpop.f32.mrb[4].mxu1 }
  0xe9   :  { %v379_v58 = vpop.f32.mrb[6].mxu0  ;;  %595 = vst.msk [vmem:[%s1389_s4 + $0xe0] sm:$0xff] %vm566_vm3, %v480_v57  ;;  %v733_v59 = vpop.f32.mrb[5].mxu1 }
  0xea   :  { %570 = vst.msk [vmem:[%s1389_s4 + $0x18] sm:$0xff] %vm566_vm3, %v379_v58  ;;  %v682_v60 = vpop.f32.mrb[7].mxu0  ;;  %v483_v61 = vpop.f32.mrb[6].mxu1 }
  0xeb   :  { %596 = vst.msk [vmem:[%s1389_s4 + $0xe8] sm:$0xff] %vm566_vm3, %v483_v61  ;;  %v734_v62 = vpop.f32.mrb[7].mxu1 }
  0xef   :  { %v384_v3 = vpop.f32.mrb[8].mxu0 }
  0xf0   :  { %571 = vst.msk [vmem:[%s1389_s4 + $0x20] sm:$0xff] %vm566_vm3, %v384_v3  ;;  %v685_v4 = vpop.f32.mrb[9].mxu0  ;;  %v488_v7 = vpop.f32.mrb[8].mxu1 }
  0xf1   :  { %v387_v8 = vpop.f32.mrb[10].mxu0  ;;  %597 = vst.msk [vmem:[%s1389_s4 + $0xf0] sm:$0xff] %vm566_vm3, %v488_v7  ;;  %v737_v9 = vpop.f32.mrb[9].mxu1 }
  0xf2   :  { %572 = vst.msk [vmem:[%s1389_s4 + $0x28] sm:$0xff] %vm566_vm3, %v387_v8  ;;  %v686_v10 = vpop.f32.mrb[11].mxu0  ;;  %v491_v12 = vpop.f32.mrb[10].mxu1 }
  0xf3   :  { %598 = vst.msk [vmem:[%s1389_s4 + $0xf8] sm:$0xff] %vm566_vm3, %v491_v12  ;;  %v738_v13 = vpop.f32.mrb[11].mxu1 }
  0xf7   :  { %v392_v14 = vpop.f32.mrb[12].mxu0 }
  0xf8   :  { %573 = vst.msk [vmem:[%s1389_s4 + $0x30] sm:$0xff] %vm566_vm3, %v392_v14  ;;  %v689_v48 = vpop.f32.mrb[13].mxu0  ;;  %v496_v15 = vpop.f32.mrb[12].mxu1 }
  0xf9   :  { %v395_v16 = vpop.f32.mrb[14].mxu0  ;;  %599 = vst.msk [vmem:[%s1389_s4 + $0x100] sm:$0xff] %vm566_vm3, %v496_v15  ;;  %v741_v51 = vpop.f32.mrb[13].mxu1 }
  0xfa   :  { %574 = vst.msk [vmem:[%s1389_s4 + $0x38] sm:$0xff] %vm566_vm3, %v395_v16  ;;  %v690_v17 = vpop.f32.mrb[15].mxu0  ;;  %v499_v18 = vpop.f32.mrb[14].mxu1 }
  0xfb   :  { %600 = vst.msk [vmem:[%s1389_s4 + $0x108] sm:$0xff] %vm566_vm3, %v499_v18  ;;  %v742_v19 = vpop.f32.mrb[15].mxu1 }
  0xff   :  { %v400_v20 = vpop.f32.mrb[16].mxu0 }
 0x100   :  { %575 = vst.msk [vmem:[%s1389_s4 + $0x40] sm:$0xff] %vm566_vm3, %v400_v20  ;;  %v693_v21 = vpop.f32.mrb[17].mxu0  ;;  %v504_v24 = vpop.f32.mrb[16].mxu1 }
 0x101   :  { %v403_v25 = vpop.f32.mrb[18].mxu0  ;;  %601 = vst.msk [vmem:[%s1389_s4 + $0x110] sm:$0xff] %vm566_vm3, %v504_v24  ;;  %v745_v26 = vpop.f32.mrb[17].mxu1 }
 0x102   :  { %576 = vst.msk [vmem:[%s1389_s4 + $0x48] sm:$0xff] %vm566_vm3, %v403_v25  ;;  %v694_v37 = vpop.f32.mrb[19].mxu0  ;;  %v507_v42 = vpop.f32.mrb[18].mxu1 }
 0x103   :  { %602 = vst.msk [vmem:[%s1389_s4 + $0x118] sm:$0xff] %vm566_vm3, %v507_v42  ;;  %v746_v52 = vpop.f32.mrb[19].mxu1 }
 0x107   :  { %v408_v43 = vpop.f32.mrb[20].mxu0 }
 0x108   :  { %577 = vst.msk [vmem:[%s1389_s4 + $0x50] sm:$0xff] %vm566_vm3, %v408_v43  ;;  %v697_v53 = vpop.f32.mrb[21].mxu0  ;;  %v512_v63 = vpop.f32.mrb[20].mxu1 }
 0x109   :  { %v411_v1 = vpop.f32.mrb[22].mxu0  ;;  %603 = vst.msk [vmem:[%s1389_s4 + $0x120] sm:$0xff] %vm566_vm3, %v512_v63  ;;  %v749_v2 = vpop.f32.mrb[21].mxu1 }
 0x10a   :  { %578 = vst.msk [vmem:[%s1389_s4 + $0x58] sm:$0xff] %vm566_vm3, %v411_v1  ;;  %v698_v11 = vpop.f32.mrb[23].mxu0  ;;  %v515_v22 = vpop.f32.mrb[22].mxu1 }
 0x10b   :  { %604 = vst.msk [vmem:[%s1389_s4 + $0x128] sm:$0xff] %vm566_vm3, %v515_v22  ;;  %v750_v27 = vpop.f32.mrb[23].mxu1 }
 0x10f   :  { %v416_v29 = vpop.f32.mrb[24].mxu0 }
 0x110   :  { %579 = vst.msk [vmem:[%s1389_s4 + $0x60] sm:$0xff] %vm566_vm3, %v416_v29  ;;  %v701_v30 = vpop.f32.mrb[25].mxu0  ;;  %v520_v31 = vpop.f32.mrb[24].mxu1 }
 0x111   :  { %v419_v32 = vpop.f32.mrb[26].mxu0  ;;  %605 = vst.msk [vmem:[%s1389_s4 + $0x130] sm:$0xff] %vm566_vm3, %v520_v31  ;;  %v753_v33 = vpop.f32.mrb[25].mxu1 }
 0x112   :  { %580 = vst.msk [vmem:[%s1389_s4 + $0x68] sm:$0xff] %vm566_vm3, %v419_v32  ;;  %v702_v34 = vpop.f32.mrb[27].mxu0  ;;  %v523_v35 = vpop.f32.mrb[26].mxu1 }
 0x113   :  { %606 = vst.msk [vmem:[%s1389_s4 + $0x138] sm:$0xff] %vm566_vm3, %v523_v35  ;;  %v754_v36 = vpop.f32.mrb[27].mxu1 }
 0x117   :  { %v424_v38 = vpop.f32.mrb[28].mxu0 }
 0x118   :  { %581 = vst.msk [vmem:[%s1389_s4 + $0x70] sm:$0xff] %vm566_vm3, %v424_v38  ;;  %v705_v39 = vpop.f32.mrb[29].mxu0  ;;  %v528_v5 = vpop.f32.mrb[28].mxu1 }
 0x119   :  { %v427_v40 = vpop.f32.mrb[30].mxu0  ;;  %607 = vst.msk [vmem:[%s1389_s4 + $0x140] sm:$0xff] %vm566_vm3, %v528_v5  ;;  %v757_v41 = vpop.f32.mrb[29].mxu1 }
 0x11a   :  { %582 = vst.msk [vmem:[%s1389_s4 + $0x78] sm:$0xff] %vm566_vm3, %v427_v40  ;;  %v706_v44 = vpop.f32.mrb[31].mxu0  ;;  %v531_v6 = vpop.f32.mrb[30].mxu1 }
 0x11b   :  { %608 = vst.msk [vmem:[%s1389_s4 + $0x148] sm:$0xff] %vm566_vm3, %v531_v6  ;;  %v758_v23 = vpop.f32.mrb[31].mxu1 }
 0x11f   :  { %v432_v28 = vpop.f32.mrb[32].mxu0 }
 0x120   :  { %583 = vst.msk [vmem:[%s1389_s4 + $0x80] sm:$0xff] %vm566_vm3, %v432_v28  ;;  %v709_v45 = vpop.f32.mrb[33].mxu0  ;;  %v536_v46 = vpop.f32.mrb[32].mxu1 }
 0x121   :  { %v435_v47 = vpop.f32.mrb[34].mxu0  ;;  %609 = vst.msk [vmem:[%s1389_s4 + $0x150] sm:$0xff] %vm566_vm3, %v536_v46  ;;  %v761_v49 = vpop.f32.mrb[33].mxu1 }
 0x122   :  { %584 = vst.msk [vmem:[%s1389_s4 + $0x88] sm:$0xff] %vm566_vm3, %v435_v47  ;;  %v710_v0 = vpop.f32.mrb[35].mxu0  ;;  %v539_v50 = vpop.f32.mrb[34].mxu1 }
 0x123   :  { %610 = vst.msk [vmem:[%s1389_s4 + $0x158] sm:$0xff] %vm566_vm3, %v539_v50  ;;  %v762_v54 = vpop.f32.mrb[35].mxu1 }
 0x127   :  { %v440_v55 = vpop.f32.mrb[36].mxu0 }
 0x128   :  { %585 = vst.msk [vmem:[%s1389_s4 + $0x90] sm:$0xff] %vm566_vm3, %v440_v55  ;;  %v713_v56 = vpop.f32.mrb[37].mxu0  ;;  %v544_v57 = vpop.f32.mrb[36].mxu1 }
 0x129   :  { %v443_v58 = vpop.f32.mrb[38].mxu0  ;;  %611 = vst.msk [vmem:[%s1389_s4 + $0x160] sm:$0xff] %vm566_vm3, %v544_v57  ;;  %v765_v59 = vpop.f32.mrb[37].mxu1 }
 0x12a   :  { %586 = vst.msk [vmem:[%s1389_s4 + $0x98] sm:$0xff] %vm566_vm3, %v443_v58  ;;  %v714_v60 = vpop.f32.mrb[39].mxu0  ;;  %v547_v61 = vpop.f32.mrb[38].mxu1 }
 0x12b   :  { %612 = vst.msk [vmem:[%s1389_s4 + $0x168] sm:$0xff] %vm566_vm3, %v547_v61  ;;  %v766_v62 = vpop.f32.mrb[39].mxu1 }
 0x12f   :  { %v448_v3 = vpop.f32.mrb[40].mxu0 }
 0x130   :  { %587 = vst.msk [vmem:[%s1389_s4 + $0xa0] sm:$0xff] %vm566_vm3, %v448_v3  ;;  %v717_v4 = vpop.f32.mrb[41].mxu0  ;;  %v552_v7 = vpop.f32.mrb[40].mxu1 }
 0x131   :  { %v451_v8 = vpop.f32.mrb[42].mxu0  ;;  %613 = vst.msk [vmem:[%s1389_s4 + $0x170] sm:$0xff] %vm566_vm3, %v552_v7  ;;  %v769_v9 = vpop.f32.mrb[41].mxu1 }
 0x132   :  { %588 = vst.msk [vmem:[%s1389_s4 + $0xa8] sm:$0xff] %vm566_vm3, %v451_v8  ;;  %v718_v10 = vpop.f32.mrb[43].mxu0  ;;  %v555_v12 = vpop.f32.mrb[42].mxu1 }
 0x133   :  { %614 = vst.msk [vmem:[%s1389_s4 + $0x178] sm:$0xff] %vm566_vm3, %v555_v12  ;;  %v770_v13 = vpop.f32.mrb[43].mxu1 }
 0x137   :  { %v456_v14 = vpop.f32.mrb[44].mxu0 }
 0x138   :  { %589 = vst.msk [vmem:[%s1389_s4 + $0xb0] sm:$0xff] %vm566_vm3, %v456_v14  ;;  %v721_v48 = vpop.f32.mrb[45].mxu0  ;;  %v560_v15 = vpop.f32.mrb[44].mxu1 }
 0x139   :  { %v459_v16 = vpop.f32.mrb[46].mxu0  ;;  %615 = vst.msk [vmem:[%s1389_s4 + $0x180] sm:$0xff] %vm566_vm3, %v560_v15  ;;  %v773_v51 = vpop.f32.mrb[45].mxu1 }
 0x13a   :  { %590 = vst.msk [vmem:[%s1389_s4 + $0xb8] sm:$0xff] %vm566_vm3, %v459_v16  ;;  %v722_v17 = vpop.f32.mrb[47].mxu0  ;;  %v563_v18 = vpop.f32.mrb[46].mxu1 }
 0x13b   :  { %v774_v19 = vpop.f32.mrb[47].mxu1 }
 0x13f   :  { %v464_v20 = vpop.f32.mrb[48].mxu0 }
 0x140   :  { %591 = vst.msk [vmem:[%s1389_s4 + $0xc0] sm:$0xff] %vm566_vm3, %v464_v20  ;;  %v725_v21 = vpop.f32.mrb[49].mxu0 }
 0x141   :  { %v467_v24 = vpop.f32.mrb[50].mxu0 }
 0x142   :  { %592 = vst.msk [vmem:[%s1389_s4 + $0xc8] sm:$0xff] %vm566_vm3, %v467_v24  ;;  %v726_v25 = vpop.f32.mrb[51].mxu0 }

// kernel: sparsenet_forward.27
= control target key start
LH: loop header
LB: loop body
LE: loop exit
PB: predicated region body
PF: predicated region fallthrough
CT: control target
= control target key end

     0   :  { %v903_v0 = vmov 0   ;;  %vm355_vm0 = vcmask 130048   ;;  %vm663_vm1 = vcmask 31744   ;;  %s1314_s1 = inlined_call_operand.vmem [shape: bf16[144,4], index: 1, kind: input, shape index: {}]   ;;  %s1315_s0 = inlined_call_operand.vmem [shape: bf16[392,144], index: 0, kind: input, shape index: {}]   ;;  %s1316_s2 = inlined_call_operand.vmem [shape: f32[392,4], index: 2, kind: output, shape index: {}]  }
   0x1   :  { %431 = vmatprep.subr.bf16.mxu0 %v903_v0  ;;  %v820_v1 = vld [vmem:[%s1314_s1] sm:$0xff]   ;;  %801 = vmatprep.subr.bf16.mxu1 %v903_v0  ;;  %v821_v2 = vld [vmem:[%s1314_s1 + $0x8] sm:$0xff]   ;;  %v822_v3 = vld [vmem:[%s1314_s1 + $0x10] sm:$0xff]  }
   0x2   :  { %432 = vmatpush1.bf16.msra.mxu0 %v820_v1  ;;  %810 = vmatpush1.bf16.msra.mxu1 %v820_v1  ;;  %v823_v4 = vld [vmem:[%s1314_s1 + $0x18] sm:$0xff]   ;;  %v831_v5 = vld [vmem:[%s1315_s0 + $0x4] ss:$8 sps:$4 sm:$0xff]   ;;  %v826_v9 = vld [vmem:[%s1314_s1 + $0x30] sm:$0xff]  }
   0x3   :  { %433 = vmatprep.subr.bf16.mxu0 %v903_v0  ;;  %802 = vmatprep.subr.bf16.mxu1 %v903_v0  ;;  %v834_v6 = vld [vmem:[%s1315_s0 + $0xd4] ss:$8 sps:$4 sm:$0xff]   ;;  %v824_v7 = vld [vmem:[%s1314_s1 + $0x20] sm:$0xff]   ;;  %v825_v8 = vld [vmem:[%s1314_s1 + $0x28] sm:$0xff]  }
   0x4   :  { %776 = vmatprep.mubr.msk.bf16.mxu0 %vm355_vm0, %v831_v5  ;;  %789 = vmatprep.mubr.msk.bf16.mxu1 %vm355_vm0, %v834_v6  ;;  %v827_v10 = vld [vmem:[%s1314_s1 + $0x38] sm:$0xff]   ;;  %v828_v11 = vld [vmem:[%s1314_s1 + $0x40] sm:$0xff]  }
   0x5   :  { %v829_v12 = vld [vmem:[%s1315_s0] ss:$8 sps:$4 sm:$0xff]   ;;  %v832_v13 = vld [vmem:[%s1315_s0 + $0xd0] ss:$8 sps:$4 sm:$0xff]   ;;  %v835_v14 = vld [vmem:[%s1315_s0 + $0x14] ss:$8 sps:$4 sm:$0xff]  }
   0x6   :  { %434 = vmatpush1.bf16.msra.mxu0 %v821_v2  ;;  %811 = vmatpush1.bf16.msra.mxu1 %v821_v2  ;;  %v838_v15 = vld [vmem:[%s1315_s0 + $0xe4] ss:$8 sps:$4 sm:$0xff]   ;;  %v837_v16 = vld [vmem:[%s1315_s0 + $0x10] ss:$8 sps:$4 sm:$0xff]   ;;  %v840_v17 = vld [vmem:[%s1315_s0 + $0xe0] ss:$8 sps:$4 sm:$0xff]  }
   0x7   :  { %435 = vmatprep.subr.bf16.mxu0 %v903_v0  ;;  %803 = vmatprep.subr.bf16.mxu1 %v903_v0  ;;  %v841_v18 = vld [vmem:[%s1315_s0 + $0x24] ss:$8 sps:$4 sm:$0xff]   ;;  %v844_v19 = vld [vmem:[%s1315_s0 + $0xf4] ss:$8 sps:$4 sm:$0xff]   ;;  %v843_v20 = vld [vmem:[%s1315_s0 + $0x20] ss:$8 sps:$4 sm:$0xff]  }
   0x8   :  { %v846_v21 = vld [vmem:[%s1315_s0 + $0xf0] ss:$8 sps:$4 sm:$0xff]   ;;  %v847_v22 = vld [vmem:[%s1315_s0 + $0x34] ss:$8 sps:$4 sm:$0xff]   ;;  %v850_v23 = vld [vmem:[%s1315_s0 + $0x104] ss:$8 sps:$4 sm:$0xff]  }
   0x9   :  { %v849_v24 = vld [vmem:[%s1315_s0 + $0x30] ss:$8 sps:$4 sm:$0xff]   ;;  %v852_v25 = vld [vmem:[%s1315_s0 + $0x100] ss:$8 sps:$4 sm:$0xff]   ;;  %v853_v26 = vld [vmem:[%s1315_s0 + $0x44] ss:$8 sps:$4 sm:$0xff]  }
   0xa   :  { %436 = vmatpush1.bf16.msra.mxu0 %v822_v3  ;;  %812 = vmatpush1.bf16.msra.mxu1 %v822_v3  ;;  %v856_v27 = vld [vmem:[%s1315_s0 + $0x114] ss:$8 sps:$4 sm:$0xff]   ;;  %v855_v28 = vld [vmem:[%s1315_s0 + $0x40] ss:$8 sps:$4 sm:$0xff]   ;;  %v858_v29 = vld [vmem:[%s1315_s0 + $0x110] ss:$8 sps:$4 sm:$0xff]  }
   0xb   :  { %437 = vmatprep.subr.bf16.mxu0 %v903_v0  ;;  %804 = vmatprep.subr.bf16.mxu1 %v903_v0  ;;  %v859_v30 = vld [vmem:[%s1315_s0 + $0x54] ss:$8 sps:$4 sm:$0xff]   ;;  %v862_v31 = vld [vmem:[%s1315_s0 + $0x124] ss:$8 sps:$4 sm:$0xff]   ;;  %v861_v32 = vld [vmem:[%s1315_s0 + $0x50] ss:$8 sps:$4 sm:$0xff]  }
   0xc   :  { %v864_v33 = vld [vmem:[%s1315_s0 + $0x120] ss:$8 sps:$4 sm:$0xff]   ;;  %v865_v34 = vld [vmem:[%s1315_s0 + $0x64] ss:$8 sps:$4 sm:$0xff]   ;;  %v868_v35 = vld [vmem:[%s1315_s0 + $0x134] ss:$8 sps:$4 sm:$0xff]  }
   0xd   :  { %v867_v36 = vld [vmem:[%s1315_s0 + $0x60] ss:$8 sps:$4 sm:$0xff]   ;;  %v870_v37 = vld [vmem:[%s1315_s0 + $0x130] ss:$8 sps:$4 sm:$0xff]   ;;  %v871_v38 = vld [vmem:[%s1315_s0 + $0x74] ss:$8 sps:$4 sm:$0xff]  }
   0xe   :  { %438 = vmatpush1.bf16.msra.mxu0 %v823_v4  ;;  %813 = vmatpush1.bf16.msra.mxu1 %v823_v4  ;;  %v874_v39 = vld [vmem:[%s1315_s0 + $0x144] ss:$8 sps:$4 sm:$0xff]   ;;  %v873_v40 = vld [vmem:[%s1315_s0 + $0x70] ss:$8 sps:$4 sm:$0xff]   ;;  %v876_v41 = vld [vmem:[%s1315_s0 + $0x140] ss:$8 sps:$4 sm:$0xff]  }
   0xf   :  { %439 = vmatprep.subr.bf16.mxu0 %v903_v0  ;;  %805 = vmatprep.subr.bf16.mxu1 %v903_v0  ;;  %v877_v42 = vld [vmem:[%s1315_s0 + $0x84] ss:$8 sps:$4 sm:$0xff]   ;;  %v880_v43 = vld [vmem:[%s1315_s0 + $0x154] ss:$8 sps:$4 sm:$0xff]   ;;  %v879_v44 = vld [vmem:[%s1315_s0 + $0x80] ss:$8 sps:$4 sm:$0xff]  }
  0x10   :  { %v882_v45 = vld [vmem:[%s1315_s0 + $0x150] ss:$8 sps:$4 sm:$0xff]   ;;  %v883_v46 = vld [vmem:[%s1315_s0 + $0x94] ss:$8 sps:$4 sm:$0xff]   ;;  %v886_v47 = vld [vmem:[%s1315_s0 + $0x164] ss:$8 sps:$4 sm:$0xff]  }
  0x11   :  { %v885_v48 = vld [vmem:[%s1315_s0 + $0x90] ss:$8 sps:$4 sm:$0xff]   ;;  %v888_v49 = vld [vmem:[%s1315_s0 + $0x160] ss:$8 sps:$4 sm:$0xff]   ;;  %v889_v50 = vld [vmem:[%s1315_s0 + $0xa4] ss:$8 sps:$4 sm:$0xff]  }
  0x12   :  { %440 = vmatpush1.bf16.msra.mxu0 %v824_v7  ;;  %814 = vmatpush1.bf16.msra.mxu1 %v824_v7  ;;  %v892_v51 = vld [vmem:[%s1315_s0 + $0x174] ss:$8 sps:$4 sm:$0xff]   ;;  %v60_v52 = vld [vmem:[%s1315_s0 + $0x180] sm:$0xff]  ;;  %v894_v54 = vld [vmem:[%s1315_s0 + $0x170] ss:$8 sps:$4 sm:$0xff]  }
  0x13   :  { %441 = vmatprep.subr.bf16.mxu0 %v903_v0  ;;  %806 = vmatprep.subr.bf16.mxu1 %v903_v0  ;;  %v891_v53 = vld [vmem:[%s1315_s0 + $0xa0] ss:$8 sps:$4 sm:$0xff]   ;;  %v895_v55 = vld [vmem:[%s1315_s0 + $0xb4] ss:$8 sps:$4 sm:$0xff]   ;;  %v766_v56 = vcombine.high %v60_v52, %v60_v52  ;;  %v897_v57 = vld [vmem:[%s1315_s0 + $0xb0] ss:$8 sps:$4 sm:$0xff]   ;;  %v765_v58 = vcombine.low %v60_v52, %v60_v52 }
  0x14   :  { %v900_v59 = vld [vmem:[%s1315_s0 + $0xc4] ss:$8 sps:$4 sm:$0xff]   ;;  %v902_v60 = vld [vmem:[%s1315_s0 + $0xc0] ss:$8 sps:$4 sm:$0xff]  }
  0x16   :  { %442 = vmatpush1.bf16.msra.mxu0 %v825_v8  ;;  %815 = vmatpush1.bf16.msra.mxu1 %v825_v8 }
  0x17   :  { %443 = vmatprep.subr.bf16.mxu0 %v903_v0  ;;  %807 = vmatprep.subr.bf16.mxu1 %v903_v0 }
  0x1a   :  { %444 = vmatpush1.bf16.msra.mxu0 %v826_v9  ;;  %816 = vmatpush1.bf16.msra.mxu1 %v826_v9 }
  0x1b   :  { %445 = vmatprep.subr.bf16.mxu0 %v903_v0  ;;  %808 = vmatprep.subr.bf16.mxu1 %v903_v0 }
  0x1e   :  { %446 = vmatpush1.bf16.msra.mxu0 %v827_v10  ;;  %817 = vmatpush1.bf16.msra.mxu1 %v827_v10 }
  0x1f   :  { %447 = vmatprep.subr.bf16.mxu0 %v903_v0  ;;  %809 = vmatprep.subr.bf16.mxu1 %v903_v0 }
  0x22   :  { %448 = vmatpush1.bf16.msra.mxu0 %v828_v11  ;;  %818 = vmatpush1.bf16.msra.mxu1 %v828_v11 }
  0x25   :  { %464 = vmatmul.mubr.bf16.vlgmr.msra.gmra.mrb[0].mxu0 %v829_v12  ;;  %568 = vmatmul.mubr.bf16.vlgmr.msra.gmra.mrb[0].mxu1 %v832_v13 }
  0x26   :  { %777 = vmatprep.mubr.msk.bf16.mxu0 %vm355_vm0, %v835_v14  ;;  %790 = vmatprep.mubr.msk.bf16.mxu1 %vm355_vm0, %v838_v15 }
  0x2d   :  { %472 = vmatmul.mubr.bf16.gmra.mrb[4].mxu0 %v837_v16  ;;  %576 = vmatmul.mubr.bf16.gmra.mrb[4].mxu1 %v840_v17 }
  0x2e   :  { %778 = vmatprep.mubr.msk.bf16.mxu0 %vm355_vm0, %v841_v18  ;;  %791 = vmatprep.mubr.msk.bf16.mxu1 %vm355_vm0, %v844_v19 }
  0x35   :  { %480 = vmatmul.mubr.bf16.gmra.mrb[8].mxu0 %v843_v20  ;;  %584 = vmatmul.mubr.bf16.gmra.mrb[8].mxu1 %v846_v21 }
  0x36   :  { %779 = vmatprep.mubr.msk.bf16.mxu0 %vm355_vm0, %v847_v22  ;;  %792 = vmatprep.mubr.msk.bf16.mxu1 %vm355_vm0, %v850_v23 }
  0x3d   :  { %488 = vmatmul.mubr.bf16.gmra.mrb[12].mxu0 %v849_v24  ;;  %592 = vmatmul.mubr.bf16.gmra.mrb[12].mxu1 %v852_v25 }
  0x3e   :  { %780 = vmatprep.mubr.msk.bf16.mxu0 %vm355_vm0, %v853_v26  ;;  %793 = vmatprep.mubr.msk.bf16.mxu1 %vm355_vm0, %v856_v27 }
  0x45   :  { %496 = vmatmul.mubr.bf16.gmra.mrb[16].mxu0 %v855_v28  ;;  %600 = vmatmul.mubr.bf16.gmra.mrb[16].mxu1 %v858_v29 }
  0x46   :  { %781 = vmatprep.mubr.msk.bf16.mxu0 %vm355_vm0, %v859_v30  ;;  %794 = vmatprep.mubr.msk.bf16.mxu1 %vm355_vm0, %v862_v31 }
  0x4d   :  { %504 = vmatmul.mubr.bf16.gmra.mrb[20].mxu0 %v861_v32  ;;  %608 = vmatmul.mubr.bf16.gmra.mrb[20].mxu1 %v864_v33 }
  0x4e   :  { %782 = vmatprep.mubr.msk.bf16.mxu0 %vm355_vm0, %v865_v34  ;;  %795 = vmatprep.mubr.msk.bf16.mxu1 %vm355_vm0, %v868_v35 }
  0x55   :  { %512 = vmatmul.mubr.bf16.gmra.mrb[24].mxu0 %v867_v36  ;;  %616 = vmatmul.mubr.bf16.gmra.mrb[24].mxu1 %v870_v37 }
  0x56   :  { %783 = vmatprep.mubr.msk.bf16.mxu0 %vm355_vm0, %v871_v38  ;;  %796 = vmatprep.mubr.msk.bf16.mxu1 %vm355_vm0, %v874_v39 }
  0x5d   :  { %520 = vmatmul.mubr.bf16.gmra.mrb[28].mxu0 %v873_v40  ;;  %624 = vmatmul.mubr.bf16.gmra.mrb[28].mxu1 %v876_v41 }
  0x5e   :  { %784 = vmatprep.mubr.msk.bf16.mxu0 %vm355_vm0, %v877_v42  ;;  %797 = vmatprep.mubr.msk.bf16.mxu1 %vm355_vm0, %v880_v43 }
  0x65   :  { %528 = vmatmul.mubr.bf16.gmra.mrb[32].mxu0 %v879_v44  ;;  %632 = vmatmul.mubr.bf16.gmra.mrb[32].mxu1 %v882_v45 }
  0x66   :  { %785 = vmatprep.mubr.msk.bf16.mxu0 %vm355_vm0, %v883_v46  ;;  %798 = vmatprep.mubr.msk.bf16.mxu1 %vm355_vm0, %v886_v47 }
  0x6d   :  { %536 = vmatmul.mubr.bf16.gmra.mrb[36].mxu0 %v885_v48  ;;  %640 = vmatmul.mubr.bf16.gmra.mrb[36].mxu1 %v888_v49 }
  0x6e   :  { %786 = vmatprep.mubr.msk.bf16.mxu0 %vm355_vm0, %v889_v50  ;;  %799 = vmatprep.mubr.msk.bf16.mxu1 %vm355_vm0, %v892_v51 }
  0x75   :  { %544 = vmatmul.mubr.bf16.gmra.mrb[40].mxu0 %v891_v53  ;;  %648 = vmatmul.mubr.bf16.gmra.mrb[40].mxu1 %v894_v54 }
  0x76   :  { %787 = vmatprep.mubr.msk.bf16.mxu0 %vm355_vm0, %v895_v55  ;;  %800 = vmatprep.mubr.msk.bf16.mxu1 %vm355_vm0, %v766_v56 }
  0x7d   :  { %552 = vmatmul.mubr.bf16.gmra.mrb[44].mxu0 %v897_v57  ;;  %656 = vmatmul.mubr.bf16.gmra.mrb[44].mxu1 %v765_v58 }
  0x7e   :  { %788 = vmatprep.mubr.msk.bf16.mxu0 %vm355_vm0, %v900_v59 }
  0x85   :  { %560 = vmatmul.mubr.bf16.gmra.mrb[48].mxu0 %v902_v60 }
  0xf8   :  { %v465_v61 = vpop.f32.mrb[0].mxu0  ;;  %v569_v62 = vpop.f32.mrb[0].mxu1 }
  0xf9   :  { %664 = vst.msk [vmem:[%s1316_s2] sm:$0xff] %vm663_vm1, %v465_v61  ;;  %v467_v63 = vpop.f32.mrb[1].mxu0  ;;  %690 = vst.msk [vmem:[%s1316_s2 + $0xd0] sm:$0xff] %vm663_vm1, %v569_v62  ;;  %v571_v0 = vpop.f32.mrb[1].mxu1 }
  0xfa   :  { %v468_v1 = vpop.f32.mrb[2].mxu0  ;;  %v572_v2 = vpop.f32.mrb[2].mxu1 }
  0xfb   :  { %665 = vst.msk [vmem:[%s1316_s2 + $0x8] sm:$0xff] %vm663_vm1, %v468_v1  ;;  %v470_v3 = vpop.f32.mrb[3].mxu0  ;;  %691 = vst.msk [vmem:[%s1316_s2 + $0xd8] sm:$0xff] %vm663_vm1, %v572_v2  ;;  %v574_v4 = vpop.f32.mrb[3].mxu1 }
 0x100   :  { %v473_v5 = vpop.f32.mrb[4].mxu0  ;;  %v577_v6 = vpop.f32.mrb[4].mxu1 }
 0x101   :  { %666 = vst.msk [vmem:[%s1316_s2 + $0x10] sm:$0xff] %vm663_vm1, %v473_v5  ;;  %v475_v7 = vpop.f32.mrb[5].mxu0  ;;  %692 = vst.msk [vmem:[%s1316_s2 + $0xe0] sm:$0xff] %vm663_vm1, %v577_v6  ;;  %v579_v8 = vpop.f32.mrb[5].mxu1 }
 0x102   :  { %v476_v9 = vpop.f32.mrb[6].mxu0  ;;  %v580_v10 = vpop.f32.mrb[6].mxu1 }
 0x103   :  { %667 = vst.msk [vmem:[%s1316_s2 + $0x18] sm:$0xff] %vm663_vm1, %v476_v9  ;;  %v478_v11 = vpop.f32.mrb[7].mxu0  ;;  %693 = vst.msk [vmem:[%s1316_s2 + $0xe8] sm:$0xff] %vm663_vm1, %v580_v10  ;;  %v582_v12 = vpop.f32.mrb[7].mxu1 }
 0x108   :  { %v481_v13 = vpop.f32.mrb[8].mxu0  ;;  %v585_v14 = vpop.f32.mrb[8].mxu1 }
 0x109   :  { %668 = vst.msk [vmem:[%s1316_s2 + $0x20] sm:$0xff] %vm663_vm1, %v481_v13  ;;  %v483_v15 = vpop.f32.mrb[9].mxu0  ;;  %694 = vst.msk [vmem:[%s1316_s2 + $0xf0] sm:$0xff] %vm663_vm1, %v585_v14  ;;  %v587_v16 = vpop.f32.mrb[9].mxu1 }
 0x10a   :  { %v484_v17 = vpop.f32.mrb[10].mxu0  ;;  %v588_v18 = vpop.f32.mrb[10].mxu1 }
 0x10b   :  { %669 = vst.msk [vmem:[%s1316_s2 + $0x28] sm:$0xff] %vm663_vm1, %v484_v17  ;;  %v486_v19 = vpop.f32.mrb[11].mxu0  ;;  %695 = vst.msk [vmem:[%s1316_s2 + $0xf8] sm:$0xff] %vm663_vm1, %v588_v18  ;;  %v590_v20 = vpop.f32.mrb[11].mxu1 }
 0x110   :  { %v489_v21 = vpop.f32.mrb[12].mxu0  ;;  %v593_v22 = vpop.f32.mrb[12].mxu1 }
 0x111   :  { %670 = vst.msk [vmem:[%s1316_s2 + $0x30] sm:$0xff] %vm663_vm1, %v489_v21  ;;  %v491_v23 = vpop.f32.mrb[13].mxu0  ;;  %696 = vst.msk [vmem:[%s1316_s2 + $0x100] sm:$0xff] %vm663_vm1, %v593_v22  ;;  %v595_v24 = vpop.f32.mrb[13].mxu1 }
 0x112   :  { %v492_v25 = vpop.f32.mrb[14].mxu0  ;;  %v596_v26 = vpop.f32.mrb[14].mxu1 }
 0x113   :  { %671 = vst.msk [vmem:[%s1316_s2 + $0x38] sm:$0xff] %vm663_vm1, %v492_v25  ;;  %v494_v27 = vpop.f32.mrb[15].mxu0  ;;  %697 = vst.msk [vmem:[%s1316_s2 + $0x108] sm:$0xff] %vm663_vm1, %v596_v26  ;;  %v598_v28 = vpop.f32.mrb[15].mxu1 }
 0x118   :  { %v497_v29 = vpop.f32.mrb[16].mxu0  ;;  %v601_v30 = vpop.f32.mrb[16].mxu1 }
 0x119   :  { %672 = vst.msk [vmem:[%s1316_s2 + $0x40] sm:$0xff] %vm663_vm1, %v497_v29  ;;  %v499_v31 = vpop.f32.mrb[17].mxu0  ;;  %698 = vst.msk [vmem:[%s1316_s2 + $0x110] sm:$0xff] %vm663_vm1, %v601_v30  ;;  %v603_v32 = vpop.f32.mrb[17].mxu1 }
 0x11a   :  { %v500_v33 = vpop.f32.mrb[18].mxu0  ;;  %v604_v34 = vpop.f32.mrb[18].mxu1 }
 0x11b   :  { %673 = vst.msk [vmem:[%s1316_s2 + $0x48] sm:$0xff] %vm663_vm1, %v500_v33  ;;  %v502_v35 = vpop.f32.mrb[19].mxu0  ;;  %699 = vst.msk [vmem:[%s1316_s2 + $0x118] sm:$0xff] %vm663_vm1, %v604_v34  ;;  %v606_v36 = vpop.f32.mrb[19].mxu1 }
 0x120   :  { %v505_v37 = vpop.f32.mrb[20].mxu0  ;;  %v609_v38 = vpop.f32.mrb[20].mxu1 }
 0x121   :  { %674 = vst.msk [vmem:[%s1316_s2 + $0x50] sm:$0xff] %vm663_vm1, %v505_v37  ;;  %v507_v39 = vpop.f32.mrb[21].mxu0  ;;  %700 = vst.msk [vmem:[%s1316_s2 + $0x120] sm:$0xff] %vm663_vm1, %v609_v38  ;;  %v611_v40 = vpop.f32.mrb[21].mxu1 }
 0x122   :  { %v508_v41 = vpop.f32.mrb[22].mxu0  ;;  %v612_v42 = vpop.f32.mrb[22].mxu1 }
 0x123   :  { %675 = vst.msk [vmem:[%s1316_s2 + $0x58] sm:$0xff] %vm663_vm1, %v508_v41  ;;  %v510_v43 = vpop.f32.mrb[23].mxu0  ;;  %701 = vst.msk [vmem:[%s1316_s2 + $0x128] sm:$0xff] %vm663_vm1, %v612_v42  ;;  %v614_v44 = vpop.f32.mrb[23].mxu1 }
 0x128   :  { %v513_v45 = vpop.f32.mrb[24].mxu0  ;;  %v617_v46 = vpop.f32.mrb[24].mxu1 }
 0x129   :  { %676 = vst.msk [vmem:[%s1316_s2 + $0x60] sm:$0xff] %vm663_vm1, %v513_v45  ;;  %v515_v47 = vpop.f32.mrb[25].mxu0  ;;  %702 = vst.msk [vmem:[%s1316_s2 + $0x130] sm:$0xff] %vm663_vm1, %v617_v46  ;;  %v619_v48 = vpop.f32.mrb[25].mxu1 }
 0x12a   :  { %v516_v49 = vpop.f32.mrb[26].mxu0  ;;  %v620_v50 = vpop.f32.mrb[26].mxu1 }
 0x12b   :  { %677 = vst.msk [vmem:[%s1316_s2 + $0x68] sm:$0xff] %vm663_vm1, %v516_v49  ;;  %v518_v51 = vpop.f32.mrb[27].mxu0  ;;  %703 = vst.msk [vmem:[%s1316_s2 + $0x138] sm:$0xff] %vm663_vm1, %v620_v50  ;;  %v622_v52 = vpop.f32.mrb[27].mxu1 }
 0x130   :  { %v521_v53 = vpop.f32.mrb[28].mxu0  ;;  %v625_v54 = vpop.f32.mrb[28].mxu1 }
 0x131   :  { %678 = vst.msk [vmem:[%s1316_s2 + $0x70] sm:$0xff] %vm663_vm1, %v521_v53  ;;  %v523_v55 = vpop.f32.mrb[29].mxu0  ;;  %704 = vst.msk [vmem:[%s1316_s2 + $0x140] sm:$0xff] %vm663_vm1, %v625_v54  ;;  %v627_v56 = vpop.f32.mrb[29].mxu1 }
 0x132   :  { %v524_v57 = vpop.f32.mrb[30].mxu0  ;;  %v628_v58 = vpop.f32.mrb[30].mxu1 }
 0x133   :  { %679 = vst.msk [vmem:[%s1316_s2 + $0x78] sm:$0xff] %vm663_vm1, %v524_v57  ;;  %v526_v59 = vpop.f32.mrb[31].mxu0  ;;  %705 = vst.msk [vmem:[%s1316_s2 + $0x148] sm:$0xff] %vm663_vm1, %v628_v58  ;;  %v630_v60 = vpop.f32.mrb[31].mxu1 }
 0x138   :  { %v529_v61 = vpop.f32.mrb[32].mxu0  ;;  %v633_v62 = vpop.f32.mrb[32].mxu1 }
 0x139   :  { %680 = vst.msk [vmem:[%s1316_s2 + $0x80] sm:$0xff] %vm663_vm1, %v529_v61  ;;  %v531_v63 = vpop.f32.mrb[33].mxu0  ;;  %706 = vst.msk [vmem:[%s1316_s2 + $0x150] sm:$0xff] %vm663_vm1, %v633_v62  ;;  %v635_v0 = vpop.f32.mrb[33].mxu1 }
 0x13a   :  { %v532_v1 = vpop.f32.mrb[34].mxu0  ;;  %v636_v2 = vpop.f32.mrb[34].mxu1 }
 0x13b   :  { %681 = vst.msk [vmem:[%s1316_s2 + $0x88] sm:$0xff] %vm663_vm1, %v532_v1  ;;  %v534_v3 = vpop.f32.mrb[35].mxu0  ;;  %707 = vst.msk [vmem:[%s1316_s2 + $0x158] sm:$0xff] %vm663_vm1, %v636_v2  ;;  %v638_v4 = vpop.f32.mrb[35].mxu1 }
 0x140   :  { %v537_v5 = vpop.f32.mrb[36].mxu0  ;;  %v641_v6 = vpop.f32.mrb[36].mxu1 }
 0x141   :  { %682 = vst.msk [vmem:[%s1316_s2 + $0x90] sm:$0xff] %vm663_vm1, %v537_v5  ;;  %v539_v7 = vpop.f32.mrb[37].mxu0  ;;  %708 = vst.msk [vmem:[%s1316_s2 + $0x160] sm:$0xff] %vm663_vm1, %v641_v6  ;;  %v643_v8 = vpop.f32.mrb[37].mxu1 }
 0x142   :  { %v540_v9 = vpop.f32.mrb[38].mxu0  ;;  %v644_v10 = vpop.f32.mrb[38].mxu1 }
 0x143   :  { %683 = vst.msk [vmem:[%s1316_s2 + $0x98] sm:$0xff] %vm663_vm1, %v540_v9  ;;  %v542_v11 = vpop.f32.mrb[39].mxu0  ;;  %709 = vst.msk [vmem:[%s1316_s2 + $0x168] sm:$0xff] %vm663_vm1, %v644_v10  ;;  %v646_v12 = vpop.f32.mrb[39].mxu1 }
 0x148   :  { %v545_v13 = vpop.f32.mrb[40].mxu0  ;;  %v649_v14 = vpop.f32.mrb[40].mxu1 }
 0x149   :  { %684 = vst.msk [vmem:[%s1316_s2 + $0xa0] sm:$0xff] %vm663_vm1, %v545_v13  ;;  %v547_v15 = vpop.f32.mrb[41].mxu0  ;;  %710 = vst.msk [vmem:[%s1316_s2 + $0x170] sm:$0xff] %vm663_vm1, %v649_v14  ;;  %v651_v16 = vpop.f32.mrb[41].mxu1 }
 0x14a   :  { %v548_v17 = vpop.f32.mrb[42].mxu0  ;;  %v652_v18 = vpop.f32.mrb[42].mxu1 }
 0x14b   :  { %685 = vst.msk [vmem:[%s1316_s2 + $0xa8] sm:$0xff] %vm663_vm1, %v548_v17  ;;  %v550_v19 = vpop.f32.mrb[43].mxu0  ;;  %711 = vst.msk [vmem:[%s1316_s2 + $0x178] sm:$0xff] %vm663_vm1, %v652_v18  ;;  %v654_v20 = vpop.f32.mrb[43].mxu1 }
 0x150   :  { %v553_v21 = vpop.f32.mrb[44].mxu0  ;;  %v657_v22 = vpop.f32.mrb[44].mxu1 }
 0x151   :  { %686 = vst.msk [vmem:[%s1316_s2 + $0xb0] sm:$0xff] %vm663_vm1, %v553_v21  ;;  %v555_v23 = vpop.f32.mrb[45].mxu0  ;;  %712 = vst.msk [vmem:[%s1316_s2 + $0x180] sm:$0xff] %vm663_vm1, %v657_v22  ;;  %v659_v24 = vpop.f32.mrb[45].mxu1 }
 0x152   :  { %v556_v25 = vpop.f32.mrb[46].mxu0  ;;  %v660_v26 = vpop.f32.mrb[46].mxu1 }
 0x153   :  { %687 = vst.msk [vmem:[%s1316_s2 + $0xb8] sm:$0xff] %vm663_vm1, %v556_v25  ;;  %v558_v27 = vpop.f32.mrb[47].mxu0  ;;  %v661_v28 = vpop.f32.mrb[47].mxu1 }
 0x158   :  { %v561_v29 = vpop.f32.mrb[48].mxu0 }
 0x159   :  { %688 = vst.msk [vmem:[%s1316_s2 + $0xc0] sm:$0xff] %vm663_vm1, %v561_v29  ;;  %v563_v30 = vpop.f32.mrb[49].mxu0 }
 0x15a   :  { %v564_v31 = vpop.f32.mrb[50].mxu0 }
 0x15b   :  { %689 = vst.msk [vmem:[%s1316_s2 + $0xc8] sm:$0xff] %vm663_vm1, %v564_v31  ;;  %v566_v32 = vpop.f32.mrb[51].mxu0 }

// kernel: sparsenet_forward.28
= control target key start
LH: loop header
LB: loop body
LE: loop exit
PB: predicated region body
PF: predicated region fallthrough
CT: control target
= control target key end

     0   :  { %vm336_vm0 = vcmask 1045504   ;;  %v787_v0 = vmov 0.0   ;;  %vm788_vm1 = vmmov 0   ;;  %vm260_vm2 = vcmask 97280   ;;  %s1401_s3 = inlined_call_operand.vmem [shape: bf16[12,16], index: 3, kind: input, shape index: {}]   ;;  %s1402_s0 = inlined_call_operand.vmem [shape: f32[392,12], index: 0, kind: input, shape index: {}]   ;;  %s1403_s1 = inlined_call_operand.vmem [shape: f32[1,12], index: 1, kind: input, shape index: {}]   ;;  %s1404_s2 = inlined_call_operand.vmem [shape: f32[1,12], index: 2, kind: input, shape index: {}]   ;;  %s1405_s4 = inlined_call_operand.vmem [shape: f32[392,16], index: 4, kind: output, shape index: {}]  }
   0x1   :  { %680 = vmatprep.subr.bf16.mxu0 %v787_v0  ;;  %v786_v1 = vld [vmem:[%s1401_s3] sm:$0x3f]   ;;  %682 = vmatprep.mubr.msk.bf16.mxu0 %vm788_vm1, %v787_v0  ;;  %v19_v3 = vld [vmem:[%s1402_s0 + $0x8] sm:$0xff]  ;;  %v44_v9 = vld [vmem:[%s1402_s0 + $0xd0] sm:$0xff]  ;;  %vm572_vm3 = vcmask 130048  }
   0x2   :  { %v18_v2 = vld [vmem:[%s1402_s0] sm:$0xff]  ;;  %782 = vmatprep.subr.bf16.mxu1 %v787_v0  ;;  %734 = vmatprep.mubr.msk.bf16.mxu1 %vm788_vm1, %v787_v0  ;;  %v338_v5 = vsel %vm336_vm0, %v786_v1, 0  ;;  %v45_v10 = vld [vmem:[%s1402_s0 + $0xd8] sm:$0xff]  ;;  %v20_v13 = vld [vmem:[%s1402_s0 + $0x10] sm:$0xff] }
   0x3   :  { %v829_v4 = vld [vmem:[%s1403_s1] ss:$0 sm:$0xff]  ;;  %681 = vmatpush3.bf16.msra.mxu0 %v338_v5  ;;  %783 = vmatpush3.bf16.msra.mxu1 %v338_v5  ;;  %v21_v14 = vld [vmem:[%s1402_s0 + $0x18] sm:$0xff]  ;;  %v47_v20 = vld [vmem:[%s1402_s0 + $0xe8] sm:$0xff] }
   0x4   :  { %v74_v6 = vmul.f32 %v829_v4, %v18_v2  ;;  %v75_v7 = vmul.f32 %v829_v4, %v19_v3  ;;  %v839_v8 = vld [vmem:[%s1404_s2] ss:$0 sm:$0xff]  ;;  %v100_v11 = vmul.f32 %v829_v4, %v44_v9  ;;  %v101_v12 = vmul.f32 %v829_v4, %v45_v10  ;;  %v23_v34 = vld [vmem:[%s1402_s0 + $0x28] sm:$0xff]  ;;  %v48_v36 = vld [vmem:[%s1402_s0 + $0xf0] sm:$0xff] }
   0x5   :  { %v46_v15 = vld [vmem:[%s1402_s0 + $0xe0] sm:$0xff]  ;;  %v76_v18 = vmul.f32 %v829_v4, %v20_v13  ;;  %v77_v19 = vmul.f32 %v829_v4, %v21_v14  ;;  %v103_v24 = vmul.f32 %v829_v4, %v47_v20  ;;  %v49_v37 = vld [vmem:[%s1402_s0 + $0xf8] sm:$0xff]  ;;  %v79_v42 = vmul.f32 %v829_v4, %v23_v34  ;;  %v24_v47 = vld [vmem:[%s1402_s0 + $0x30] sm:$0xff] }
   0x6   :  { %v130_v16 = vadd.f32 %v839_v8, %v74_v6  ;;  %v131_v17 = vadd.f32 %v839_v8, %v75_v7  ;;  %v156_v21 = vadd.f32 %v839_v8, %v100_v11  ;;  %v157_v22 = vadd.f32 %v839_v8, %v101_v12  ;;  %v22_v33 = vld [vmem:[%s1402_s0 + $0x20] sm:$0xff]  ;;  %v25_v48 = vld [vmem:[%s1402_s0 + $0x38] sm:$0xff]  ;;  %v51_v50 = vld [vmem:[%s1402_s0 + $0x108] sm:$0xff] }
   0x7   :  { %v102_v23 = vmul.f32 %v829_v4, %v46_v15  ;;  %v132_v27 = vadd.f32 %v839_v8, %v76_v18  ;;  %v133_v28 = vadd.f32 %v839_v8, %v77_v19  ;;  %v159_v32 = vadd.f32 %v839_v8, %v103_v24  ;;  %v50_v49 = vld [vmem:[%s1402_s0 + $0x100] sm:$0xff]  ;;  %v27_v55 = vld [vmem:[%s1402_s0 + $0x48] sm:$0xff]  ;;  %v52_v56 = vld [vmem:[%s1402_s0 + $0x110] sm:$0xff] }
   0x8   :  { %v179_v25 = vmax.f32 %v130_v16, 0.0  ;;  %v180_v26 = vmax.f32 %v131_v17, 0.0  ;;  %v205_v29 = vmax.f32 %v156_v21, 0.0  ;;  %v206_v30 = vmax.f32 %v157_v22, 0.0  ;;  %v26_v51 = vld [vmem:[%s1402_s0 + $0x40] sm:$0xff]  ;;  %v53_v57 = vld [vmem:[%s1402_s0 + $0x118] sm:$0xff] }
   0x9   :  { %v158_v31 = vadd.f32 %v839_v8, %v102_v23  ;;  %v181_v39 = vmax.f32 %v132_v27, 0.0  ;;  %v182_v40 = vmax.f32 %v133_v28, 0.0  ;;  %v78_v41 = vmul.f32 %v829_v4, %v22_v33  ;;  %v28_v10 = vld [vmem:[%s1402_s0 + $0x50] sm:$0xff]  ;;  %v29_v14 = vld [vmem:[%s1402_s0 + $0x58] sm:$0xff]  ;;  %v54_v19 = vld [vmem:[%s1402_s0 + $0x120] sm:$0xff] }
   0xa   :  { %v228_v35 = vpack.c.bf16 %v180_v26, %v179_v25  ;;  %v241_v38 = vpack.c.bf16 %v206_v30, %v205_v29  ;;  %v208_v44 = vmax.f32 %v159_v32, 0.0  ;;  %v104_v45 = vmul.f32 %v829_v4, %v48_v36  ;;  %v55_v28 = vld [vmem:[%s1402_s0 + $0x128] sm:$0xff] }
   0xb   :  { %v207_v43 = vmax.f32 %v158_v31, 0.0  ;;  %v105_v46 = vmul.f32 %v829_v4, %v49_v37  ;;  %v229_v52 = vpack.c.bf16 %v182_v40, %v181_v39  ;;  %v134_v53 = vadd.f32 %v839_v8, %v78_v41  ;;  %v34_v41 = vld [vmem:[%s1402_s0 + $0x80] sm:$0xff] }
   0xc   :  { %683 = vmatmul.mubr.msk.bf16.vlgmr.msra.gmra.mrb[0].mxu0 %vm260_vm2, %v228_v35  ;;  %735 = vmatmul.mubr.msk.bf16.vlgmr.msra.gmra.mrb[0].mxu1 %vm260_vm2, %v241_v38  ;;  %v135_v54 = vadd.f32 %v839_v8, %v79_v42  ;;  %v160_v59 = vadd.f32 %v839_v8, %v104_v45  ;;  %v80_v61 = vmul.f32 %v829_v4, %v24_v47  ;;  %v30_v38 = vld [vmem:[%s1402_s0 + $0x60] sm:$0xff] }
   0xd   :  { %686 = vmatprep.mubr.msk.bf16.mxu0 %vm788_vm1, %v787_v0  ;;  %738 = vmatprep.mubr.msk.bf16.mxu1 %vm788_vm1, %v787_v0  ;;  %v242_v58 = vpack.c.bf16 %v208_v44, %v207_v43  ;;  %v161_v60 = vadd.f32 %v839_v8, %v105_v46  ;;  %v81_v62 = vmul.f32 %v829_v4, %v25_v48  ;;  %v183_v7 = vmax.f32 %v134_v53, 0.0  ;;  %v31_v43 = vld [vmem:[%s1402_s0 + $0x68] sm:$0xff]  ;;  %v60_v48 = vld [vmem:[%s1402_s0 + $0x150] sm:$0xff] }
   0xe   :  { %v106_v63 = vmul.f32 %v829_v4, %v50_v49  ;;  %v107_v1 = vmul.f32 %v829_v4, %v51_v50  ;;  %v82_v2 = vmul.f32 %v829_v4, %v26_v51  ;;  %v83_v3 = vmul.f32 %v829_v4, %v27_v55  ;;  %v35_v44 = vld [vmem:[%s1402_s0 + $0x88] sm:$0xff]  ;;  %v61_v49 = vld [vmem:[%s1402_s0 + $0x158] sm:$0xff]  ;;  %v56_v53 = vld [vmem:[%s1402_s0 + $0x130] sm:$0xff] }
   0xf   :  { %v108_v5 = vmul.f32 %v829_v4, %v52_v56  ;;  %v109_v6 = vmul.f32 %v829_v4, %v53_v57  ;;  %v184_v9 = vmax.f32 %v135_v54, 0.0  ;;  %v209_v11 = vmax.f32 %v160_v59, 0.0  ;;  %v57_v54 = vld [vmem:[%s1402_s0 + $0x138] sm:$0xff]  ;;  %v36_v56 = vld [vmem:[%s1402_s0 + $0x90] sm:$0xff] }
  0x10   :  { %v210_v12 = vmax.f32 %v161_v60, 0.0  ;;  %v136_v13 = vadd.f32 %v839_v8, %v80_v61  ;;  %v137_v15 = vadd.f32 %v839_v8, %v81_v62  ;;  %v162_v16 = vadd.f32 %v839_v8, %v106_v63  ;;  %v37_v61 = vld [vmem:[%s1402_s0 + $0x98] sm:$0xff] }
  0x11   :  { %v163_v17 = vadd.f32 %v839_v8, %v107_v1  ;;  %v138_v18 = vadd.f32 %v839_v8, %v82_v2  ;;  %v139_v20 = vadd.f32 %v839_v8, %v83_v3  ;;  %v164_v21 = vadd.f32 %v839_v8, %v108_v5  ;;  %v62_v3 = vld [vmem:[%s1402_s0 + $0x160] sm:$0xff] }
  0x12   :  { %v165_v22 = vadd.f32 %v839_v8, %v109_v6  ;;  %v84_v23 = vmul.f32 %v829_v4, %v28_v10  ;;  %v230_v24 = vpack.c.bf16 %v184_v9, %v183_v7  ;;  %v85_v25 = vmul.f32 %v829_v4, %v29_v14  ;;  %v63_v10 = vld [vmem:[%s1402_s0 + $0x168] sm:$0xff] }
  0x13   :  { %v243_v26 = vpack.c.bf16 %v210_v12, %v209_v11  ;;  %v185_v27 = vmax.f32 %v136_v13, 0.0  ;;  %v110_v29 = vmul.f32 %v829_v4, %v54_v19  ;;  %v186_v30 = vmax.f32 %v137_v15, 0.0  ;;  %v38_v15 = vld [vmem:[%s1402_s0 + $0xa0] sm:$0xff] }
  0x14   :  { %687 = vmatmul.mubr.msk.bf16.gmra.mrb[4].mxu0 %vm260_vm2, %v229_v52  ;;  %739 = vmatmul.mubr.msk.bf16.gmra.mrb[4].mxu1 %vm260_vm2, %v242_v58  ;;  %v211_v31 = vmax.f32 %v162_v16, 0.0  ;;  %v212_v32 = vmax.f32 %v163_v17, 0.0  ;;  %v187_v33 = vmax.f32 %v138_v18, 0.0  ;;  %v188_v34 = vmax.f32 %v139_v20, 0.0  ;;  %v39_v20 = vld [vmem:[%s1402_s0 + $0xa8] sm:$0xff] }
  0x15   :  { %690 = vmatprep.mubr.msk.bf16.mxu0 %vm788_vm1, %v787_v0  ;;  %742 = vmatprep.mubr.msk.bf16.mxu1 %vm788_vm1, %v787_v0  ;;  %v213_v35 = vmax.f32 %v164_v21, 0.0  ;;  %v214_v36 = vmax.f32 %v165_v22, 0.0  ;;  %v961_v37 = vadd.f32 %v839_v8, %v84_v23  ;;  %v968_v39 = vadd.f32 %v839_v8, %v85_v25  ;;  %v64_v25 = vld [vmem:[%s1402_s0 + $0x170] sm:$0xff] }
  0x16   :  { %v111_v40 = vmul.f32 %v829_v4, %v55_v28  ;;  %v978_v42 = vadd.f32 %v839_v8, %v110_v29  ;;  %v231_v45 = vpack.c.bf16 %v186_v30, %v185_v27  ;;  %v244_v46 = vpack.c.bf16 %v212_v32, %v211_v31  ;;  %v40_v31 = vld [vmem:[%s1402_s0 + $0xb0] sm:$0xff] }
  0x17   :  { %v989_v47 = vmul.f32 %v829_v4, %v30_v38  ;;  %v997_v50 = vpack.c.bf16 %v188_v34, %v187_v33  ;;  %v999_v51 = vpack.c.bf16 %v214_v36, %v213_v35  ;;  %v189_v52 = vmax.f32 %v961_v37, 0.0  ;;  %v41_v36 = vld [vmem:[%s1402_s0 + $0xb8] sm:$0xff]  ;;  %v32_v37 = vld [vmem:[%s1402_s0 + $0x70] sm:$0xff] }
  0x18   :  { %v90_v55 = vmul.f32 %v829_v4, %v34_v41  ;;  %v190_v57 = vmax.f32 %v968_v39, 0.0  ;;  %v1014_v58 = vadd.f32 %v839_v8, %v111_v40  ;;  %v1017_v59 = vmul.f32 %v829_v4, %v31_v43  ;;  %v33_v39 = vld [vmem:[%s1402_s0 + $0x78] sm:$0xff] }
  0x19   :  { %v91_v60 = vmul.f32 %v829_v4, %v35_v44  ;;  %v215_v62 = vmax.f32 %v978_v42, 0.0  ;;  %v116_v1 = vmul.f32 %v829_v4, %v60_v48  ;;  %v117_v2 = vmul.f32 %v829_v4, %v61_v49  ;;  %v66_v44 = vld [vmem:[%s1402_s0 + $0x180] sm:$0xff] }
  0x1a   :  { %v146_v63 = vadd.f32 %v839_v8, %v90_v55  ;;  %v1031_v5 = vmul.f32 %v829_v4, %v56_v53  ;;  %v1034_v6 = vmul.f32 %v829_v4, %v57_v54  ;;  %v92_v9 = vmul.f32 %v829_v4, %v36_v56  ;;  %v42_v53 = vld [vmem:[%s1402_s0 + $0xc0] sm:$0xff] }
  0x1b   :  { %v147_v7 = vadd.f32 %v839_v8, %v91_v60  ;;  %v172_v12 = vadd.f32 %v839_v8, %v116_v1  ;;  %v173_v13 = vadd.f32 %v839_v8, %v117_v2  ;;  %v93_v14 = vmul.f32 %v829_v4, %v37_v61  ;;  %v43_v61 = vld [vmem:[%s1402_s0 + $0xc8] sm:$0xff]  ;;  %v58_v42 = vld [vmem:[%s1402_s0 + $0x140] sm:$0xff] }
  0x1c   :  { %691 = vmatmul.mubr.msk.bf16.gmra.mrb[8].mxu0 %vm260_vm2, %v230_v24  ;;  %743 = vmatmul.mubr.msk.bf16.gmra.mrb[8].mxu1 %vm260_vm2, %v243_v26  ;;  %v195_v11 = vmax.f32 %v146_v63, 0.0  ;;  %v216_v16 = vmax.f32 %v1014_v58, 0.0  ;;  %v148_v18 = vadd.f32 %v839_v8, %v92_v9  ;;  %v118_v19 = vmul.f32 %v829_v4, %v62_v3  ;;  %v65_v26 = vld [vmem:[%s1402_s0 + $0x178] sm:$0xff] }
  0x1d   :  { %694 = vmatprep.mubr.msk.bf16.mxu0 %vm788_vm1, %v787_v0  ;;  %746 = vmatprep.mubr.msk.bf16.mxu1 %vm788_vm1, %v787_v0  ;;  %v196_v17 = vmax.f32 %v147_v7, 0.0  ;;  %v221_v21 = vmax.f32 %v172_v12, 0.0  ;;  %v222_v22 = vmax.f32 %v173_v13, 0.0  ;;  %v149_v23 = vadd.f32 %v839_v8, %v93_v14 }
  0x1e   :  { %v119_v24 = vmul.f32 %v829_v4, %v63_v10  ;;  %v197_v28 = vmax.f32 %v148_v18, 0.0  ;;  %v174_v29 = vadd.f32 %v839_v8, %v118_v19  ;;  %v94_v30 = vmul.f32 %v829_v4, %v38_v15 }
  0x1f   :  { %v1067_v27 = vpack.c.bf16 %v196_v17, %v195_v11  ;;  %v1074_v32 = vpack.c.bf16 %v222_v22, %v221_v21  ;;  %v198_v33 = vmax.f32 %v149_v23, 0.0  ;;  %v95_v35 = vmul.f32 %v829_v4, %v39_v20 }
  0x20   :  { %v175_v34 = vadd.f32 %v839_v8, %v119_v24  ;;  %v223_v38 = vmax.f32 %v174_v29, 0.0  ;;  %v150_v40 = vadd.f32 %v839_v8, %v94_v30  ;;  %v120_v41 = vmul.f32 %v829_v4, %v64_v25 }
  0x21   :  { %v121_v43 = vmul.f32 %v829_v4, %v65_v26  ;;  %v151_v48 = vadd.f32 %v839_v8, %v95_v35  ;;  %v96_v49 = vmul.f32 %v829_v4, %v40_v31  ;;  %v97_v60 = vmul.f32 %v829_v4, %v41_v36 }
  0x22   :  { %v199_v54 = vmax.f32 %v150_v40, 0.0  ;;  %v176_v55 = vadd.f32 %v839_v8, %v120_v41  ;;  %v122_v3 = vmul.f32 %v829_v4, %v66_v44  ;;  %v98_v11 = vmul.f32 %v829_v4, %v42_v53 }
  0x23   :  { %v177_v56 = vadd.f32 %v839_v8, %v121_v43  ;;  %v200_v1 = vmax.f32 %v151_v48, 0.0  ;;  %v152_v2 = vadd.f32 %v839_v8, %v96_v49  ;;  %v153_v10 = vadd.f32 %v839_v8, %v97_v60 }
  0x24   :  { %695 = vmatmul.mubr.msk.bf16.gmra.mrb[12].mxu0 %vm260_vm2, %v231_v45  ;;  %747 = vmatmul.mubr.msk.bf16.gmra.mrb[12].mxu1 %vm260_vm2, %v244_v46  ;;  %v1087_v45 = vpack.c.bf16 %v198_v33, %v197_v28  ;;  %v224_v46 = vmax.f32 %v175_v34, 0.0  ;;  %v225_v7 = vmax.f32 %v176_v55, 0.0  ;;  %v1115_v14 = vadd.f32 %v839_v8, %v122_v3 }
  0x25   :  { %698 = vmatprep.mubr.msk.bf16.mxu0 %vm788_vm1, %v787_v0  ;;  %750 = vmatprep.mubr.msk.bf16.mxu1 %vm788_vm1, %v787_v0  ;;  %v226_v9 = vmax.f32 %v177_v56, 0.0  ;;  %v1112_v12 = vpack.c.bf16 %v200_v1, %v199_v54  ;;  %v201_v13 = vmax.f32 %v152_v2, 0.0  ;;  %v202_v17 = vmax.f32 %v153_v10, 0.0 }
  0x26   :  { %v1100_v63 = vpack.c.bf16 %v224_v46, %v223_v38  ;;  %v154_v18 = vadd.f32 %v839_v8, %v98_v11  ;;  %v233_v20 = vpack.c.bf16 %v190_v57, %v189_v52  ;;  %v143_v21 = vadd.f32 %v839_v8, %v1017_v59  ;;  %v59_v57 = vld [vmem:[%s1402_s0 + $0x148] sm:$0xff] }
  0x27   :  { %v251_v15 = vpack.c.bf16 %v226_v9, %v225_v7  ;;  %v239_v22 = vpack.c.bf16 %v202_v17, %v201_v13  ;;  %v246_v24 = vpack.c.bf16 %v216_v16, %v215_v62  ;;  %v169_v25 = vadd.f32 %v839_v8, %v1034_v6 }
  0x28   :  { %v203_v23 = vmax.f32 %v154_v18, 0.0  ;;  %v192_v62 = vmax.f32 %v143_v21, 0.0  ;;  %v89_v6 = vmul.f32 %v829_v4, %v33_v39  ;;  %v114_v28 = vmul.f32 %v829_v4, %v58_v42 }
  0x29   :  { %v218_v26 = vmax.f32 %v169_v25, 0.0  ;;  %v115_v29 = vmul.f32 %v829_v4, %v59_v57 }
  0x2a   :  { %v145_v33 = vadd.f32 %v839_v8, %v89_v6  ;;  %v170_v35 = vadd.f32 %v839_v8, %v114_v28 }
  0x2b   :  { %v171_v36 = vadd.f32 %v839_v8, %v115_v29 }
  0x2c   :  { %699 = vmatmul.mubr.msk.bf16.gmra.mrb[16].mxu0 %vm260_vm2, %v997_v50  ;;  %751 = vmatmul.mubr.msk.bf16.gmra.mrb[16].mxu1 %vm260_vm2, %v999_v51  ;;  %v99_v50 = vmul.f32 %v829_v4, %v43_v61  ;;  %v142_v51 = vadd.f32 %v839_v8, %v989_v47  ;;  %v168_v47 = vadd.f32 %v839_v8, %v1031_v5  ;;  %v194_v40 = vmax.f32 %v145_v33, 0.0 }
  0x2d   :  { %702 = vmatprep.mubr.msk.bf16.mxu0 %vm788_vm1, %v787_v0  ;;  %754 = vmatprep.mubr.msk.bf16.mxu1 %vm788_vm1, %v787_v0  ;;  %v88_v5 = vmul.f32 %v829_v4, %v32_v37  ;;  %v219_v4 = vmax.f32 %v170_v35, 0.0  ;;  %v220_v41 = vmax.f32 %v171_v36, 0.0 }
  0x2e   :  { %v155_v19 = vadd.f32 %v839_v8, %v99_v50  ;;  %v191_v59 = vmax.f32 %v142_v51, 0.0  ;;  %v217_v16 = vmax.f32 %v168_v47, 0.0 }
  0x2f   :  { %v144_v31 = vadd.f32 %v839_v8, %v88_v5  ;;  %v248_v44 = vpack.c.bf16 %v220_v41, %v219_v4  ;;  %v227_v8 = vmax.f32 %v1115_v14, 0.0 }
  0x30   :  { %v204_v52 = vmax.f32 %v155_v19, 0.0  ;;  %v234_v30 = vpack.c.bf16 %v192_v62, %v191_v59  ;;  %v247_v34 = vpack.c.bf16 %v218_v26, %v217_v16 }
  0x31   :  { %v193_v38 = vmax.f32 %v144_v31, 0.0 }
  0x32   :  { %v240_v58 = vpack.c.bf16 %v204_v52, %v203_v23 }
  0x33   :  { %v235_v43 = vpack.c.bf16 %v194_v40, %v193_v38 }
  0x34   :  { %703 = vmatmul.mubr.msk.bf16.gmra.mrb[20].mxu0 %vm260_vm2, %v233_v20  ;;  %755 = vmatmul.mubr.msk.bf16.gmra.mrb[20].mxu1 %vm260_vm2, %v246_v24 }
  0x35   :  { %706 = vmatprep.mubr.msk.bf16.mxu0 %vm788_vm1, %v787_v0  ;;  %758 = vmatprep.mubr.msk.bf16.mxu1 %vm788_vm1, %v787_v0 }
  0x3c   :  { %707 = vmatmul.mubr.msk.bf16.gmra.mrb[24].mxu0 %vm260_vm2, %v234_v30  ;;  %759 = vmatmul.mubr.msk.bf16.gmra.mrb[24].mxu1 %vm260_vm2, %v247_v34 }
  0x3d   :  { %710 = vmatprep.mubr.msk.bf16.mxu0 %vm788_vm1, %v787_v0  ;;  %762 = vmatprep.mubr.msk.bf16.mxu1 %vm788_vm1, %v787_v0 }
  0x44   :  { %711 = vmatmul.mubr.msk.bf16.gmra.mrb[28].mxu0 %vm260_vm2, %v235_v43  ;;  %763 = vmatmul.mubr.msk.bf16.gmra.mrb[28].mxu1 %vm260_vm2, %v248_v44 }
  0x45   :  { %714 = vmatprep.mubr.msk.bf16.mxu0 %vm788_vm1, %v787_v0  ;;  %766 = vmatprep.mubr.msk.bf16.mxu1 %vm788_vm1, %v787_v0 }
  0x4c   :  { %715 = vmatmul.mubr.msk.bf16.gmra.mrb[32].mxu0 %vm260_vm2, %v1067_v27  ;;  %767 = vmatmul.mubr.msk.bf16.gmra.mrb[32].mxu1 %vm260_vm2, %v1074_v32  ;;  %v252_v27 = vpack.c.bf16 %v227_v8, %v227_v8 }
  0x4d   :  { %718 = vmatprep.mubr.msk.bf16.mxu0 %vm788_vm1, %v787_v0  ;;  %770 = vmatprep.mubr.msk.bf16.mxu1 %vm788_vm1, %v787_v0 }
  0x54   :  { %719 = vmatmul.mubr.msk.bf16.gmra.mrb[36].mxu0 %vm260_vm2, %v1087_v45  ;;  %771 = vmatmul.mubr.msk.bf16.gmra.mrb[36].mxu1 %vm260_vm2, %v1100_v63 }
  0x55   :  { %722 = vmatprep.mubr.msk.bf16.mxu0 %vm788_vm1, %v787_v0  ;;  %774 = vmatprep.mubr.msk.bf16.mxu1 %vm788_vm1, %v787_v0 }
  0x5c   :  { %723 = vmatmul.mubr.msk.bf16.gmra.mrb[40].mxu0 %vm260_vm2, %v1112_v12  ;;  %775 = vmatmul.mubr.msk.bf16.gmra.mrb[40].mxu1 %vm260_vm2, %v251_v15 }
  0x5d   :  { %726 = vmatprep.mubr.msk.bf16.mxu0 %vm788_vm1, %v787_v0  ;;  %778 = vmatprep.mubr.msk.bf16.mxu1 %vm788_vm1, %v787_v0 }
  0x64   :  { %727 = vmatmul.mubr.msk.bf16.gmra.mrb[44].mxu0 %vm260_vm2, %v239_v22  ;;  %779 = vmatmul.mubr.msk.bf16.gmra.mrb[44].mxu1 %vm260_vm2, %v252_v27 }
  0x65   :  { %730 = vmatprep.mubr.msk.bf16.mxu0 %vm788_vm1, %v787_v0 }
  0x6c   :  { %731 = vmatmul.mubr.msk.bf16.gmra.mrb[48].mxu0 %vm260_vm2, %v240_v58 }
  0xdf   :  { %v374_v32 = vpop.f32.mrb[0].mxu0  ;;  %v478_v46 = vpop.f32.mrb[0].mxu1 }
  0xe0   :  { %573 = vst.msk [vmem:[%s1405_s4] sm:$0xff] %vm572_vm3, %v374_v32  ;;  %v684_v45 = vpop.f32.mrb[1].mxu0  ;;  %599 = vst.msk [vmem:[%s1405_s4 + $0xd0] sm:$0xff] %vm572_vm3, %v478_v46  ;;  %v736_v49 = vpop.f32.mrb[1].mxu1 }
  0xe1   :  { %v377_v48 = vpop.f32.mrb[2].mxu0  ;;  %v481_v53 = vpop.f32.mrb[2].mxu1 }
  0xe2   :  { %574 = vst.msk [vmem:[%s1405_s4 + $0x8] sm:$0xff] %vm572_vm3, %v377_v48  ;;  %v685_v0 = vpop.f32.mrb[3].mxu0  ;;  %600 = vst.msk [vmem:[%s1405_s4 + $0xd8] sm:$0xff] %vm572_vm3, %v481_v53  ;;  %v737_v54 = vpop.f32.mrb[3].mxu1 }
  0xe7   :  { %v382_v55 = vpop.f32.mrb[4].mxu0  ;;  %v486_v60 = vpop.f32.mrb[4].mxu1 }
  0xe8   :  { %575 = vst.msk [vmem:[%s1405_s4 + $0x10] sm:$0xff] %vm572_vm3, %v382_v55  ;;  %v688_v56 = vpop.f32.mrb[5].mxu0  ;;  %601 = vst.msk [vmem:[%s1405_s4 + $0xe0] sm:$0xff] %vm572_vm3, %v486_v60  ;;  %v740_v63 = vpop.f32.mrb[5].mxu1 }
  0xe9   :  { %v385_v61 = vpop.f32.mrb[6].mxu0  ;;  %v489_v2 = vpop.f32.mrb[6].mxu1 }
  0xea   :  { %576 = vst.msk [vmem:[%s1405_s4 + $0x18] sm:$0xff] %vm572_vm3, %v385_v61  ;;  %v689_v1 = vpop.f32.mrb[7].mxu0  ;;  %602 = vst.msk [vmem:[%s1405_s4 + $0xe8] sm:$0xff] %vm572_vm3, %v489_v2  ;;  %v741_v3 = vpop.f32.mrb[7].mxu1 }
  0xef   :  { %v390_v7 = vpop.f32.mrb[8].mxu0  ;;  %v494_v10 = vpop.f32.mrb[8].mxu1 }
  0xf0   :  { %577 = vst.msk [vmem:[%s1405_s4 + $0x20] sm:$0xff] %vm572_vm3, %v390_v7  ;;  %v692_v9 = vpop.f32.mrb[9].mxu0  ;;  %603 = vst.msk [vmem:[%s1405_s4 + $0xf0] sm:$0xff] %vm572_vm3, %v494_v10  ;;  %v744_v12 = vpop.f32.mrb[9].mxu1 }
  0xf1   :  { %v393_v11 = vpop.f32.mrb[10].mxu0  ;;  %v497_v14 = vpop.f32.mrb[10].mxu1 }
  0xf2   :  { %578 = vst.msk [vmem:[%s1405_s4 + $0x28] sm:$0xff] %vm572_vm3, %v393_v11  ;;  %v693_v13 = vpop.f32.mrb[11].mxu0  ;;  %604 = vst.msk [vmem:[%s1405_s4 + $0xf8] sm:$0xff] %vm572_vm3, %v497_v14  ;;  %v745_v50 = vpop.f32.mrb[11].mxu1 }
  0xf7   :  { %v398_v15 = vpop.f32.mrb[12].mxu0  ;;  %v502_v18 = vpop.f32.mrb[12].mxu1 }
  0xf8   :  { %579 = vst.msk [vmem:[%s1405_s4 + $0x30] sm:$0xff] %vm572_vm3, %v398_v15  ;;  %v696_v17 = vpop.f32.mrb[13].mxu0  ;;  %605 = vst.msk [vmem:[%s1405_s4 + $0x100] sm:$0xff] %vm572_vm3, %v502_v18  ;;  %v748_v19 = vpop.f32.mrb[13].mxu1 }
  0xf9   :  { %v401_v51 = vpop.f32.mrb[14].mxu0  ;;  %v505_v21 = vpop.f32.mrb[14].mxu1 }
  0xfa   :  { %580 = vst.msk [vmem:[%s1405_s4 + $0x38] sm:$0xff] %vm572_vm3, %v401_v51  ;;  %v697_v20 = vpop.f32.mrb[15].mxu0  ;;  %606 = vst.msk [vmem:[%s1405_s4 + $0x108] sm:$0xff] %vm572_vm3, %v505_v21  ;;  %v749_v22 = vpop.f32.mrb[15].mxu1 }
  0xff   :  { %v406_v23 = vpop.f32.mrb[16].mxu0  ;;  %v510_v47 = vpop.f32.mrb[16].mxu1 }
 0x100   :  { %581 = vst.msk [vmem:[%s1405_s4 + $0x40] sm:$0xff] %vm572_vm3, %v406_v23  ;;  %v700_v24 = vpop.f32.mrb[17].mxu0  ;;  %607 = vst.msk [vmem:[%s1405_s4 + $0x110] sm:$0xff] %vm572_vm3, %v510_v47  ;;  %v752_v37 = vpop.f32.mrb[17].mxu1 }
 0x101   :  { %v409_v25 = vpop.f32.mrb[18].mxu0  ;;  %v513_v52 = vpop.f32.mrb[18].mxu1 }
 0x102   :  { %582 = vst.msk [vmem:[%s1405_s4 + $0x48] sm:$0xff] %vm572_vm3, %v409_v25  ;;  %v701_v39 = vpop.f32.mrb[19].mxu0  ;;  %608 = vst.msk [vmem:[%s1405_s4 + $0x118] sm:$0xff] %vm572_vm3, %v513_v52  ;;  %v753_v42 = vpop.f32.mrb[19].mxu1 }
 0x107   :  { %v414_v57 = vpop.f32.mrb[20].mxu0  ;;  %v518_v59 = vpop.f32.mrb[20].mxu1 }
 0x108   :  { %583 = vst.msk [vmem:[%s1405_s4 + $0x50] sm:$0xff] %vm572_vm3, %v414_v57  ;;  %v704_v58 = vpop.f32.mrb[21].mxu0  ;;  %609 = vst.msk [vmem:[%s1405_s4 + $0x120] sm:$0xff] %vm572_vm3, %v518_v59  ;;  %v756_v5 = vpop.f32.mrb[21].mxu1 }
 0x109   :  { %v417_v62 = vpop.f32.mrb[22].mxu0  ;;  %v521_v16 = vpop.f32.mrb[22].mxu1 }
 0x10a   :  { %584 = vst.msk [vmem:[%s1405_s4 + $0x58] sm:$0xff] %vm572_vm3, %v417_v62  ;;  %v705_v6 = vpop.f32.mrb[23].mxu0  ;;  %610 = vst.msk [vmem:[%s1405_s4 + $0x128] sm:$0xff] %vm572_vm3, %v521_v16  ;;  %v757_v26 = vpop.f32.mrb[23].mxu1 }
 0x10f   :  { %v422_v28 = vpop.f32.mrb[24].mxu0  ;;  %v526_v30 = vpop.f32.mrb[24].mxu1 }
 0x110   :  { %585 = vst.msk [vmem:[%s1405_s4 + $0x60] sm:$0xff] %vm572_vm3, %v422_v28  ;;  %v708_v29 = vpop.f32.mrb[25].mxu0  ;;  %611 = vst.msk [vmem:[%s1405_s4 + $0x130] sm:$0xff] %vm572_vm3, %v526_v30  ;;  %v760_v33 = vpop.f32.mrb[25].mxu1 }
 0x111   :  { %v425_v31 = vpop.f32.mrb[26].mxu0  ;;  %v529_v35 = vpop.f32.mrb[26].mxu1 }
 0x112   :  { %586 = vst.msk [vmem:[%s1405_s4 + $0x68] sm:$0xff] %vm572_vm3, %v425_v31  ;;  %v709_v34 = vpop.f32.mrb[27].mxu0  ;;  %612 = vst.msk [vmem:[%s1405_s4 + $0x138] sm:$0xff] %vm572_vm3, %v529_v35  ;;  %v761_v36 = vpop.f32.mrb[27].mxu1 }
 0x117   :  { %v430_v38 = vpop.f32.mrb[28].mxu0  ;;  %v534_v4 = vpop.f32.mrb[28].mxu1 }
 0x118   :  { %587 = vst.msk [vmem:[%s1405_s4 + $0x70] sm:$0xff] %vm572_vm3, %v430_v38  ;;  %v712_v40 = vpop.f32.mrb[29].mxu0  ;;  %613 = vst.msk [vmem:[%s1405_s4 + $0x140] sm:$0xff] %vm572_vm3, %v534_v4  ;;  %v764_v43 = vpop.f32.mrb[29].mxu1 }
 0x119   :  { %v433_v41 = vpop.f32.mrb[30].mxu0  ;;  %v537_v8 = vpop.f32.mrb[30].mxu1 }
 0x11a   :  { %588 = vst.msk [vmem:[%s1405_s4 + $0x78] sm:$0xff] %vm572_vm3, %v433_v41  ;;  %v713_v44 = vpop.f32.mrb[31].mxu0  ;;  %614 = vst.msk [vmem:[%s1405_s4 + $0x148] sm:$0xff] %vm572_vm3, %v537_v8  ;;  %v765_v27 = vpop.f32.mrb[31].mxu1 }
 0x11f   :  { %v438_v32 = vpop.f32.mrb[32].mxu0  ;;  %v542_v46 = vpop.f32.mrb[32].mxu1 }
 0x120   :  { %589 = vst.msk [vmem:[%s1405_s4 + $0x80] sm:$0xff] %vm572_vm3, %v438_v32  ;;  %v716_v45 = vpop.f32.mrb[33].mxu0  ;;  %615 = vst.msk [vmem:[%s1405_s4 + $0x150] sm:$0xff] %vm572_vm3, %v542_v46  ;;  %v768_v49 = vpop.f32.mrb[33].mxu1 }
 0x121   :  { %v441_v48 = vpop.f32.mrb[34].mxu0  ;;  %v545_v53 = vpop.f32.mrb[34].mxu1 }
 0x122   :  { %590 = vst.msk [vmem:[%s1405_s4 + $0x88] sm:$0xff] %vm572_vm3, %v441_v48  ;;  %v717_v0 = vpop.f32.mrb[35].mxu0  ;;  %616 = vst.msk [vmem:[%s1405_s4 + $0x158] sm:$0xff] %vm572_vm3, %v545_v53  ;;  %v769_v54 = vpop.f32.mrb[35].mxu1 }
 0x127   :  { %v446_v55 = vpop.f32.mrb[36].mxu0  ;;  %v550_v60 = vpop.f32.mrb[36].mxu1 }
 0x128   :  { %591 = vst.msk [vmem:[%s1405_s4 + $0x90] sm:$0xff] %vm572_vm3, %v446_v55  ;;  %v720_v56 = vpop.f32.mrb[37].mxu0  ;;  %617 = vst.msk [vmem:[%s1405_s4 + $0x160] sm:$0xff] %vm572_vm3, %v550_v60  ;;  %v772_v63 = vpop.f32.mrb[37].mxu1 }
 0x129   :  { %v449_v61 = vpop.f32.mrb[38].mxu0  ;;  %v553_v2 = vpop.f32.mrb[38].mxu1 }
 0x12a   :  { %592 = vst.msk [vmem:[%s1405_s4 + $0x98] sm:$0xff] %vm572_vm3, %v449_v61  ;;  %v721_v1 = vpop.f32.mrb[39].mxu0  ;;  %618 = vst.msk [vmem:[%s1405_s4 + $0x168] sm:$0xff] %vm572_vm3, %v553_v2  ;;  %v773_v3 = vpop.f32.mrb[39].mxu1 }
 0x12f   :  { %v454_v7 = vpop.f32.mrb[40].mxu0  ;;  %v558_v10 = vpop.f32.mrb[40].mxu1 }
 0x130   :  { %593 = vst.msk [vmem:[%s1405_s4 + $0xa0] sm:$0xff] %vm572_vm3, %v454_v7  ;;  %v724_v9 = vpop.f32.mrb[41].mxu0  ;;  %619 = vst.msk [vmem:[%s1405_s4 + $0x170] sm:$0xff] %vm572_vm3, %v558_v10  ;;  %v776_v12 = vpop.f32.mrb[41].mxu1 }
 0x131   :  { %v457_v11 = vpop.f32.mrb[42].mxu0  ;;  %v561_v14 = vpop.f32.mrb[42].mxu1 }
 0x132   :  { %594 = vst.msk [vmem:[%s1405_s4 + $0xa8] sm:$0xff] %vm572_vm3, %v457_v11  ;;  %v725_v13 = vpop.f32.mrb[43].mxu0  ;;  %620 = vst.msk [vmem:[%s1405_s4 + $0x178] sm:$0xff] %vm572_vm3, %v561_v14  ;;  %v777_v50 = vpop.f32.mrb[43].mxu1 }
 0x137   :  { %v462_v15 = vpop.f32.mrb[44].mxu0  ;;  %v566_v18 = vpop.f32.mrb[44].mxu1 }
 0x138   :  { %595 = vst.msk [vmem:[%s1405_s4 + $0xb0] sm:$0xff] %vm572_vm3, %v462_v15  ;;  %v728_v17 = vpop.f32.mrb[45].mxu0  ;;  %621 = vst.msk [vmem:[%s1405_s4 + $0x180] sm:$0xff] %vm572_vm3, %v566_v18  ;;  %v780_v19 = vpop.f32.mrb[45].mxu1 }
 0x139   :  { %v465_v51 = vpop.f32.mrb[46].mxu0  ;;  %v569_v21 = vpop.f32.mrb[46].mxu1 }
 0x13a   :  { %596 = vst.msk [vmem:[%s1405_s4 + $0xb8] sm:$0xff] %vm572_vm3, %v465_v51  ;;  %v729_v20 = vpop.f32.mrb[47].mxu0  ;;  %v781_v22 = vpop.f32.mrb[47].mxu1 }
 0x13f   :  { %v470_v23 = vpop.f32.mrb[48].mxu0 }
 0x140   :  { %597 = vst.msk [vmem:[%s1405_s4 + $0xc0] sm:$0xff] %vm572_vm3, %v470_v23  ;;  %v732_v24 = vpop.f32.mrb[49].mxu0 }
 0x141   :  { %v473_v47 = vpop.f32.mrb[50].mxu0 }
 0x142   :  { %598 = vst.msk [vmem:[%s1405_s4 + $0xc8] sm:$0xff] %vm572_vm3, %v473_v47  ;;  %v733_v25 = vpop.f32.mrb[51].mxu0 }

// kernel: sparsenet_forward.34
= control target key start
LH: loop header
LB: loop body
LE: loop exit
PB: predicated region body
PF: predicated region fallthrough
CT: control target
= control target key end

     0   :  { %v784_v0 = vmov 0.0   ;;  %vm785_vm0 = vmmov 0   ;;  %vm261_vm1 = vcmask 130048   ;;  %vm569_vm2 = vcmask 64512   ;;  %s1398_s3 = inlined_call_operand.vmem [shape: bf16[16,8], index: 3, kind: input, shape index: {}]   ;;  %s1399_s0 = inlined_call_operand.vmem [shape: f32[392,16], index: 0, kind: input, shape index: {}]   ;;  %s1400_s1 = inlined_call_operand.vmem [shape: f32[1,16], index: 1, kind: input, shape index: {}]   ;;  %s1401_s2 = inlined_call_operand.vmem [shape: f32[1,16], index: 2, kind: input, shape index: {}]   ;;  %s1402_s4 = inlined_call_operand.vmem [shape: f32[392,8], index: 4, kind: output, shape index: {}]  }
   0x1   :  { %677 = vmatprep.subr.bf16.mxu0 %v784_v0  ;;  %v783_v1 = vld [vmem:[%s1398_s3] sm:$0xff]   ;;  %679 = vmatprep.mubr.msk.bf16.mxu0 %vm785_vm0, %v784_v0  ;;  %v19_v3 = vld [vmem:[%s1399_s0 + $0x8] sm:$0xff]  ;;  %v44_v8 = vld [vmem:[%s1399_s0 + $0xd0] sm:$0xff] }
   0x2   :  { %v18_v2 = vld [vmem:[%s1399_s0] sm:$0xff]  ;;  %779 = vmatprep.subr.bf16.mxu1 %v784_v0  ;;  %731 = vmatprep.mubr.msk.bf16.mxu1 %vm785_vm0, %v784_v0  ;;  %v45_v9 = vld [vmem:[%s1399_s0 + $0xd8] sm:$0xff]  ;;  %v20_v12 = vld [vmem:[%s1399_s0 + $0x10] sm:$0xff] }
   0x3   :  { %v826_v4 = vld [vmem:[%s1400_s1] ss:$0 sm:$0xff]  ;;  %678 = vmatpush3.bf16.msra.mxu0 %v783_v1  ;;  %780 = vmatpush3.bf16.msra.mxu1 %v783_v1  ;;  %v21_v13 = vld [vmem:[%s1399_s0 + $0x18] sm:$0xff]  ;;  %v47_v19 = vld [vmem:[%s1399_s0 + $0xe8] sm:$0xff] }
   0x4   :  { %v74_v5 = vmul.f32 %v826_v4, %v18_v2  ;;  %v75_v6 = vmul.f32 %v826_v4, %v19_v3  ;;  %v836_v7 = vld [vmem:[%s1401_s2] ss:$0 sm:$0xff]  ;;  %v100_v10 = vmul.f32 %v826_v4, %v44_v8  ;;  %v101_v11 = vmul.f32 %v826_v4, %v45_v9  ;;  %v23_v33 = vld [vmem:[%s1399_s0 + $0x28] sm:$0xff]  ;;  %v48_v35 = vld [vmem:[%s1399_s0 + $0xf0] sm:$0xff] }
   0x5   :  { %v46_v14 = vld [vmem:[%s1399_s0 + $0xe0] sm:$0xff]  ;;  %v76_v17 = vmul.f32 %v826_v4, %v20_v12  ;;  %v77_v18 = vmul.f32 %v826_v4, %v21_v13  ;;  %v103_v23 = vmul.f32 %v826_v4, %v47_v19  ;;  %v49_v36 = vld [vmem:[%s1399_s0 + $0xf8] sm:$0xff]  ;;  %v79_v41 = vmul.f32 %v826_v4, %v23_v33  ;;  %v24_v46 = vld [vmem:[%s1399_s0 + $0x30] sm:$0xff] }
   0x6   :  { %v130_v15 = vadd.f32 %v836_v7, %v74_v5  ;;  %v131_v16 = vadd.f32 %v836_v7, %v75_v6  ;;  %v156_v20 = vadd.f32 %v836_v7, %v100_v10  ;;  %v157_v21 = vadd.f32 %v836_v7, %v101_v11  ;;  %v22_v32 = vld [vmem:[%s1399_s0 + $0x20] sm:$0xff]  ;;  %v25_v47 = vld [vmem:[%s1399_s0 + $0x38] sm:$0xff]  ;;  %v51_v49 = vld [vmem:[%s1399_s0 + $0x108] sm:$0xff] }
   0x7   :  { %v102_v22 = vmul.f32 %v826_v4, %v46_v14  ;;  %v132_v26 = vadd.f32 %v836_v7, %v76_v17  ;;  %v133_v27 = vadd.f32 %v836_v7, %v77_v18  ;;  %v159_v31 = vadd.f32 %v836_v7, %v103_v23  ;;  %v50_v48 = vld [vmem:[%s1399_s0 + $0x100] sm:$0xff]  ;;  %v27_v54 = vld [vmem:[%s1399_s0 + $0x48] sm:$0xff]  ;;  %v52_v55 = vld [vmem:[%s1399_s0 + $0x110] sm:$0xff] }
   0x8   :  { %v179_v24 = vmax.f32 %v130_v15, 0.0  ;;  %v180_v25 = vmax.f32 %v131_v16, 0.0  ;;  %v205_v28 = vmax.f32 %v156_v20, 0.0  ;;  %v206_v29 = vmax.f32 %v157_v21, 0.0  ;;  %v26_v50 = vld [vmem:[%s1399_s0 + $0x40] sm:$0xff]  ;;  %v53_v56 = vld [vmem:[%s1399_s0 + $0x118] sm:$0xff] }
   0x9   :  { %v158_v30 = vadd.f32 %v836_v7, %v102_v22  ;;  %v181_v38 = vmax.f32 %v132_v26, 0.0  ;;  %v182_v39 = vmax.f32 %v133_v27, 0.0  ;;  %v78_v40 = vmul.f32 %v826_v4, %v22_v32  ;;  %v28_v9 = vld [vmem:[%s1399_s0 + $0x50] sm:$0xff]  ;;  %v29_v13 = vld [vmem:[%s1399_s0 + $0x58] sm:$0xff]  ;;  %v54_v18 = vld [vmem:[%s1399_s0 + $0x120] sm:$0xff] }
   0xa   :  { %v228_v34 = vpack.c.bf16 %v180_v25, %v179_v24  ;;  %v241_v37 = vpack.c.bf16 %v206_v29, %v205_v28  ;;  %v208_v43 = vmax.f32 %v159_v31, 0.0  ;;  %v104_v44 = vmul.f32 %v826_v4, %v48_v35  ;;  %v55_v27 = vld [vmem:[%s1399_s0 + $0x128] sm:$0xff] }
   0xb   :  { %v207_v42 = vmax.f32 %v158_v30, 0.0  ;;  %v105_v45 = vmul.f32 %v826_v4, %v49_v36  ;;  %v229_v51 = vpack.c.bf16 %v182_v39, %v181_v38  ;;  %v134_v52 = vadd.f32 %v836_v7, %v78_v40  ;;  %v34_v40 = vld [vmem:[%s1399_s0 + $0x80] sm:$0xff] }
   0xc   :  { %680 = vmatmul.mubr.msk.bf16.vlgmr.msra.gmra.mrb[0].mxu0 %vm261_vm1, %v228_v34  ;;  %732 = vmatmul.mubr.msk.bf16.vlgmr.msra.gmra.mrb[0].mxu1 %vm261_vm1, %v241_v37  ;;  %v135_v53 = vadd.f32 %v836_v7, %v79_v41  ;;  %v160_v58 = vadd.f32 %v836_v7, %v104_v44  ;;  %v80_v60 = vmul.f32 %v826_v4, %v24_v46  ;;  %v30_v37 = vld [vmem:[%s1399_s0 + $0x60] sm:$0xff] }
   0xd   :  { %683 = vmatprep.mubr.msk.bf16.mxu0 %vm785_vm0, %v784_v0  ;;  %735 = vmatprep.mubr.msk.bf16.mxu1 %vm785_vm0, %v784_v0  ;;  %v242_v57 = vpack.c.bf16 %v208_v43, %v207_v42  ;;  %v161_v59 = vadd.f32 %v836_v7, %v105_v45  ;;  %v81_v61 = vmul.f32 %v826_v4, %v25_v47  ;;  %v183_v6 = vmax.f32 %v134_v52, 0.0  ;;  %v31_v42 = vld [vmem:[%s1399_s0 + $0x68] sm:$0xff]  ;;  %v60_v47 = vld [vmem:[%s1399_s0 + $0x150] sm:$0xff] }
   0xe   :  { %v106_v62 = vmul.f32 %v826_v4, %v50_v48  ;;  %v107_v63 = vmul.f32 %v826_v4, %v51_v49  ;;  %v82_v1 = vmul.f32 %v826_v4, %v26_v50  ;;  %v83_v2 = vmul.f32 %v826_v4, %v27_v54  ;;  %v35_v43 = vld [vmem:[%s1399_s0 + $0x88] sm:$0xff]  ;;  %v61_v48 = vld [vmem:[%s1399_s0 + $0x158] sm:$0xff]  ;;  %v56_v52 = vld [vmem:[%s1399_s0 + $0x130] sm:$0xff] }
   0xf   :  { %v108_v3 = vmul.f32 %v826_v4, %v52_v55  ;;  %v109_v5 = vmul.f32 %v826_v4, %v53_v56  ;;  %v184_v8 = vmax.f32 %v135_v53, 0.0  ;;  %v209_v10 = vmax.f32 %v160_v58, 0.0  ;;  %v57_v53 = vld [vmem:[%s1399_s0 + $0x138] sm:$0xff]  ;;  %v36_v55 = vld [vmem:[%s1399_s0 + $0x90] sm:$0xff] }
  0x10   :  { %v210_v11 = vmax.f32 %v161_v59, 0.0  ;;  %v136_v12 = vadd.f32 %v836_v7, %v80_v60  ;;  %v137_v14 = vadd.f32 %v836_v7, %v81_v61  ;;  %v162_v15 = vadd.f32 %v836_v7, %v106_v62  ;;  %v37_v60 = vld [vmem:[%s1399_s0 + $0x98] sm:$0xff] }
  0x11   :  { %v163_v16 = vadd.f32 %v836_v7, %v107_v63  ;;  %v138_v17 = vadd.f32 %v836_v7, %v82_v1  ;;  %v139_v19 = vadd.f32 %v836_v7, %v83_v2  ;;  %v164_v20 = vadd.f32 %v836_v7, %v108_v3  ;;  %v62_v2 = vld [vmem:[%s1399_s0 + $0x160] sm:$0xff] }
  0x12   :  { %v165_v21 = vadd.f32 %v836_v7, %v109_v5  ;;  %v84_v22 = vmul.f32 %v826_v4, %v28_v9  ;;  %v230_v23 = vpack.c.bf16 %v184_v8, %v183_v6  ;;  %v85_v24 = vmul.f32 %v826_v4, %v29_v13  ;;  %v63_v9 = vld [vmem:[%s1399_s0 + $0x168] sm:$0xff] }
  0x13   :  { %v243_v25 = vpack.c.bf16 %v210_v11, %v209_v10  ;;  %v185_v26 = vmax.f32 %v136_v12, 0.0  ;;  %v110_v28 = vmul.f32 %v826_v4, %v54_v18  ;;  %v186_v29 = vmax.f32 %v137_v14, 0.0  ;;  %v38_v14 = vld [vmem:[%s1399_s0 + $0xa0] sm:$0xff] }
  0x14   :  { %684 = vmatmul.mubr.msk.bf16.gmra.mrb[4].mxu0 %vm261_vm1, %v229_v51  ;;  %736 = vmatmul.mubr.msk.bf16.gmra.mrb[4].mxu1 %vm261_vm1, %v242_v57  ;;  %v211_v30 = vmax.f32 %v162_v15, 0.0  ;;  %v212_v31 = vmax.f32 %v163_v16, 0.0  ;;  %v187_v32 = vmax.f32 %v138_v17, 0.0  ;;  %v188_v33 = vmax.f32 %v139_v19, 0.0  ;;  %v39_v19 = vld [vmem:[%s1399_s0 + $0xa8] sm:$0xff] }
  0x15   :  { %687 = vmatprep.mubr.msk.bf16.mxu0 %vm785_vm0, %v784_v0  ;;  %739 = vmatprep.mubr.msk.bf16.mxu1 %vm785_vm0, %v784_v0  ;;  %v213_v34 = vmax.f32 %v164_v20, 0.0  ;;  %v214_v35 = vmax.f32 %v165_v21, 0.0  ;;  %v958_v36 = vadd.f32 %v836_v7, %v84_v22  ;;  %v965_v38 = vadd.f32 %v836_v7, %v85_v24  ;;  %v64_v24 = vld [vmem:[%s1399_s0 + $0x170] sm:$0xff] }
  0x16   :  { %v111_v39 = vmul.f32 %v826_v4, %v55_v27  ;;  %v975_v41 = vadd.f32 %v836_v7, %v110_v28  ;;  %v231_v44 = vpack.c.bf16 %v186_v29, %v185_v26  ;;  %v244_v45 = vpack.c.bf16 %v212_v31, %v211_v30  ;;  %v40_v30 = vld [vmem:[%s1399_s0 + $0xb0] sm:$0xff] }
  0x17   :  { %v986_v46 = vmul.f32 %v826_v4, %v30_v37  ;;  %v994_v49 = vpack.c.bf16 %v188_v33, %v187_v32  ;;  %v996_v50 = vpack.c.bf16 %v214_v35, %v213_v34  ;;  %v189_v51 = vmax.f32 %v958_v36, 0.0  ;;  %v41_v35 = vld [vmem:[%s1399_s0 + $0xb8] sm:$0xff]  ;;  %v32_v36 = vld [vmem:[%s1399_s0 + $0x70] sm:$0xff] }
  0x18   :  { %v90_v54 = vmul.f32 %v826_v4, %v34_v40  ;;  %v190_v56 = vmax.f32 %v965_v38, 0.0  ;;  %v1011_v57 = vadd.f32 %v836_v7, %v111_v39  ;;  %v1014_v58 = vmul.f32 %v826_v4, %v31_v42  ;;  %v33_v38 = vld [vmem:[%s1399_s0 + $0x78] sm:$0xff] }
  0x19   :  { %v91_v59 = vmul.f32 %v826_v4, %v35_v43  ;;  %v215_v61 = vmax.f32 %v975_v41, 0.0  ;;  %v116_v63 = vmul.f32 %v826_v4, %v60_v47  ;;  %v117_v1 = vmul.f32 %v826_v4, %v61_v48  ;;  %v66_v43 = vld [vmem:[%s1399_s0 + $0x180] sm:$0xff] }
  0x1a   :  { %v146_v62 = vadd.f32 %v836_v7, %v90_v54  ;;  %v1028_v3 = vmul.f32 %v826_v4, %v56_v52  ;;  %v1031_v5 = vmul.f32 %v826_v4, %v57_v53  ;;  %v92_v8 = vmul.f32 %v826_v4, %v36_v55  ;;  %v42_v52 = vld [vmem:[%s1399_s0 + $0xc0] sm:$0xff] }
  0x1b   :  { %v147_v6 = vadd.f32 %v836_v7, %v91_v59  ;;  %v172_v11 = vadd.f32 %v836_v7, %v116_v63  ;;  %v173_v12 = vadd.f32 %v836_v7, %v117_v1  ;;  %v93_v13 = vmul.f32 %v826_v4, %v37_v60  ;;  %v43_v60 = vld [vmem:[%s1399_s0 + $0xc8] sm:$0xff]  ;;  %v58_v41 = vld [vmem:[%s1399_s0 + $0x140] sm:$0xff] }
  0x1c   :  { %688 = vmatmul.mubr.msk.bf16.gmra.mrb[8].mxu0 %vm261_vm1, %v230_v23  ;;  %740 = vmatmul.mubr.msk.bf16.gmra.mrb[8].mxu1 %vm261_vm1, %v243_v25  ;;  %v195_v10 = vmax.f32 %v146_v62, 0.0  ;;  %v216_v15 = vmax.f32 %v1011_v57, 0.0  ;;  %v148_v17 = vadd.f32 %v836_v7, %v92_v8  ;;  %v118_v18 = vmul.f32 %v826_v4, %v62_v2  ;;  %v65_v25 = vld [vmem:[%s1399_s0 + $0x178] sm:$0xff] }
  0x1d   :  { %691 = vmatprep.mubr.msk.bf16.mxu0 %vm785_vm0, %v784_v0  ;;  %743 = vmatprep.mubr.msk.bf16.mxu1 %vm785_vm0, %v784_v0  ;;  %v196_v16 = vmax.f32 %v147_v6, 0.0  ;;  %v221_v20 = vmax.f32 %v172_v11, 0.0  ;;  %v222_v21 = vmax.f32 %v173_v12, 0.0  ;;  %v149_v22 = vadd.f32 %v836_v7, %v93_v13 }
  0x1e   :  { %v119_v23 = vmul.f32 %v826_v4, %v63_v9  ;;  %v197_v27 = vmax.f32 %v148_v17, 0.0  ;;  %v174_v28 = vadd.f32 %v836_v7, %v118_v18  ;;  %v94_v29 = vmul.f32 %v826_v4, %v38_v14 }
  0x1f   :  { %v1064_v26 = vpack.c.bf16 %v196_v16, %v195_v10  ;;  %v1071_v31 = vpack.c.bf16 %v222_v21, %v221_v20  ;;  %v198_v32 = vmax.f32 %v149_v22, 0.0  ;;  %v95_v34 = vmul.f32 %v826_v4, %v39_v19 }
  0x20   :  { %v175_v33 = vadd.f32 %v836_v7, %v119_v23  ;;  %v223_v37 = vmax.f32 %v174_v28, 0.0  ;;  %v150_v39 = vadd.f32 %v836_v7, %v94_v29  ;;  %v120_v40 = vmul.f32 %v826_v4, %v64_v24 }
  0x21   :  { %v121_v42 = vmul.f32 %v826_v4, %v65_v25  ;;  %v151_v47 = vadd.f32 %v836_v7, %v95_v34  ;;  %v96_v48 = vmul.f32 %v826_v4, %v40_v30  ;;  %v97_v59 = vmul.f32 %v826_v4, %v41_v35 }
  0x22   :  { %v199_v53 = vmax.f32 %v150_v39, 0.0  ;;  %v176_v54 = vadd.f32 %v836_v7, %v120_v40  ;;  %v122_v2 = vmul.f32 %v826_v4, %v66_v43  ;;  %v98_v10 = vmul.f32 %v826_v4, %v42_v52 }
  0x23   :  { %v177_v55 = vadd.f32 %v836_v7, %v121_v42  ;;  %v200_v63 = vmax.f32 %v151_v47, 0.0  ;;  %v152_v1 = vadd.f32 %v836_v7, %v96_v48  ;;  %v153_v9 = vadd.f32 %v836_v7, %v97_v59 }
  0x24   :  { %692 = vmatmul.mubr.msk.bf16.gmra.mrb[12].mxu0 %vm261_vm1, %v231_v44  ;;  %744 = vmatmul.mubr.msk.bf16.gmra.mrb[12].mxu1 %vm261_vm1, %v244_v45  ;;  %v1084_v44 = vpack.c.bf16 %v198_v32, %v197_v27  ;;  %v224_v45 = vmax.f32 %v175_v33, 0.0  ;;  %v225_v6 = vmax.f32 %v176_v54, 0.0  ;;  %v1112_v13 = vadd.f32 %v836_v7, %v122_v2 }
  0x25   :  { %695 = vmatprep.mubr.msk.bf16.mxu0 %vm785_vm0, %v784_v0  ;;  %747 = vmatprep.mubr.msk.bf16.mxu1 %vm785_vm0, %v784_v0  ;;  %v226_v8 = vmax.f32 %v177_v55, 0.0  ;;  %v1109_v11 = vpack.c.bf16 %v200_v63, %v199_v53  ;;  %v201_v12 = vmax.f32 %v152_v1, 0.0  ;;  %v202_v16 = vmax.f32 %v153_v9, 0.0 }
  0x26   :  { %v1097_v62 = vpack.c.bf16 %v224_v45, %v223_v37  ;;  %v154_v17 = vadd.f32 %v836_v7, %v98_v10  ;;  %v233_v19 = vpack.c.bf16 %v190_v56, %v189_v51  ;;  %v143_v20 = vadd.f32 %v836_v7, %v1014_v58  ;;  %v59_v56 = vld [vmem:[%s1399_s0 + $0x148] sm:$0xff] }
  0x27   :  { %v251_v14 = vpack.c.bf16 %v226_v8, %v225_v6  ;;  %v239_v21 = vpack.c.bf16 %v202_v16, %v201_v12  ;;  %v246_v23 = vpack.c.bf16 %v216_v15, %v215_v61  ;;  %v169_v24 = vadd.f32 %v836_v7, %v1031_v5 }
  0x28   :  { %v203_v22 = vmax.f32 %v154_v17, 0.0  ;;  %v192_v61 = vmax.f32 %v143_v20, 0.0  ;;  %v89_v5 = vmul.f32 %v826_v4, %v33_v38  ;;  %v114_v27 = vmul.f32 %v826_v4, %v58_v41 }
  0x29   :  { %v218_v25 = vmax.f32 %v169_v24, 0.0  ;;  %v115_v28 = vmul.f32 %v826_v4, %v59_v56 }
  0x2a   :  { %v145_v32 = vadd.f32 %v836_v7, %v89_v5  ;;  %v170_v34 = vadd.f32 %v836_v7, %v114_v27 }
  0x2b   :  { %v171_v35 = vadd.f32 %v836_v7, %v115_v28 }
  0x2c   :  { %696 = vmatmul.mubr.msk.bf16.gmra.mrb[16].mxu0 %vm261_vm1, %v994_v49  ;;  %748 = vmatmul.mubr.msk.bf16.gmra.mrb[16].mxu1 %vm261_vm1, %v996_v50  ;;  %v99_v49 = vmul.f32 %v826_v4, %v43_v60  ;;  %v142_v50 = vadd.f32 %v836_v7, %v986_v46  ;;  %v168_v46 = vadd.f32 %v836_v7, %v1028_v3  ;;  %v194_v39 = vmax.f32 %v145_v32, 0.0 }
  0x2d   :  { %699 = vmatprep.mubr.msk.bf16.mxu0 %vm785_vm0, %v784_v0  ;;  %751 = vmatprep.mubr.msk.bf16.mxu1 %vm785_vm0, %v784_v0  ;;  %v88_v3 = vmul.f32 %v826_v4, %v32_v36  ;;  %v219_v4 = vmax.f32 %v170_v34, 0.0  ;;  %v220_v40 = vmax.f32 %v171_v35, 0.0 }
  0x2e   :  { %v155_v18 = vadd.f32 %v836_v7, %v99_v49  ;;  %v191_v58 = vmax.f32 %v142_v50, 0.0  ;;  %v217_v15 = vmax.f32 %v168_v46, 0.0 }
  0x2f   :  { %v144_v30 = vadd.f32 %v836_v7, %v88_v3  ;;  %v248_v43 = vpack.c.bf16 %v220_v40, %v219_v4  ;;  %v227_v7 = vmax.f32 %v1112_v13, 0.0 }
  0x30   :  { %v204_v51 = vmax.f32 %v155_v18, 0.0  ;;  %v234_v29 = vpack.c.bf16 %v192_v61, %v191_v58  ;;  %v247_v33 = vpack.c.bf16 %v218_v25, %v217_v15 }
  0x31   :  { %v193_v37 = vmax.f32 %v144_v30, 0.0 }
  0x32   :  { %v240_v57 = vpack.c.bf16 %v204_v51, %v203_v22 }
  0x33   :  { %v235_v42 = vpack.c.bf16 %v194_v39, %v193_v37 }
  0x34   :  { %700 = vmatmul.mubr.msk.bf16.gmra.mrb[20].mxu0 %vm261_vm1, %v233_v19  ;;  %752 = vmatmul.mubr.msk.bf16.gmra.mrb[20].mxu1 %vm261_vm1, %v246_v23 }
  0x35   :  { %703 = vmatprep.mubr.msk.bf16.mxu0 %vm785_vm0, %v784_v0  ;;  %755 = vmatprep.mubr.msk.bf16.mxu1 %vm785_vm0, %v784_v0 }
  0x3c   :  { %704 = vmatmul.mubr.msk.bf16.gmra.mrb[24].mxu0 %vm261_vm1, %v234_v29  ;;  %756 = vmatmul.mubr.msk.bf16.gmra.mrb[24].mxu1 %vm261_vm1, %v247_v33 }
  0x3d   :  { %707 = vmatprep.mubr.msk.bf16.mxu0 %vm785_vm0, %v784_v0  ;;  %759 = vmatprep.mubr.msk.bf16.mxu1 %vm785_vm0, %v784_v0 }
  0x44   :  { %708 = vmatmul.mubr.msk.bf16.gmra.mrb[28].mxu0 %vm261_vm1, %v235_v42  ;;  %760 = vmatmul.mubr.msk.bf16.gmra.mrb[28].mxu1 %vm261_vm1, %v248_v43 }
  0x45   :  { %711 = vmatprep.mubr.msk.bf16.mxu0 %vm785_vm0, %v784_v0  ;;  %763 = vmatprep.mubr.msk.bf16.mxu1 %vm785_vm0, %v784_v0 }
  0x4c   :  { %712 = vmatmul.mubr.msk.bf16.gmra.mrb[32].mxu0 %vm261_vm1, %v1064_v26  ;;  %764 = vmatmul.mubr.msk.bf16.gmra.mrb[32].mxu1 %vm261_vm1, %v1071_v31  ;;  %v252_v26 = vpack.c.bf16 %v227_v7, %v227_v7 }
  0x4d   :  { %715 = vmatprep.mubr.msk.bf16.mxu0 %vm785_vm0, %v784_v0  ;;  %767 = vmatprep.mubr.msk.bf16.mxu1 %vm785_vm0, %v784_v0 }
  0x54   :  { %716 = vmatmul.mubr.msk.bf16.gmra.mrb[36].mxu0 %vm261_vm1, %v1084_v44  ;;  %768 = vmatmul.mubr.msk.bf16.gmra.mrb[36].mxu1 %vm261_vm1, %v1097_v62 }
  0x55   :  { %719 = vmatprep.mubr.msk.bf16.mxu0 %vm785_vm0, %v784_v0  ;;  %771 = vmatprep.mubr.msk.bf16.mxu1 %vm785_vm0, %v784_v0 }
  0x5c   :  { %720 = vmatmul.mubr.msk.bf16.gmra.mrb[40].mxu0 %vm261_vm1, %v1109_v11  ;;  %772 = vmatmul.mubr.msk.bf16.gmra.mrb[40].mxu1 %vm261_vm1, %v251_v14 }
  0x5d   :  { %723 = vmatprep.mubr.msk.bf16.mxu0 %vm785_vm0, %v784_v0  ;;  %775 = vmatprep.mubr.msk.bf16.mxu1 %vm785_vm0, %v784_v0 }
  0x64   :  { %724 = vmatmul.mubr.msk.bf16.gmra.mrb[44].mxu0 %vm261_vm1, %v239_v21  ;;  %776 = vmatmul.mubr.msk.bf16.gmra.mrb[44].mxu1 %vm261_vm1, %v252_v26 }
  0x65   :  { %727 = vmatprep.mubr.msk.bf16.mxu0 %vm785_vm0, %v784_v0 }
  0x6c   :  { %728 = vmatmul.mubr.msk.bf16.gmra.mrb[48].mxu0 %vm261_vm1, %v240_v57 }
  0xdf   :  { %v371_v31 = vpop.f32.mrb[0].mxu0  ;;  %v475_v45 = vpop.f32.mrb[0].mxu1 }
  0xe0   :  { %570 = vst.msk [vmem:[%s1402_s4] sm:$0xff] %vm569_vm2, %v371_v31  ;;  %v681_v44 = vpop.f32.mrb[1].mxu0  ;;  %596 = vst.msk [vmem:[%s1402_s4 + $0xd0] sm:$0xff] %vm569_vm2, %v475_v45  ;;  %v733_v48 = vpop.f32.mrb[1].mxu1 }
  0xe1   :  { %v374_v47 = vpop.f32.mrb[2].mxu0  ;;  %v478_v52 = vpop.f32.mrb[2].mxu1 }
  0xe2   :  { %571 = vst.msk [vmem:[%s1402_s4 + $0x8] sm:$0xff] %vm569_vm2, %v374_v47  ;;  %v682_v0 = vpop.f32.mrb[3].mxu0  ;;  %597 = vst.msk [vmem:[%s1402_s4 + $0xd8] sm:$0xff] %vm569_vm2, %v478_v52  ;;  %v734_v53 = vpop.f32.mrb[3].mxu1 }
  0xe7   :  { %v379_v54 = vpop.f32.mrb[4].mxu0  ;;  %v483_v59 = vpop.f32.mrb[4].mxu1 }
  0xe8   :  { %572 = vst.msk [vmem:[%s1402_s4 + $0x10] sm:$0xff] %vm569_vm2, %v379_v54  ;;  %v685_v55 = vpop.f32.mrb[5].mxu0  ;;  %598 = vst.msk [vmem:[%s1402_s4 + $0xe0] sm:$0xff] %vm569_vm2, %v483_v59  ;;  %v737_v62 = vpop.f32.mrb[5].mxu1 }
  0xe9   :  { %v382_v60 = vpop.f32.mrb[6].mxu0  ;;  %v486_v1 = vpop.f32.mrb[6].mxu1 }
  0xea   :  { %573 = vst.msk [vmem:[%s1402_s4 + $0x18] sm:$0xff] %vm569_vm2, %v382_v60  ;;  %v686_v63 = vpop.f32.mrb[7].mxu0  ;;  %599 = vst.msk [vmem:[%s1402_s4 + $0xe8] sm:$0xff] %vm569_vm2, %v486_v1  ;;  %v738_v2 = vpop.f32.mrb[7].mxu1 }
  0xef   :  { %v387_v6 = vpop.f32.mrb[8].mxu0  ;;  %v491_v9 = vpop.f32.mrb[8].mxu1 }
  0xf0   :  { %574 = vst.msk [vmem:[%s1402_s4 + $0x20] sm:$0xff] %vm569_vm2, %v387_v6  ;;  %v689_v8 = vpop.f32.mrb[9].mxu0  ;;  %600 = vst.msk [vmem:[%s1402_s4 + $0xf0] sm:$0xff] %vm569_vm2, %v491_v9  ;;  %v741_v11 = vpop.f32.mrb[9].mxu1 }
  0xf1   :  { %v390_v10 = vpop.f32.mrb[10].mxu0  ;;  %v494_v13 = vpop.f32.mrb[10].mxu1 }
  0xf2   :  { %575 = vst.msk [vmem:[%s1402_s4 + $0x28] sm:$0xff] %vm569_vm2, %v390_v10  ;;  %v690_v12 = vpop.f32.mrb[11].mxu0  ;;  %601 = vst.msk [vmem:[%s1402_s4 + $0xf8] sm:$0xff] %vm569_vm2, %v494_v13  ;;  %v742_v49 = vpop.f32.mrb[11].mxu1 }
  0xf7   :  { %v395_v14 = vpop.f32.mrb[12].mxu0  ;;  %v499_v17 = vpop.f32.mrb[12].mxu1 }
  0xf8   :  { %576 = vst.msk [vmem:[%s1402_s4 + $0x30] sm:$0xff] %vm569_vm2, %v395_v14  ;;  %v693_v16 = vpop.f32.mrb[13].mxu0  ;;  %602 = vst.msk [vmem:[%s1402_s4 + $0x100] sm:$0xff] %vm569_vm2, %v499_v17  ;;  %v745_v18 = vpop.f32.mrb[13].mxu1 }
  0xf9   :  { %v398_v50 = vpop.f32.mrb[14].mxu0  ;;  %v502_v20 = vpop.f32.mrb[14].mxu1 }
  0xfa   :  { %577 = vst.msk [vmem:[%s1402_s4 + $0x38] sm:$0xff] %vm569_vm2, %v398_v50  ;;  %v694_v19 = vpop.f32.mrb[15].mxu0  ;;  %603 = vst.msk [vmem:[%s1402_s4 + $0x108] sm:$0xff] %vm569_vm2, %v502_v20  ;;  %v746_v21 = vpop.f32.mrb[15].mxu1 }
  0xff   :  { %v403_v22 = vpop.f32.mrb[16].mxu0  ;;  %v507_v46 = vpop.f32.mrb[16].mxu1 }
 0x100   :  { %578 = vst.msk [vmem:[%s1402_s4 + $0x40] sm:$0xff] %vm569_vm2, %v403_v22  ;;  %v697_v23 = vpop.f32.mrb[17].mxu0  ;;  %604 = vst.msk [vmem:[%s1402_s4 + $0x110] sm:$0xff] %vm569_vm2, %v507_v46  ;;  %v749_v36 = vpop.f32.mrb[17].mxu1 }
 0x101   :  { %v406_v24 = vpop.f32.mrb[18].mxu0  ;;  %v510_v51 = vpop.f32.mrb[18].mxu1 }
 0x102   :  { %579 = vst.msk [vmem:[%s1402_s4 + $0x48] sm:$0xff] %vm569_vm2, %v406_v24  ;;  %v698_v38 = vpop.f32.mrb[19].mxu0  ;;  %605 = vst.msk [vmem:[%s1402_s4 + $0x118] sm:$0xff] %vm569_vm2, %v510_v51  ;;  %v750_v41 = vpop.f32.mrb[19].mxu1 }
 0x107   :  { %v411_v56 = vpop.f32.mrb[20].mxu0  ;;  %v515_v58 = vpop.f32.mrb[20].mxu1 }
 0x108   :  { %580 = vst.msk [vmem:[%s1402_s4 + $0x50] sm:$0xff] %vm569_vm2, %v411_v56  ;;  %v701_v57 = vpop.f32.mrb[21].mxu0  ;;  %606 = vst.msk [vmem:[%s1402_s4 + $0x120] sm:$0xff] %vm569_vm2, %v515_v58  ;;  %v753_v3 = vpop.f32.mrb[21].mxu1 }
 0x109   :  { %v414_v61 = vpop.f32.mrb[22].mxu0  ;;  %v518_v15 = vpop.f32.mrb[22].mxu1 }
 0x10a   :  { %581 = vst.msk [vmem:[%s1402_s4 + $0x58] sm:$0xff] %vm569_vm2, %v414_v61  ;;  %v702_v5 = vpop.f32.mrb[23].mxu0  ;;  %607 = vst.msk [vmem:[%s1402_s4 + $0x128] sm:$0xff] %vm569_vm2, %v518_v15  ;;  %v754_v25 = vpop.f32.mrb[23].mxu1 }
 0x10f   :  { %v419_v27 = vpop.f32.mrb[24].mxu0  ;;  %v523_v29 = vpop.f32.mrb[24].mxu1 }
 0x110   :  { %582 = vst.msk [vmem:[%s1402_s4 + $0x60] sm:$0xff] %vm569_vm2, %v419_v27  ;;  %v705_v28 = vpop.f32.mrb[25].mxu0  ;;  %608 = vst.msk [vmem:[%s1402_s4 + $0x130] sm:$0xff] %vm569_vm2, %v523_v29  ;;  %v757_v32 = vpop.f32.mrb[25].mxu1 }
 0x111   :  { %v422_v30 = vpop.f32.mrb[26].mxu0  ;;  %v526_v34 = vpop.f32.mrb[26].mxu1 }
 0x112   :  { %583 = vst.msk [vmem:[%s1402_s4 + $0x68] sm:$0xff] %vm569_vm2, %v422_v30  ;;  %v706_v33 = vpop.f32.mrb[27].mxu0  ;;  %609 = vst.msk [vmem:[%s1402_s4 + $0x138] sm:$0xff] %vm569_vm2, %v526_v34  ;;  %v758_v35 = vpop.f32.mrb[27].mxu1 }
 0x117   :  { %v427_v37 = vpop.f32.mrb[28].mxu0  ;;  %v531_v4 = vpop.f32.mrb[28].mxu1 }
 0x118   :  { %584 = vst.msk [vmem:[%s1402_s4 + $0x70] sm:$0xff] %vm569_vm2, %v427_v37  ;;  %v709_v39 = vpop.f32.mrb[29].mxu0  ;;  %610 = vst.msk [vmem:[%s1402_s4 + $0x140] sm:$0xff] %vm569_vm2, %v531_v4  ;;  %v761_v42 = vpop.f32.mrb[29].mxu1 }
 0x119   :  { %v430_v40 = vpop.f32.mrb[30].mxu0  ;;  %v534_v7 = vpop.f32.mrb[30].mxu1 }
 0x11a   :  { %585 = vst.msk [vmem:[%s1402_s4 + $0x78] sm:$0xff] %vm569_vm2, %v430_v40  ;;  %v710_v43 = vpop.f32.mrb[31].mxu0  ;;  %611 = vst.msk [vmem:[%s1402_s4 + $0x148] sm:$0xff] %vm569_vm2, %v534_v7  ;;  %v762_v26 = vpop.f32.mrb[31].mxu1 }
 0x11f   :  { %v435_v31 = vpop.f32.mrb[32].mxu0  ;;  %v539_v45 = vpop.f32.mrb[32].mxu1 }
 0x120   :  { %586 = vst.msk [vmem:[%s1402_s4 + $0x80] sm:$0xff] %vm569_vm2, %v435_v31  ;;  %v713_v44 = vpop.f32.mrb[33].mxu0  ;;  %612 = vst.msk [vmem:[%s1402_s4 + $0x150] sm:$0xff] %vm569_vm2, %v539_v45  ;;  %v765_v48 = vpop.f32.mrb[33].mxu1 }
 0x121   :  { %v438_v47 = vpop.f32.mrb[34].mxu0  ;;  %v542_v52 = vpop.f32.mrb[34].mxu1 }
 0x122   :  { %587 = vst.msk [vmem:[%s1402_s4 + $0x88] sm:$0xff] %vm569_vm2, %v438_v47  ;;  %v714_v0 = vpop.f32.mrb[35].mxu0  ;;  %613 = vst.msk [vmem:[%s1402_s4 + $0x158] sm:$0xff] %vm569_vm2, %v542_v52  ;;  %v766_v53 = vpop.f32.mrb[35].mxu1 }
 0x127   :  { %v443_v54 = vpop.f32.mrb[36].mxu0  ;;  %v547_v59 = vpop.f32.mrb[36].mxu1 }
 0x128   :  { %588 = vst.msk [vmem:[%s1402_s4 + $0x90] sm:$0xff] %vm569_vm2, %v443_v54  ;;  %v717_v55 = vpop.f32.mrb[37].mxu0  ;;  %614 = vst.msk [vmem:[%s1402_s4 + $0x160] sm:$0xff] %vm569_vm2, %v547_v59  ;;  %v769_v62 = vpop.f32.mrb[37].mxu1 }
 0x129   :  { %v446_v60 = vpop.f32.mrb[38].mxu0  ;;  %v550_v1 = vpop.f32.mrb[38].mxu1 }
 0x12a   :  { %589 = vst.msk [vmem:[%s1402_s4 + $0x98] sm:$0xff] %vm569_vm2, %v446_v60  ;;  %v718_v63 = vpop.f32.mrb[39].mxu0  ;;  %615 = vst.msk [vmem:[%s1402_s4 + $0x168] sm:$0xff] %vm569_vm2, %v550_v1  ;;  %v770_v2 = vpop.f32.mrb[39].mxu1 }
 0x12f   :  { %v451_v6 = vpop.f32.mrb[40].mxu0  ;;  %v555_v9 = vpop.f32.mrb[40].mxu1 }
 0x130   :  { %590 = vst.msk [vmem:[%s1402_s4 + $0xa0] sm:$0xff] %vm569_vm2, %v451_v6  ;;  %v721_v8 = vpop.f32.mrb[41].mxu0  ;;  %616 = vst.msk [vmem:[%s1402_s4 + $0x170] sm:$0xff] %vm569_vm2, %v555_v9  ;;  %v773_v11 = vpop.f32.mrb[41].mxu1 }
 0x131   :  { %v454_v10 = vpop.f32.mrb[42].mxu0  ;;  %v558_v13 = vpop.f32.mrb[42].mxu1 }
 0x132   :  { %591 = vst.msk [vmem:[%s1402_s4 + $0xa8] sm:$0xff] %vm569_vm2, %v454_v10  ;;  %v722_v12 = vpop.f32.mrb[43].mxu0  ;;  %617 = vst.msk [vmem:[%s1402_s4 + $0x178] sm:$0xff] %vm569_vm2, %v558_v13  ;;  %v774_v49 = vpop.f32.mrb[43].mxu1 }
 0x137   :  { %v459_v14 = vpop.f32.mrb[44].mxu0  ;;  %v563_v17 = vpop.f32.mrb[44].mxu1 }
 0x138   :  { %592 = vst.msk [vmem:[%s1402_s4 + $0xb0] sm:$0xff] %vm569_vm2, %v459_v14  ;;  %v725_v16 = vpop.f32.mrb[45].mxu0  ;;  %618 = vst.msk [vmem:[%s1402_s4 + $0x180] sm:$0xff] %vm569_vm2, %v563_v17  ;;  %v777_v18 = vpop.f32.mrb[45].mxu1 }
 0x139   :  { %v462_v50 = vpop.f32.mrb[46].mxu0  ;;  %v566_v20 = vpop.f32.mrb[46].mxu1 }
 0x13a   :  { %593 = vst.msk [vmem:[%s1402_s4 + $0xb8] sm:$0xff] %vm569_vm2, %v462_v50  ;;  %v726_v19 = vpop.f32.mrb[47].mxu0  ;;  %v778_v21 = vpop.f32.mrb[47].mxu1 }
 0x13f   :  { %v467_v22 = vpop.f32.mrb[48].mxu0 }
 0x140   :  { %594 = vst.msk [vmem:[%s1402_s4 + $0xc0] sm:$0xff] %vm569_vm2, %v467_v22  ;;  %v729_v23 = vpop.f32.mrb[49].mxu0 }
 0x141   :  { %v470_v46 = vpop.f32.mrb[50].mxu0 }
 0x142   :  { %595 = vst.msk [vmem:[%s1402_s4 + $0xc8] sm:$0xff] %vm569_vm2, %v470_v46  ;;  %v730_v24 = vpop.f32.mrb[51].mxu0 }

// kernel: sparsenet_forward.36
= control target key start
LH: loop header
LB: loop body
LE: loop exit
PB: predicated region body
PF: predicated region fallthrough
CT: control target
= control target key end

     0   :  { %vm80_vm0 = vcmask 130048   ;;  %s217_s0 = inlined_call_operand.vmem [shape: f32[104,16], index: 0, kind: input, shape index: {}]   ;;  %s218_s1 = inlined_call_operand.vmem [shape: f32[1,16], index: 1, kind: input, shape index: {}]   ;;  %s219_s2 = inlined_call_operand.vmem [shape: f32[1,16], index: 2, kind: input, shape index: {}]   ;;  %s220_s3 = inlined_call_operand.vmem [shape: f32[104,16], index: 3, kind: output, shape index: {}]  }
   0x1   :  { %v14_v0 = vld [vmem:[%s217_s0] sm:$0xff]  ;;  %v15_v4 = vld [vmem:[%s217_s0 + $0x8] sm:$0xff]  ;;  %v16_v5 = vld [vmem:[%s217_s0 + $0x10] sm:$0xff] }
   0x2   :  { %v98_v1 = vld [vmem:[%s218_s1] ss:$0 sm:$0xff]  ;;  %v17_v6 = vld [vmem:[%s217_s0 + $0x18] sm:$0xff]  ;;  %v19_v11 = vld [vmem:[%s217_s0 + $0x28] sm:$0xff] }
   0x3   :  { %v99_v2 = vld [vmem:[%s219_s2] ss:$0 sm:$0xff]  ;;  %v34_v3 = vmul.f32 %v98_v1, %v14_v0  ;;  %v35_v7 = vmul.f32 %v98_v1, %v15_v4  ;;  %v36_v8 = vmul.f32 %v98_v1, %v16_v5  ;;  %v37_v9 = vmul.f32 %v98_v1, %v17_v6  ;;  %v20_v12 = vld [vmem:[%s217_s0 + $0x30] sm:$0xff]  ;;  %v21_v17 = vld [vmem:[%s217_s0 + $0x38] sm:$0xff] }
   0x4   :  { %v18_v10 = vld [vmem:[%s217_s0 + $0x20] sm:$0xff]  ;;  %v39_v15 = vmul.f32 %v98_v1, %v19_v11  ;;  %v40_v16 = vmul.f32 %v98_v1, %v20_v12  ;;  %v41_v21 = vmul.f32 %v98_v1, %v21_v17  ;;  %v23_v27 = vld [vmem:[%s217_s0 + $0x48] sm:$0xff]  ;;  %v24_v28 = vld [vmem:[%s217_s0 + $0x50] sm:$0xff] }
   0x5   :  { %v54_v13 = vadd.f32 %v99_v2, %v34_v3  ;;  %v38_v14 = vmul.f32 %v98_v1, %v18_v10  ;;  %v55_v18 = vadd.f32 %v99_v2, %v35_v7  ;;  %v56_v19 = vadd.f32 %v99_v2, %v36_v8  ;;  %v22_v22 = vld [vmem:[%s217_s0 + $0x40] sm:$0xff]  ;;  %v25_v29 = vld [vmem:[%s217_s0 + $0x58] sm:$0xff] }
   0x6   :  { %v57_v20 = vadd.f32 %v99_v2, %v37_v9  ;;  %v59_v25 = vadd.f32 %v99_v2, %v39_v15  ;;  %v60_v26 = vadd.f32 %v99_v2, %v40_v16  ;;  %v61_v33 = vadd.f32 %v99_v2, %v41_v21  ;;  %v26_v34 = vld [vmem:[%s217_s0 + $0x60] sm:$0xff] }
   0x7   :  { %v67_v23 = vmax.f32 %v54_v13, 0.0  ;;  %v58_v24 = vadd.f32 %v99_v2, %v38_v14  ;;  %v68_v30 = vmax.f32 %v55_v18, 0.0  ;;  %v69_v31 = vmax.f32 %v56_v19, 0.0 }
   0x8   :  { %v70_v32 = vmax.f32 %v57_v20, 0.0  ;;  %v72_v36 = vmax.f32 %v59_v25, 0.0  ;;  %v73_v37 = vmax.f32 %v60_v26, 0.0  ;;  %v42_v38 = vmul.f32 %v98_v1, %v22_v22 }
   0x9   :  { %81 = vst.msk [vmem:[%s220_s3] sm:$0xff] %vm80_vm0, %v67_v23  ;;  %v71_v35 = vmax.f32 %v58_v24, 0.0  ;;  %82 = vst.msk [vmem:[%s220_s3 + $0x8] sm:$0xff] %vm80_vm0, %v68_v30  ;;  %v74_v39 = vmax.f32 %v61_v33, 0.0  ;;  %v43_v40 = vmul.f32 %v98_v1, %v23_v27  ;;  %v44_v41 = vmul.f32 %v98_v1, %v24_v28 }
   0xa   :  { %83 = vst.msk [vmem:[%s220_s3 + $0x10] sm:$0xff] %vm80_vm0, %v69_v31  ;;  %84 = vst.msk [vmem:[%s220_s3 + $0x18] sm:$0xff] %vm80_vm0, %v70_v32  ;;  %v45_v42 = vmul.f32 %v98_v1, %v25_v29  ;;  %v62_v43 = vadd.f32 %v99_v2, %v42_v38  ;;  %v46_v44 = vmul.f32 %v98_v1, %v26_v34 }
   0xb   :  { %85 = vst.msk [vmem:[%s220_s3 + $0x20] sm:$0xff] %vm80_vm0, %v71_v35  ;;  %86 = vst.msk [vmem:[%s220_s3 + $0x28] sm:$0xff] %vm80_vm0, %v72_v36  ;;  %v63_v45 = vadd.f32 %v99_v2, %v43_v40  ;;  %v64_v46 = vadd.f32 %v99_v2, %v44_v41 }
   0xc   :  { %87 = vst.msk [vmem:[%s220_s3 + $0x30] sm:$0xff] %vm80_vm0, %v73_v37  ;;  %88 = vst.msk [vmem:[%s220_s3 + $0x38] sm:$0xff] %vm80_vm0, %v74_v39  ;;  %v65_v47 = vadd.f32 %v99_v2, %v45_v42  ;;  %v75_v48 = vmax.f32 %v62_v43, 0.0  ;;  %v66_v49 = vadd.f32 %v99_v2, %v46_v44 }
   0xd   :  { %v76_v50 = vmax.f32 %v63_v45, 0.0  ;;  %v77_v51 = vmax.f32 %v64_v46, 0.0 }
   0xe   :  { %v78_v52 = vmax.f32 %v65_v47, 0.0  ;;  %89 = vst.msk [vmem:[%s220_s3 + $0x40] sm:$0xff] %vm80_vm0, %v75_v48  ;;  %v79_v53 = vmax.f32 %v66_v49, 0.0 }
   0xf   :  { %90 = vst.msk [vmem:[%s220_s3 + $0x48] sm:$0xff] %vm80_vm0, %v76_v50  ;;  %91 = vst.msk [vmem:[%s220_s3 + $0x50] sm:$0xff] %vm80_vm0, %v77_v51 }
  0x10   :  { %92 = vst.msk [vmem:[%s220_s3 + $0x58] sm:$0xff] %vm80_vm0, %v78_v52  ;;  %93 = vst.msk [vmem:[%s220_s3 + $0x60] sm:$0xff] %vm80_vm0, %v79_v53 }

// kernel: sparsenet_forward.35
= control target key start
LH: loop header
LB: loop body
LE: loop exit
PB: predicated region body
PF: predicated region fallthrough
CT: control target
= control target key end

     0   :  { %vm114_vm0 = vcmask 1043456   ;;  %v275_v0 = vmov 0.0   ;;  %vm276_vm1 = vmmov 0   ;;  %vm92_vm2 = vcmask 64512   ;;  %s440_s3 = inlined_call_operand.vmem [shape: bf16[8,16], index: 3, kind: input, shape index: {}]   ;;  %s441_s0 = inlined_call_operand.vmem [shape: f32[104,8], index: 0, kind: input, shape index: {}]   ;;  %s442_s1 = inlined_call_operand.vmem [shape: f32[1,8], index: 1, kind: input, shape index: {}]   ;;  %s443_s2 = inlined_call_operand.vmem [shape: f32[1,8], index: 2, kind: input, shape index: {}]   ;;  %s444_s4 = inlined_call_operand.vmem [shape: f32[104,16], index: 4, kind: output, shape index: {}]  }
   0x1   :  { %241 = vmatprep.subr.bf16.mxu0 %v275_v0  ;;  %v91_v1 = vld [vmem:[%s440_s3] sm:$0xf]  ;;  %243 = vmatprep.mubr.msk.bf16.mxu0 %vm276_vm1, %v275_v0  ;;  %v19_v3 = vld [vmem:[%s441_s0 + $0x8] sm:$0xff]  ;;  %v20_v12 = vld [vmem:[%s441_s0 + $0x10] sm:$0xff]  ;;  %vm206_vm3 = vcmask 130048  }
   0x2   :  { %v18_v2 = vld [vmem:[%s441_s0] sm:$0xff]  ;;  %v116_v4 = vsel %vm114_vm0, %v91_v1, 0  ;;  %271 = vmatprep.subr.bf16.mxu1 %v275_v0  ;;  %259 = vmatprep.mubr.msk.bf16.mxu1 %vm276_vm1, %v275_v0  ;;  %v27_v10 = vld [vmem:[%s441_s0 + $0x48] sm:$0xff]  ;;  %v21_v13 = vld [vmem:[%s441_s0 + $0x18] sm:$0xff] }
   0x3   :  { %v224_v5 = vld [vmem:[%s442_s1] ss:$0 sm:$0xff]  ;;  %242 = vmatpush3.bf16.msra.mxu0 %v116_v4  ;;  %272 = vmatpush3.bf16.msra.mxu1 %v116_v4  ;;  %v28_v17 = vld [vmem:[%s441_s0 + $0x50] sm:$0xff]  ;;  %v29_v18 = vld [vmem:[%s441_s0 + $0x58] sm:$0xff] }
   0x4   :  { %v320_v6 = vld [vmem:[%s443_s2] ss:$0 sm:$0xff]  ;;  %v38_v8 = vmul.f32 %v224_v5, %v18_v2  ;;  %v39_v9 = vmul.f32 %v224_v5, %v19_v3  ;;  %v47_v14 = vmul.f32 %v224_v5, %v27_v10  ;;  %v40_v15 = vmul.f32 %v224_v5, %v20_v12  ;;  %v23_v34 = vld [vmem:[%s441_s0 + $0x28] sm:$0xff]  ;;  %v24_v50 = vld [vmem:[%s441_s0 + $0x30] sm:$0xff] }
   0x5   :  { %v26_v7 = vld [vmem:[%s441_s0 + $0x40] sm:$0xff]  ;;  %v41_v16 = vmul.f32 %v224_v5, %v21_v13  ;;  %v48_v22 = vmul.f32 %v224_v5, %v28_v17  ;;  %v49_v25 = vmul.f32 %v224_v5, %v29_v18  ;;  %v43_v41 = vmul.f32 %v224_v5, %v23_v34  ;;  %v25_v51 = vld [vmem:[%s441_s0 + $0x38] sm:$0xff] }
   0x6   :  { %v46_v11 = vmul.f32 %v224_v5, %v26_v7  ;;  %v58_v19 = vadd.f32 %v320_v6, %v38_v8  ;;  %v59_v20 = vadd.f32 %v320_v6, %v39_v9  ;;  %v67_v23 = vadd.f32 %v320_v6, %v47_v14  ;;  %v22_v33 = vld [vmem:[%s441_s0 + $0x20] sm:$0xff] }
   0x7   :  { %v60_v24 = vadd.f32 %v320_v6, %v40_v15  ;;  %v61_v29 = vadd.f32 %v320_v6, %v41_v16  ;;  %v68_v31 = vadd.f32 %v320_v6, %v48_v22  ;;  %v69_v32 = vadd.f32 %v320_v6, %v49_v25  ;;  %v30_v36 = vld [vmem:[%s441_s0 + $0x60] sm:$0xff] }
   0x8   :  { %v66_v21 = vadd.f32 %v320_v6, %v46_v11  ;;  %v71_v26 = vmax.f32 %v58_v19, 0.0  ;;  %v72_v27 = vmax.f32 %v59_v20, 0.0  ;;  %v80_v30 = vmax.f32 %v67_v23, 0.0 }
   0x9   :  { %v73_v38 = vmax.f32 %v60_v24, 0.0  ;;  %v74_v39 = vmax.f32 %v61_v29, 0.0  ;;  %v42_v40 = vmul.f32 %v224_v5, %v22_v33  ;;  %v81_v42 = vmax.f32 %v68_v31, 0.0 }
   0xa   :  { %v79_v28 = vmax.f32 %v66_v21, 0.0  ;;  %v84_v35 = vpack.c.bf16 %v72_v27, %v71_v26  ;;  %v82_v43 = vmax.f32 %v69_v32, 0.0  ;;  %v50_v44 = vmul.f32 %v224_v5, %v30_v36 }
   0xb   :  { %v85_v45 = vpack.c.bf16 %v74_v39, %v73_v38  ;;  %v62_v46 = vadd.f32 %v320_v6, %v42_v40  ;;  %v63_v47 = vadd.f32 %v320_v6, %v43_v41  ;;  %v44_v54 = vmul.f32 %v224_v5, %v24_v50 }
   0xc   :  { %v88_v37 = vpack.c.bf16 %v80_v30, %v79_v28  ;;  %244 = vmatmul.mubr.msk.bf16.vlgmr.msra.gmra.mrb[0].mxu0 %vm92_vm2, %v84_v35  ;;  %v89_v48 = vpack.c.bf16 %v82_v43, %v81_v42  ;;  %v70_v49 = vadd.f32 %v320_v6, %v50_v44  ;;  %v45_v55 = vmul.f32 %v224_v5, %v25_v51 }
   0xd   :  { %247 = vmatprep.mubr.msk.bf16.mxu0 %vm276_vm1, %v275_v0  ;;  %v75_v52 = vmax.f32 %v62_v46, 0.0  ;;  %v76_v53 = vmax.f32 %v63_v47, 0.0  ;;  %v64_v58 = vadd.f32 %v320_v6, %v44_v54 }
   0xe   :  { %260 = vmatmul.mubr.msk.bf16.vlgmr.msra.gmra.mrb[0].mxu1 %vm92_vm2, %v88_v37  ;;  %v83_v56 = vmax.f32 %v70_v49, 0.0  ;;  %v65_v59 = vadd.f32 %v320_v6, %v45_v55 }
   0xf   :  { %263 = vmatprep.mubr.msk.bf16.mxu1 %vm276_vm1, %v275_v0  ;;  %v86_v57 = vpack.c.bf16 %v76_v53, %v75_v52  ;;  %v77_v61 = vmax.f32 %v64_v58, 0.0 }
  0x10   :  { %v90_v60 = vpack.c.bf16 %v83_v56, %v83_v56  ;;  %v78_v62 = vmax.f32 %v65_v59, 0.0 }
  0x12   :  { %v87_v63 = vpack.c.bf16 %v78_v62, %v77_v61 }
  0x14   :  { %248 = vmatmul.mubr.msk.bf16.gmra.mrb[4].mxu0 %vm92_vm2, %v85_v45 }
  0x15   :  { %251 = vmatprep.mubr.msk.bf16.mxu0 %vm276_vm1, %v275_v0 }
  0x16   :  { %264 = vmatmul.mubr.msk.bf16.gmra.mrb[4].mxu1 %vm92_vm2, %v89_v48 }
  0x17   :  { %267 = vmatprep.mubr.msk.bf16.mxu1 %vm276_vm1, %v275_v0 }
  0x1c   :  { %252 = vmatmul.mubr.msk.bf16.gmra.mrb[8].mxu0 %vm92_vm2, %v86_v57 }
  0x1d   :  { %255 = vmatprep.mubr.msk.bf16.mxu0 %vm276_vm1, %v275_v0 }
  0x1e   :  { %268 = vmatmul.mubr.msk.bf16.gmra.mrb[8].mxu1 %vm92_vm2, %v90_v60 }
  0x24   :  { %256 = vmatmul.mubr.msk.bf16.gmra.mrb[12].mxu0 %vm92_vm2, %v87_v63 }
  0xdf   :  { %v152_v1 = vpop.f32.mrb[0].mxu0 }
  0xe0   :  { %207 = vst.msk [vmem:[%s444_s4] sm:$0xff] %vm206_vm3, %v152_v1  ;;  %v245_v2 = vpop.f32.mrb[1].mxu0 }
  0xe1   :  { %v184_v3 = vpop.f32.mrb[0].mxu1  ;;  %v155_v4 = vpop.f32.mrb[2].mxu0 }
  0xe2   :  { %215 = vst.msk [vmem:[%s444_s4 + $0x40] sm:$0xff] %vm206_vm3, %v184_v3  ;;  %v261_v5 = vpop.f32.mrb[1].mxu1  ;;  %208 = vst.msk [vmem:[%s444_s4 + $0x8] sm:$0xff] %vm206_vm3, %v155_v4  ;;  %v246_v0 = vpop.f32.mrb[3].mxu0 }
  0xe3   :  { %v187_v6 = vpop.f32.mrb[2].mxu1 }
  0xe4   :  { %216 = vst.msk [vmem:[%s444_s4 + $0x48] sm:$0xff] %vm206_vm3, %v187_v6  ;;  %v262_v7 = vpop.f32.mrb[3].mxu1 }
  0xe7   :  { %v160_v8 = vpop.f32.mrb[4].mxu0 }
  0xe8   :  { %209 = vst.msk [vmem:[%s444_s4 + $0x10] sm:$0xff] %vm206_vm3, %v160_v8  ;;  %v249_v9 = vpop.f32.mrb[5].mxu0 }
  0xe9   :  { %v192_v10 = vpop.f32.mrb[4].mxu1  ;;  %v163_v11 = vpop.f32.mrb[6].mxu0 }
  0xea   :  { %217 = vst.msk [vmem:[%s444_s4 + $0x50] sm:$0xff] %vm206_vm3, %v192_v10  ;;  %v265_v12 = vpop.f32.mrb[5].mxu1  ;;  %210 = vst.msk [vmem:[%s444_s4 + $0x18] sm:$0xff] %vm206_vm3, %v163_v11  ;;  %v250_v13 = vpop.f32.mrb[7].mxu0 }
  0xeb   :  { %v195_v14 = vpop.f32.mrb[6].mxu1 }
  0xec   :  { %218 = vst.msk [vmem:[%s444_s4 + $0x58] sm:$0xff] %vm206_vm3, %v195_v14  ;;  %v266_v15 = vpop.f32.mrb[7].mxu1 }
  0xef   :  { %v168_v16 = vpop.f32.mrb[8].mxu0 }
  0xf0   :  { %211 = vst.msk [vmem:[%s444_s4 + $0x20] sm:$0xff] %vm206_vm3, %v168_v16  ;;  %v253_v17 = vpop.f32.mrb[9].mxu0 }
  0xf1   :  { %v200_v18 = vpop.f32.mrb[8].mxu1  ;;  %v171_v19 = vpop.f32.mrb[10].mxu0 }
  0xf2   :  { %219 = vst.msk [vmem:[%s444_s4 + $0x60] sm:$0xff] %vm206_vm3, %v200_v18  ;;  %v269_v20 = vpop.f32.mrb[9].mxu1  ;;  %212 = vst.msk [vmem:[%s444_s4 + $0x28] sm:$0xff] %vm206_vm3, %v171_v19  ;;  %v254_v21 = vpop.f32.mrb[11].mxu0 }
  0xf3   :  { %v203_v22 = vpop.f32.mrb[10].mxu1 }
  0xf4   :  { %v270_v23 = vpop.f32.mrb[11].mxu1 }
  0xf7   :  { %v176_v24 = vpop.f32.mrb[12].mxu0 }
  0xf8   :  { %213 = vst.msk [vmem:[%s444_s4 + $0x30] sm:$0xff] %vm206_vm3, %v176_v24  ;;  %v257_v25 = vpop.f32.mrb[13].mxu0 }
  0xf9   :  { %v179_v26 = vpop.f32.mrb[14].mxu0 }
  0xfa   :  { %214 = vst.msk [vmem:[%s444_s4 + $0x38] sm:$0xff] %vm206_vm3, %v179_v26  ;;  %v258_v27 = vpop.f32.mrb[15].mxu0 }

// kernel: sparsenet_forward.37
= control target key start
LH: loop header
LB: loop body
LE: loop exit
PB: predicated region body
PF: predicated region fallthrough
CT: control target
= control target key end

     0   :  { %v363_v0 = vmov 0   ;;  %vm157_vm0 = vcmask 130048   ;;  %vm267_vm1 = vcmask 31744   ;;  %s504_s1 = inlined_call_operand.vmem [shape: bf16[144,4], index: 1, kind: input, shape index: {}]   ;;  %s505_s0 = inlined_call_operand.vmem [shape: bf16[104,144], index: 0, kind: input, shape index: {}]   ;;  %s506_s2 = inlined_call_operand.vmem [shape: f32[104,4], index: 2, kind: output, shape index: {}]  }
   0x1   :  { %179 = vmatprep.subr.bf16.mxu0 %v363_v0  ;;  %v334_v1 = vld [vmem:[%s504_s1] sm:$0xff]   ;;  %315 = vmatprep.subr.bf16.mxu1 %v363_v0  ;;  %v335_v2 = vld [vmem:[%s504_s1 + $0x8] sm:$0xff]   ;;  %v336_v3 = vld [vmem:[%s504_s1 + $0x10] sm:$0xff]  }
   0x2   :  { %180 = vmatpush1.bf16.msra.mxu0 %v334_v1  ;;  %324 = vmatpush1.bf16.msra.mxu1 %v334_v1  ;;  %v337_v4 = vld [vmem:[%s504_s1 + $0x18] sm:$0xff]   ;;  %v345_v5 = vld [vmem:[%s505_s0 + $0x4] ss:$8 sps:$4 sm:$0xff]   ;;  %v340_v9 = vld [vmem:[%s504_s1 + $0x30] sm:$0xff]  }
   0x3   :  { %181 = vmatprep.subr.bf16.mxu0 %v363_v0  ;;  %316 = vmatprep.subr.bf16.mxu1 %v363_v0  ;;  %v348_v6 = vld [vmem:[%s505_s0 + $0x44] ss:$8 sps:$4 sm:$0xff]   ;;  %v341_v10 = vld [vmem:[%s504_s1 + $0x38] sm:$0xff]   ;;  %v343_v12 = vld [vmem:[%s505_s0] ss:$8 sps:$4 sm:$0xff]  }
   0x4   :  { %308 = vmatprep.mubr.msk.bf16.mxu0 %vm157_vm0, %v345_v5  ;;  %312 = vmatprep.mubr.msk.bf16.mxu1 %vm157_vm0, %v348_v6  ;;  %v338_v7 = vld [vmem:[%s504_s1 + $0x20] sm:$0xff]   ;;  %v339_v8 = vld [vmem:[%s504_s1 + $0x28] sm:$0xff]   ;;  %v349_v14 = vld [vmem:[%s505_s0 + $0x14] ss:$8 sps:$4 sm:$0xff]  }
   0x5   :  { %v342_v11 = vld [vmem:[%s504_s1 + $0x40] sm:$0xff]   ;;  %v352_v15 = vld [vmem:[%s505_s0 + $0x54] ss:$8 sps:$4 sm:$0xff]   ;;  %v351_v17 = vld [vmem:[%s505_s0 + $0x10] ss:$8 sps:$4 sm:$0xff]  }
   0x6   :  { %182 = vmatpush1.bf16.msra.mxu0 %v335_v2  ;;  %325 = vmatpush1.bf16.msra.mxu1 %v335_v2  ;;  %v346_v13 = vld [vmem:[%s505_s0 + $0x40] ss:$8 sps:$4 sm:$0xff]   ;;  %v354_v18 = vld [vmem:[%s505_s0 + $0x50] ss:$8 sps:$4 sm:$0xff]   ;;  %v355_v19 = vld [vmem:[%s505_s0 + $0x24] ss:$8 sps:$4 sm:$0xff]  }
   0x7   :  { %183 = vmatprep.subr.bf16.mxu0 %v363_v0  ;;  %317 = vmatprep.subr.bf16.mxu1 %v363_v0  ;;  %v24_v16 = vld [vmem:[%s505_s0 + $0x60] sm:$0xff]  ;;  %v360_v23 = vld [vmem:[%s505_s0 + $0x34] ss:$8 sps:$4 sm:$0xff]   ;;  %v362_v24 = vld [vmem:[%s505_s0 + $0x30] ss:$8 sps:$4 sm:$0xff]  }
   0x8   :  { %v298_v20 = vcombine.high %v24_v16, %v24_v16  ;;  %v357_v21 = vld [vmem:[%s505_s0 + $0x20] ss:$8 sps:$4 sm:$0xff]   ;;  %v297_v22 = vcombine.low %v24_v16, %v24_v16 }
   0xa   :  { %184 = vmatpush1.bf16.msra.mxu0 %v336_v3  ;;  %326 = vmatpush1.bf16.msra.mxu1 %v336_v3 }
   0xb   :  { %185 = vmatprep.subr.bf16.mxu0 %v363_v0  ;;  %318 = vmatprep.subr.bf16.mxu1 %v363_v0 }
   0xe   :  { %186 = vmatpush1.bf16.msra.mxu0 %v337_v4  ;;  %327 = vmatpush1.bf16.msra.mxu1 %v337_v4 }
   0xf   :  { %187 = vmatprep.subr.bf16.mxu0 %v363_v0  ;;  %319 = vmatprep.subr.bf16.mxu1 %v363_v0 }
  0x12   :  { %188 = vmatpush1.bf16.msra.mxu0 %v338_v7  ;;  %328 = vmatpush1.bf16.msra.mxu1 %v338_v7 }
  0x13   :  { %189 = vmatprep.subr.bf16.mxu0 %v363_v0  ;;  %320 = vmatprep.subr.bf16.mxu1 %v363_v0 }
  0x16   :  { %190 = vmatpush1.bf16.msra.mxu0 %v339_v8  ;;  %329 = vmatpush1.bf16.msra.mxu1 %v339_v8 }
  0x17   :  { %191 = vmatprep.subr.bf16.mxu0 %v363_v0  ;;  %321 = vmatprep.subr.bf16.mxu1 %v363_v0 }
  0x1a   :  { %192 = vmatpush1.bf16.msra.mxu0 %v340_v9  ;;  %330 = vmatpush1.bf16.msra.mxu1 %v340_v9 }
  0x1b   :  { %193 = vmatprep.subr.bf16.mxu0 %v363_v0  ;;  %322 = vmatprep.subr.bf16.mxu1 %v363_v0 }
  0x1e   :  { %194 = vmatpush1.bf16.msra.mxu0 %v341_v10  ;;  %331 = vmatpush1.bf16.msra.mxu1 %v341_v10 }
  0x1f   :  { %195 = vmatprep.subr.bf16.mxu0 %v363_v0  ;;  %323 = vmatprep.subr.bf16.mxu1 %v363_v0 }
  0x22   :  { %196 = vmatpush1.bf16.msra.mxu0 %v342_v11  ;;  %332 = vmatpush1.bf16.msra.mxu1 %v342_v11 }
  0x25   :  { %212 = vmatmul.mubr.bf16.vlgmr.msra.gmra.mrb[0].mxu0 %v343_v12  ;;  %244 = vmatmul.mubr.bf16.vlgmr.msra.gmra.mrb[0].mxu1 %v346_v13 }
  0x26   :  { %309 = vmatprep.mubr.msk.bf16.mxu0 %vm157_vm0, %v349_v14  ;;  %313 = vmatprep.mubr.msk.bf16.mxu1 %vm157_vm0, %v352_v15 }
  0x2d   :  { %220 = vmatmul.mubr.bf16.gmra.mrb[4].mxu0 %v351_v17  ;;  %252 = vmatmul.mubr.bf16.gmra.mrb[4].mxu1 %v354_v18 }
  0x2e   :  { %310 = vmatprep.mubr.msk.bf16.mxu0 %vm157_vm0, %v355_v19  ;;  %314 = vmatprep.mubr.msk.bf16.mxu1 %vm157_vm0, %v298_v20 }
  0x35   :  { %228 = vmatmul.mubr.bf16.gmra.mrb[8].mxu0 %v357_v21  ;;  %260 = vmatmul.mubr.bf16.gmra.mrb[8].mxu1 %v297_v22 }
  0x36   :  { %311 = vmatprep.mubr.msk.bf16.mxu0 %vm157_vm0, %v360_v23 }
  0x3d   :  { %236 = vmatmul.mubr.bf16.gmra.mrb[12].mxu0 %v362_v24 }
  0xf8   :  { %v213_v25 = vpop.f32.mrb[0].mxu0  ;;  %v245_v26 = vpop.f32.mrb[0].mxu1 }
  0xf9   :  { %268 = vst.msk [vmem:[%s506_s2] sm:$0xff] %vm267_vm1, %v213_v25  ;;  %v215_v27 = vpop.f32.mrb[1].mxu0  ;;  %276 = vst.msk [vmem:[%s506_s2 + $0x40] sm:$0xff] %vm267_vm1, %v245_v26  ;;  %v247_v28 = vpop.f32.mrb[1].mxu1 }
  0xfa   :  { %v216_v29 = vpop.f32.mrb[2].mxu0  ;;  %v248_v30 = vpop.f32.mrb[2].mxu1 }
  0xfb   :  { %269 = vst.msk [vmem:[%s506_s2 + $0x8] sm:$0xff] %vm267_vm1, %v216_v29  ;;  %v218_v31 = vpop.f32.mrb[3].mxu0  ;;  %277 = vst.msk [vmem:[%s506_s2 + $0x48] sm:$0xff] %vm267_vm1, %v248_v30  ;;  %v250_v32 = vpop.f32.mrb[3].mxu1 }
 0x100   :  { %v221_v33 = vpop.f32.mrb[4].mxu0  ;;  %v253_v34 = vpop.f32.mrb[4].mxu1 }
 0x101   :  { %270 = vst.msk [vmem:[%s506_s2 + $0x10] sm:$0xff] %vm267_vm1, %v221_v33  ;;  %v223_v35 = vpop.f32.mrb[5].mxu0  ;;  %278 = vst.msk [vmem:[%s506_s2 + $0x50] sm:$0xff] %vm267_vm1, %v253_v34  ;;  %v255_v36 = vpop.f32.mrb[5].mxu1 }
 0x102   :  { %v224_v37 = vpop.f32.mrb[6].mxu0  ;;  %v256_v38 = vpop.f32.mrb[6].mxu1 }
 0x103   :  { %271 = vst.msk [vmem:[%s506_s2 + $0x18] sm:$0xff] %vm267_vm1, %v224_v37  ;;  %v226_v39 = vpop.f32.mrb[7].mxu0  ;;  %279 = vst.msk [vmem:[%s506_s2 + $0x58] sm:$0xff] %vm267_vm1, %v256_v38  ;;  %v258_v40 = vpop.f32.mrb[7].mxu1 }
 0x108   :  { %v229_v41 = vpop.f32.mrb[8].mxu0  ;;  %v261_v42 = vpop.f32.mrb[8].mxu1 }
 0x109   :  { %272 = vst.msk [vmem:[%s506_s2 + $0x20] sm:$0xff] %vm267_vm1, %v229_v41  ;;  %v231_v43 = vpop.f32.mrb[9].mxu0  ;;  %280 = vst.msk [vmem:[%s506_s2 + $0x60] sm:$0xff] %vm267_vm1, %v261_v42  ;;  %v263_v44 = vpop.f32.mrb[9].mxu1 }
 0x10a   :  { %v232_v45 = vpop.f32.mrb[10].mxu0  ;;  %v264_v46 = vpop.f32.mrb[10].mxu1 }
 0x10b   :  { %273 = vst.msk [vmem:[%s506_s2 + $0x28] sm:$0xff] %vm267_vm1, %v232_v45  ;;  %v234_v47 = vpop.f32.mrb[11].mxu0  ;;  %v265_v48 = vpop.f32.mrb[11].mxu1 }
 0x110   :  { %v237_v49 = vpop.f32.mrb[12].mxu0 }
 0x111   :  { %274 = vst.msk [vmem:[%s506_s2 + $0x30] sm:$0xff] %vm267_vm1, %v237_v49  ;;  %v239_v50 = vpop.f32.mrb[13].mxu0 }
 0x112   :  { %v240_v51 = vpop.f32.mrb[14].mxu0 }
 0x113   :  { %275 = vst.msk [vmem:[%s506_s2 + $0x38] sm:$0xff] %vm267_vm1, %v240_v51  ;;  %v242_v52 = vpop.f32.mrb[15].mxu0 }

// kernel: sparsenet_forward.38
= control target key start
LH: loop header
LB: loop body
LE: loop exit
PB: predicated region body
PF: predicated region fallthrough
CT: control target
= control target key end

     0   :  { %vm120_vm0 = vcmask 1045504   ;;  %v283_v0 = vmov 0.0   ;;  %vm284_vm1 = vmmov 0   ;;  %vm98_vm2 = vcmask 97280   ;;  %s433_s3 = inlined_call_operand.vmem [shape: bf16[12,16], index: 3, kind: input, shape index: {}]   ;;  %s434_s0 = inlined_call_operand.vmem [shape: f32[104,12], index: 0, kind: input, shape index: {}]   ;;  %s435_s1 = inlined_call_operand.vmem [shape: f32[1,12], index: 1, kind: input, shape index: {}]   ;;  %s436_s2 = inlined_call_operand.vmem [shape: f32[1,12], index: 2, kind: input, shape index: {}]   ;;  %s437_s4 = inlined_call_operand.vmem [shape: f32[104,16], index: 4, kind: output, shape index: {}]  }
   0x1   :  { %248 = vmatprep.subr.bf16.mxu0 %v283_v0  ;;  %v282_v1 = vld [vmem:[%s433_s3] sm:$0x3f]   ;;  %250 = vmatprep.mubr.msk.bf16.mxu0 %vm284_vm1, %v283_v0  ;;  %v19_v3 = vld [vmem:[%s434_s0 + $0x8] sm:$0xff]  ;;  %v20_v13 = vld [vmem:[%s434_s0 + $0x10] sm:$0xff]  ;;  %vm212_vm3 = vcmask 130048  }
   0x2   :  { %v18_v2 = vld [vmem:[%s434_s0] sm:$0xff]  ;;  %278 = vmatprep.subr.bf16.mxu1 %v283_v0  ;;  %266 = vmatprep.mubr.msk.bf16.mxu1 %vm284_vm1, %v283_v0  ;;  %v122_v5 = vsel %vm120_vm0, %v282_v1, 0  ;;  %v27_v10 = vld [vmem:[%s434_s0 + $0x48] sm:$0xff]  ;;  %v21_v14 = vld [vmem:[%s434_s0 + $0x18] sm:$0xff] }
   0x3   :  { %v230_v4 = vld [vmem:[%s435_s1] ss:$0 sm:$0xff]  ;;  %249 = vmatpush3.bf16.msra.mxu0 %v122_v5  ;;  %279 = vmatpush3.bf16.msra.mxu1 %v122_v5  ;;  %v28_v15 = vld [vmem:[%s434_s0 + $0x50] sm:$0xff]  ;;  %v29_v20 = vld [vmem:[%s434_s0 + $0x58] sm:$0xff] }
   0x4   :  { %v38_v6 = vmul.f32 %v230_v4, %v18_v2  ;;  %v39_v7 = vmul.f32 %v230_v4, %v19_v3  ;;  %v231_v8 = vld [vmem:[%s436_s2] ss:$0 sm:$0xff]  ;;  %v47_v12 = vmul.f32 %v230_v4, %v27_v10  ;;  %v40_v18 = vmul.f32 %v230_v4, %v20_v13  ;;  %v23_v34 = vld [vmem:[%s434_s0 + $0x28] sm:$0xff]  ;;  %v24_v50 = vld [vmem:[%s434_s0 + $0x30] sm:$0xff] }
   0x5   :  { %v26_v9 = vld [vmem:[%s434_s0 + $0x40] sm:$0xff]  ;;  %v41_v19 = vmul.f32 %v230_v4, %v21_v14  ;;  %v48_v23 = vmul.f32 %v230_v4, %v28_v15  ;;  %v49_v24 = vmul.f32 %v230_v4, %v29_v20  ;;  %v43_v41 = vmul.f32 %v230_v4, %v23_v34  ;;  %v25_v51 = vld [vmem:[%s434_s0 + $0x38] sm:$0xff] }
   0x6   :  { %v46_v11 = vmul.f32 %v230_v4, %v26_v9  ;;  %v58_v16 = vadd.f32 %v231_v8, %v38_v6  ;;  %v59_v17 = vadd.f32 %v231_v8, %v39_v7  ;;  %v67_v22 = vadd.f32 %v231_v8, %v47_v12  ;;  %v22_v33 = vld [vmem:[%s434_s0 + $0x20] sm:$0xff] }
   0x7   :  { %v60_v27 = vadd.f32 %v231_v8, %v40_v18  ;;  %v61_v28 = vadd.f32 %v231_v8, %v41_v19  ;;  %v68_v31 = vadd.f32 %v231_v8, %v48_v23  ;;  %v69_v32 = vadd.f32 %v231_v8, %v49_v24  ;;  %v30_v36 = vld [vmem:[%s434_s0 + $0x60] sm:$0xff] }
   0x8   :  { %v66_v21 = vadd.f32 %v231_v8, %v46_v11  ;;  %v71_v25 = vmax.f32 %v58_v16, 0.0  ;;  %v72_v26 = vmax.f32 %v59_v17, 0.0  ;;  %v80_v30 = vmax.f32 %v67_v22, 0.0 }
   0x9   :  { %v73_v38 = vmax.f32 %v60_v27, 0.0  ;;  %v74_v39 = vmax.f32 %v61_v28, 0.0  ;;  %v42_v40 = vmul.f32 %v230_v4, %v22_v33  ;;  %v81_v42 = vmax.f32 %v68_v31, 0.0 }
   0xa   :  { %v79_v29 = vmax.f32 %v66_v21, 0.0  ;;  %v84_v35 = vpack.c.bf16 %v72_v26, %v71_v25  ;;  %v82_v43 = vmax.f32 %v69_v32, 0.0  ;;  %v50_v44 = vmul.f32 %v230_v4, %v30_v36 }
   0xb   :  { %v85_v45 = vpack.c.bf16 %v74_v39, %v73_v38  ;;  %v62_v46 = vadd.f32 %v231_v8, %v42_v40  ;;  %v63_v47 = vadd.f32 %v231_v8, %v43_v41  ;;  %v44_v54 = vmul.f32 %v230_v4, %v24_v50 }
   0xc   :  { %v88_v37 = vpack.c.bf16 %v80_v30, %v79_v29  ;;  %251 = vmatmul.mubr.msk.bf16.vlgmr.msra.gmra.mrb[0].mxu0 %vm98_vm2, %v84_v35  ;;  %v89_v48 = vpack.c.bf16 %v82_v43, %v81_v42  ;;  %v70_v49 = vadd.f32 %v231_v8, %v50_v44  ;;  %v45_v55 = vmul.f32 %v230_v4, %v25_v51 }
   0xd   :  { %254 = vmatprep.mubr.msk.bf16.mxu0 %vm284_vm1, %v283_v0  ;;  %v75_v52 = vmax.f32 %v62_v46, 0.0  ;;  %v76_v53 = vmax.f32 %v63_v47, 0.0  ;;  %v64_v58 = vadd.f32 %v231_v8, %v44_v54 }
   0xe   :  { %267 = vmatmul.mubr.msk.bf16.vlgmr.msra.gmra.mrb[0].mxu1 %vm98_vm2, %v88_v37  ;;  %v83_v56 = vmax.f32 %v70_v49, 0.0  ;;  %v65_v59 = vadd.f32 %v231_v8, %v45_v55 }
   0xf   :  { %270 = vmatprep.mubr.msk.bf16.mxu1 %vm284_vm1, %v283_v0  ;;  %v86_v57 = vpack.c.bf16 %v76_v53, %v75_v52  ;;  %v77_v61 = vmax.f32 %v64_v58, 0.0 }
  0x10   :  { %v90_v60 = vpack.c.bf16 %v83_v56, %v83_v56  ;;  %v78_v62 = vmax.f32 %v65_v59, 0.0 }
  0x12   :  { %v87_v63 = vpack.c.bf16 %v78_v62, %v77_v61 }
  0x14   :  { %255 = vmatmul.mubr.msk.bf16.gmra.mrb[4].mxu0 %vm98_vm2, %v85_v45 }
  0x15   :  { %258 = vmatprep.mubr.msk.bf16.mxu0 %vm284_vm1, %v283_v0 }
  0x16   :  { %271 = vmatmul.mubr.msk.bf16.gmra.mrb[4].mxu1 %vm98_vm2, %v89_v48 }
  0x17   :  { %274 = vmatprep.mubr.msk.bf16.mxu1 %vm284_vm1, %v283_v0 }
  0x1c   :  { %259 = vmatmul.mubr.msk.bf16.gmra.mrb[8].mxu0 %vm98_vm2, %v86_v57 }
  0x1d   :  { %262 = vmatprep.mubr.msk.bf16.mxu0 %vm284_vm1, %v283_v0 }
  0x1e   :  { %275 = vmatmul.mubr.msk.bf16.gmra.mrb[8].mxu1 %vm98_vm2, %v90_v60 }
  0x24   :  { %263 = vmatmul.mubr.msk.bf16.gmra.mrb[12].mxu0 %vm98_vm2, %v87_v63 }
  0xdf   :  { %v158_v1 = vpop.f32.mrb[0].mxu0 }
  0xe0   :  { %213 = vst.msk [vmem:[%s437_s4] sm:$0xff] %vm212_vm3, %v158_v1  ;;  %v252_v2 = vpop.f32.mrb[1].mxu0 }
  0xe1   :  { %v190_v3 = vpop.f32.mrb[0].mxu1  ;;  %v161_v4 = vpop.f32.mrb[2].mxu0 }
  0xe2   :  { %221 = vst.msk [vmem:[%s437_s4 + $0x40] sm:$0xff] %vm212_vm3, %v190_v3  ;;  %v268_v5 = vpop.f32.mrb[1].mxu1  ;;  %214 = vst.msk [vmem:[%s437_s4 + $0x8] sm:$0xff] %vm212_vm3, %v161_v4  ;;  %v253_v0 = vpop.f32.mrb[3].mxu0 }
  0xe3   :  { %v193_v6 = vpop.f32.mrb[2].mxu1 }
  0xe4   :  { %222 = vst.msk [vmem:[%s437_s4 + $0x48] sm:$0xff] %vm212_vm3, %v193_v6  ;;  %v269_v7 = vpop.f32.mrb[3].mxu1 }
  0xe7   :  { %v166_v8 = vpop.f32.mrb[4].mxu0 }
  0xe8   :  { %215 = vst.msk [vmem:[%s437_s4 + $0x10] sm:$0xff] %vm212_vm3, %v166_v8  ;;  %v256_v9 = vpop.f32.mrb[5].mxu0 }
  0xe9   :  { %v198_v10 = vpop.f32.mrb[4].mxu1  ;;  %v169_v11 = vpop.f32.mrb[6].mxu0 }
  0xea   :  { %223 = vst.msk [vmem:[%s437_s4 + $0x50] sm:$0xff] %vm212_vm3, %v198_v10  ;;  %v272_v12 = vpop.f32.mrb[5].mxu1  ;;  %216 = vst.msk [vmem:[%s437_s4 + $0x18] sm:$0xff] %vm212_vm3, %v169_v11  ;;  %v257_v13 = vpop.f32.mrb[7].mxu0 }
  0xeb   :  { %v201_v14 = vpop.f32.mrb[6].mxu1 }
  0xec   :  { %224 = vst.msk [vmem:[%s437_s4 + $0x58] sm:$0xff] %vm212_vm3, %v201_v14  ;;  %v273_v15 = vpop.f32.mrb[7].mxu1 }
  0xef   :  { %v174_v16 = vpop.f32.mrb[8].mxu0 }
  0xf0   :  { %217 = vst.msk [vmem:[%s437_s4 + $0x20] sm:$0xff] %vm212_vm3, %v174_v16  ;;  %v260_v17 = vpop.f32.mrb[9].mxu0 }
  0xf1   :  { %v206_v18 = vpop.f32.mrb[8].mxu1  ;;  %v177_v19 = vpop.f32.mrb[10].mxu0 }
  0xf2   :  { %225 = vst.msk [vmem:[%s437_s4 + $0x60] sm:$0xff] %vm212_vm3, %v206_v18  ;;  %v276_v20 = vpop.f32.mrb[9].mxu1  ;;  %218 = vst.msk [vmem:[%s437_s4 + $0x28] sm:$0xff] %vm212_vm3, %v177_v19  ;;  %v261_v21 = vpop.f32.mrb[11].mxu0 }
  0xf3   :  { %v209_v22 = vpop.f32.mrb[10].mxu1 }
  0xf4   :  { %v277_v23 = vpop.f32.mrb[11].mxu1 }
  0xf7   :  { %v182_v24 = vpop.f32.mrb[12].mxu0 }
  0xf8   :  { %219 = vst.msk [vmem:[%s437_s4 + $0x30] sm:$0xff] %vm212_vm3, %v182_v24  ;;  %v264_v25 = vpop.f32.mrb[13].mxu0 }
  0xf9   :  { %v185_v26 = vpop.f32.mrb[14].mxu0 }
  0xfa   :  { %220 = vst.msk [vmem:[%s437_s4 + $0x38] sm:$0xff] %vm212_vm3, %v185_v26  ;;  %v265_v27 = vpop.f32.mrb[15].mxu0 }

// kernel: sparsenet_forward.45
= control target key start
LH: loop header
LB: loop body
LE: loop exit
PB: predicated region body
PF: predicated region fallthrough
CT: control target
= control target key end

     0   :  { %v85_v0 = vmov 0.0   ;;  %vm86_vm0 = vmmov 0   ;;  %vm22_vm1 = vcmask 130048   ;;  %vm66_vm2 = vcmask 80896   ;;  %s111_s1 = inlined_call_operand.vmem [shape: bf16[16,10], index: 1, kind: input, shape index: {}]   ;;  %s112_s0 = inlined_call_operand.vmem [shape: f32[8,16], index: 0, kind: input, shape index: {}]   ;;  %s113_s2 = inlined_call_operand.vmem [shape: f32[8,10], index: 2, kind: output, shape index: {}]  }
   0x1   :  { %76 = vmatprep.subr.bf16.mxu0 %v85_v0  ;;  %v84_v1 = vld [vmem:[%s111_s1] sm:$0xff]   ;;  %78 = vmatprep.mubr.msk.bf16.mxu0 %vm86_vm0, %v85_v0 }
   0x2   :  { %v12_v2 = vld [vmem:[%s112_s0] sm:$0xff]  ;;  %77 = vmatpush3.bf16.msra.mxu0 %v84_v1 }
   0x3   :  { %v13_v3 = vpack.c.bf16 %v12_v2, %v12_v2 }
   0x5   :  { %79 = vmatmul.mubr.msk.bf16.vlgmr.msra.gmra.mrb[0].mxu0 %vm22_vm1, %v13_v3 }
  0xd8   :  { %v60_v4 = vpop.f32.mrb[0].mxu0 }
  0xd9   :  { %67 = vst.msk [vmem:[%s113_s2] sm:$0xff] %vm66_vm2, %v60_v4  ;;  %v80_v5 = vpop.f32.mrb[1].mxu0 }
  0xda   :  { %v63_v6 = vpop.f32.mrb[2].mxu0 }
  0xdb   :  { %v81_v7 = vpop.f32.mrb[3].mxu0 }

</bundles_post_ra>
